<compile_context>
chip_gen: v7x
topology: tpu7x:2x2x1
jax: 0.10.0
libtpu: 0.0.40
codegen_flags: <defaults>
</compile_context>

<pallas_src>
import functools

import jax
import jax.numpy as jnp
import numpy as np
from jax import lax
from jax.experimental import pallas as pl
from jax.experimental.pallas import tpu as pltpu


def resnet_pointnet_kernel(
    p_ref,       # (Bb, Tp, 3)   f32  point-cloud block
    wpa_ref,     # (3, Hp)       f32  fc_pos weight, outputs [0:H)
    wpb_ref,     # (3, Hp)       f32  fc_pos weight, outputs [H:2H)
    bpa_ref,     # (1, Hp)       f32
    bpb_ref,     # (1, Hp)       f32
    w0a_ref,     # (5, Hp, Hp)   bf16 fc_0 weight rows [0:H)  ("net" half)
    w0b_ref,     # (5, Hp, Hp)   bf16 fc_0 weight rows [H:2H) ("pooled" half)
    b0_ref,      # (5, 1, Hp)    f32
    w1_ref,      # (5, Hp, Hp)   bf16 fc_1
    b1_ref,      # (5, 1, Hp)    f32
    wsa_ref,     # (5, Hp, Hp)   bf16 shortcut rows [0:H)
    wsb_ref,     # (5, Hp, Hp)   bf16 shortcut rows [H:2H)
    wc_ref,      # (Hp, Cp)      bf16 fc_c
    bc_ref,      # (1, Cp)       f32
    o_ref,       # (Bb, Cp)      f32
    *,
    t_valid,     # real (unpadded) number of points per cloud, static
):
    Bb, Tp, _ = p_ref.shape
    Hp = wpa_ref.shape[1]
    M = Bb * Tp
    inv_t = 1.0 / float(t_valid)

    relu = lambda v: jnp.maximum(v, 0.0)
    # MXU matmul: bf16 operands, f32 accumulation; elementwise math stays f32.
    mm = lambda a, b: jnp.dot(a.astype(jnp.bfloat16), b,
                              preferred_element_type=jnp.float32)

    def expand(v):
        # (Bb, Hp) per-cloud values -> (Bb*Tp, Hp): repeat each cloud row Tp times.
        return jnp.broadcast_to(v[:, None, :], (Bb, Tp, Hp)).reshape(M, Hp)

    def pool(x):
        # Mean over the Tp points of each cloud: (Bb*Tp, Hp) -> (Bb, Hp), f32.
        x3 = x.reshape(Bb, Tp, Hp)
        if Tp != t_valid:   # static branch: T was padded, mask pad rows out
            row = lax.broadcasted_iota(jnp.int32, (1, Tp, 1), 1)
            x3 = jnp.where(row < t_valid, x3, 0.0)
        return jnp.sum(x3, axis=1) * inv_t

    # fc_pos (K=3) on the VPU, once per grid step for the whole (Bb*Tp) slab
    # (a K=3 MXU pass is pure fill/drain).
    pts = p_ref[...].reshape(M, 3)
    px, py, pz = pts[:, 0:1], pts[:, 1:2], pts[:, 2:3]
    net_a = (px * wpa_ref[0:1, :] + py * wpa_ref[1:2, :]
             + pz * wpa_ref[2:3, :] + bpa_ref[...])              # (M, Hp)
    net_b = (px * wpb_ref[0:1, :] + py * wpb_ref[1:2, :]
             + pz * wpb_ref[2:3, :] + bpb_ref[...])              # (M, Hp)

    # Block 0: both halves are per-point -> plain (M, Hp) x (Hp, Hp) matmuls.
    # (On v6e/v7x the two K=Hp passes could be fused into one K=2Hp matmul; the
    #  split form is kept so the same kernel stays optimal on v5e's 128-deep MXU.)
    h = mm(relu(net_a), w0a_ref[0]) + mm(relu(net_b), w0b_ref[0]) + b0_ref[0]
    dx = mm(relu(h), w1_ref[0]) + b1_ref[0]
    net = mm(net_a, wsa_ref[0]) + mm(net_b, wsb_ref[0]) + dx     # (M, Hp)

    # Blocks 1..4: the pooled half is per-cloud -> batched (Bb, Hp) matmuls,
    # broadcast back over the Tp points of each cloud (no (M, 2Hp) concat).
    for i in range(1, 5):
        pooled = pool(net)                                       # (Bb, Hp)
        h = (mm(relu(net), w0a_ref[i])
             + expand(mm(relu(pooled), w0b_ref[i])) + b0_ref[i])
        dx = mm(relu(h), w1_ref[i]) + b1_ref[i]
        net = (mm(net, wsa_ref[i])
               + expand(mm(pooled, wsb_ref[i])) + dx)            # (M, Hp)

    # Final pool + fc_c: one (Bb, Hp) @ (Hp, Cp) matmul, one lane-dense store.
    pooled = pool(net)
    o_ref[...] = (mm(relu(pooled), wc_ref[...]) + bc_ref[...]).astype(o_ref.dtype)


def _round_up(x, m):
    return ((x + m - 1) // m) * m


def resnet_pointnet_pallas(p, params, *, block_b=8):
    """ResnetPointnet forward.  p: (B, T, 3) f32 -> (B, c_dim) f32."""
    B, T, D = p.shape
    assert D == 3
    H = params["w0"].shape[2]
    C = params["wc"].shape[1]
    f32, bf16 = jnp.float32, jnp.bfloat16

    # Lane-dense padding (exact: relu(0)=0, zero rows/cols contribute nothing).
    Hp = _round_up(H, 128)
    Cp = _round_up(C, 128)
    Tp = _round_up(T, 8)

    def pad2(w, rows, cols):
        return jnp.pad(w.astype(f32),
                       ((0, rows - w.shape[0]), (0, cols - w.shape[1])))

    def pad3(w, rows, cols):
        return jnp.pad(w.astype(f32),
                       ((0, 0), (0, rows - w.shape[1]), (0, cols - w.shape[2])))

    # Split every 2H weight into "net"/"pooled" halves; matmul weights -> bf16.
    wpos, bpos = params["wpos"], params["bpos"]                 # (3, 2H), (1, 2H)
    wpa = pad2(wpos[:, :H], 3, Hp)
    wpb = pad2(wpos[:, H:], 3, Hp)
    bpa = pad2(bpos[:, :H], 1, Hp)
    bpb = pad2(bpos[:, H:], 1, Hp)
    w0, ws = params["w0"], params["ws"]                         # (5, 2H, H)
    w0a = pad3(w0[:, :H, :], Hp, Hp).astype(bf16)
    w0b = pad3(w0[:, H:, :], Hp, Hp).astype(bf16)
    wsa = pad3(ws[:, :H, :], Hp, Hp).astype(bf16)
    wsb = pad3(ws[:, H:, :], Hp, Hp).astype(bf16)
    w1 = pad3(params["w1"], Hp, Hp).astype(bf16)                # (5, H, H)
    b0 = pad3(params["b0"], 1, Hp)
    b1 = pad3(params["b1"], 1, Hp)
    wc = pad2(params["wc"], Hp, Cp).astype(bf16)                # (H, C)
    bc = pad2(params["bc"], 1, Cp)

    # Per-generation VMEM budget (v7x 64 MiB/TC; v5e/v6e 128 MiB).
    try:
        vmem_cap = int(pltpu.get_tpu_info().vmem_capacity_bytes)
    except Exception:
        vmem_cap = 64 * 1024 * 1024
    vmem_limit = min(vmem_cap * 3 // 4, 100 * 1024 * 1024)

    # Batch blocking: Bb clouds per grid step, sized so batched activations,
    # the lane-padded points tile (3 -> 128 lanes) and the weights fit.
    def est_vmem(bb):
        act = 5 * bb * Tp * Hp * 4              # ~5 live f32 (Bb*Tp, Hp) slabs
        pts = 2 * bb * Tp * 128 * 4             # points tile (lane-padded), 2 bufs
        wts = 25 * Hp * Hp * 2 + Hp * Cp * 2    # bf16 matmul weights
        out = 2 * bb * Cp * 4
        return act + pts + wts + out + (4 << 20)

    Bb = max(8, block_b)
    while Bb > 8 and est_vmem(Bb) > vmem_limit:
        Bb //= 2
    Bpad = _round_up(B, Bb)

    p = p.astype(f32)
    if (Bpad, Tp) != (B, T):
        p = jnp.pad(p, ((0, Bpad - B), (0, Tp - T), (0, 0)))

    args = (p, wpa, wpb, bpa, bpb, w0a, w0b, b0, w1, b1, wsa, wsb, wc, bc)

    def make_grid_spec(single_buffer_weights):
        def wspec(shape):
            nd = len(shape)
            imap = lambda b, _nd=nd: (0,) * _nd
            if single_buffer_weights:
                # Grid-invariant weights: don't double-buffer them in VMEM.
                return pl.BlockSpec(shape, imap, pipeline_mode=pl.Buffered(1))
            return pl.BlockSpec(shape, imap)

        return pltpu.PrefetchScalarGridSpec(
            num_scalar_prefetch=0,
            grid=(Bpad // Bb,),
            in_specs=[
                pl.BlockSpec((Bb, Tp, 3), lambda b: (b, 0, 0)),           # points
                wspec((3, Hp)), wspec((3, Hp)),                           # wpos halves
                wspec((1, Hp)), wspec((1, Hp)),                           # bpos halves
                wspec((5, Hp, Hp)), wspec((5, Hp, Hp)), wspec((5, 1, Hp)),  # w0a,w0b,b0
                wspec((5, Hp, Hp)), wspec((5, 1, Hp)),                    # w1, b1
                wspec((5, Hp, Hp)), wspec((5, Hp, Hp)),                   # wsa, wsb
                wspec((Hp, Cp)), wspec((1, Cp)),                          # wc, bc
            ],
            out_specs=pl.BlockSpec((Bb, Cp), lambda b: (b, 0)),
        )

    # Advisory cost hint for XLA scheduling around the custom call.
    m_tot = Bpad * Tp
    cost = pl.CostEstimate(
        flops=int(50 * m_tot * Hp * Hp + 12 * m_tot * Hp + 2 * Bpad * Hp * Cp),
        transcendentals=0,
        bytes_accessed=int(Bpad * Tp * 3 * 4 + 25 * Hp * Hp * 2 + Hp * Cp * 2
                           + 14 * Hp * 4 + 2 * Cp * 4 + Bpad * Cp * 4),
    )

    compiler_params = pltpu.CompilerParams(
        dimension_semantics=("parallel",),        # batch grid splits across TCs (v7x)
        vmem_limit_bytes=int(vmem_limit),
    )

    kernel = functools.partial(resnet_pointnet_kernel, t_valid=T)

    def run(single_buffer_weights):
        return pl.pallas_call(
            kernel,
            out_shape=jax.ShapeDtypeStruct((Bpad, Cp), f32),
            grid_spec=make_grid_spec(single_buffer_weights),
            compiler_params=compiler_params,
            cost_estimate=cost,
        )(*args)

    if hasattr(pl, "Buffered"):
        try:
            out = run(True)
        except (TypeError, ValueError, NotImplementedError, pltpu.LoweringException):
            # Only the optional pipeline_mode=pl.Buffered(1) feature falls back;
            # a genuine kernel error recurs on the fallback path and propagates.
            out = run(False)
    else:
        out = run(False)

    return out[:B, :C]


def resnet_pointnet_reference(p, params):
    """Pure-JAX f32 reference mirroring the PyTorch forward (concat + blocks)."""
    relu = lambda v: jnp.maximum(v, 0.0)

    def block(x, i):
        h = relu(x) @ params["w0"][i] + params["b0"][i]
        dx = relu(h) @ params["w1"][i] + params["b1"][i]
        xs = x @ params["ws"][i]
        return xs + dx

    net = p @ params["wpos"] + params["bpos"]
    net = block(net, 0)
    for i in range(1, 5):
        pooled = jnp.mean(net, axis=1, keepdims=True)
        net = jnp.concatenate([net, jnp.broadcast_to(pooled, net.shape)], axis=-1)
        net = block(net, i)
    net = jnp.mean(net, axis=1)
    return relu(net) @ params["wc"] + params["bc"]


def make_params(key, hidden_dim, c_dim):
    H = hidden_dim
    H2 = 2 * H
    ks = jax.random.split(key, 10)
    scale = 0.1
    return {
        "wpos": scale * jax.random.normal(ks[0], (3, H2), jnp.float32),
        "bpos": scale * jax.random.normal(ks[1], (1, H2), jnp.float32),
        "w0":   scale * jax.random.normal(ks[2], (5, H2, H), jnp.float32),
        "b0":   scale * jax.random.normal(ks[3], (5, 1, H), jnp.float32),
        # The PyTorch module zero-initializes fc_1.weight at construction; small
        # random values are used here so the fc_1 matmul path is validated too.
        "w1":   scale * jax.random.normal(ks[4], (5, H, H), jnp.float32),
        "b1":   scale * jax.random.normal(ks[5], (5, 1, H), jnp.float32),
        "ws":   scale * jax.random.normal(ks[6], (5, H2, H), jnp.float32),
        "wc":   scale * jax.random.normal(ks[7], (H, c_dim), jnp.float32),
        "bc":   scale * jax.random.normal(ks[8], (1, c_dim), jnp.float32),
    }


if __name__ == "__main__":
    B, T, D = 16, 16, 3            # 16 clouds -> 2 grid steps of Bb=8 (exercises megacore)
    hidden_dim = 32
    c_dim = 16

    key = jax.random.PRNGKey(0)
    kp, kw = jax.random.split(key)
    p = jax.random.normal(kp, (B, T, D), jnp.float32)
    params = make_params(kw, hidden_dim, c_dim)

    out = resnet_pointnet_pallas(p, params)
    out = jax.block_until_ready(out)

    ref = resnet_pointnet_reference(p, params)
    assert out.shape == (B, c_dim)
    max_err = float(jnp.max(jnp.abs(out - ref)))
    # bf16 MXU operands with f32 accumulation -> relaxed tolerance vs f32 reference.
    assert np.allclose(np.asarray(out), np.asarray(ref), atol=3e-2, rtol=3e-2), \
        f"Pallas output does not match JAX reference (max abs err {max_err:.2e})"
    print("KERNEL_OK")
</pallas_src>

<mosaic_0001>
module attributes {stable_mosaic.version = 11 : i64} {
  func.func @resnet_pointnet_kernel(%arg0: i32, %arg1: memref<8x16x3xf32, #tpu.memory_space<vmem>>, %arg2: memref<3x128xf32, #tpu.memory_space<vmem>>, %arg3: memref<3x128xf32, #tpu.memory_space<vmem>>, %arg4: memref<1x128xf32, #tpu.memory_space<vmem>>, %arg5: memref<1x128xf32, #tpu.memory_space<vmem>>, %arg6: memref<5x128x128xbf16, #tpu.memory_space<vmem>>, %arg7: memref<5x128x128xbf16, #tpu.memory_space<vmem>>, %arg8: memref<5x1x128xf32, #tpu.memory_space<vmem>>, %arg9: memref<5x128x128xbf16, #tpu.memory_space<vmem>>, %arg10: memref<5x1x128xf32, #tpu.memory_space<vmem>>, %arg11: memref<5x128x128xbf16, #tpu.memory_space<vmem>>, %arg12: memref<5x128x128xbf16, #tpu.memory_space<vmem>>, %arg13: memref<128x128xbf16, #tpu.memory_space<vmem>>, %arg14: memref<1x128xf32, #tpu.memory_space<vmem>>, %arg15: memref<8x128xf32, #tpu.memory_space<vmem>>) attributes {dimension_semantics = [#tpu.dimension_semantics<parallel>], iteration_bounds = array<i64: 2>, scalar_prefetch = 0 : i64, scratch_operands = 0 : i64, tpu.core_type = #tpu.core_type<tc>, window_params = [{transform_indices = @transform_0, window_bounds = array<i64: 8, 16, 3>}, {pipeline_mode = #tpu.pipeline_mode<synchronous>, transform_indices = @transform_1, window_bounds = array<i64: 3, 128>}, {pipeline_mode = #tpu.pipeline_mode<synchronous>, transform_indices = @transform_2, window_bounds = array<i64: 3, 128>}, {pipeline_mode = #tpu.pipeline_mode<synchronous>, transform_indices = @transform_3, window_bounds = array<i64: 1, 128>}, {pipeline_mode = #tpu.pipeline_mode<synchronous>, transform_indices = @transform_4, window_bounds = array<i64: 1, 128>}, {pipeline_mode = #tpu.pipeline_mode<synchronous>, transform_indices = @transform_5, window_bounds = array<i64: 5, 128, 128>}, {pipeline_mode = #tpu.pipeline_mode<synchronous>, transform_indices = @transform_6, window_bounds = array<i64: 5, 128, 128>}, {pipeline_mode = #tpu.pipeline_mode<synchronous>, transform_indices = @transform_7, window_bounds = array<i64: 5, 1, 128>}, {pipeline_mode = #tpu.pipeline_mode<synchronous>, transform_indices = @transform_8, window_bounds = array<i64: 5, 128, 128>}, {pipeline_mode = #tpu.pipeline_mode<synchronous>, transform_indices = @transform_9, window_bounds = array<i64: 5, 1, 128>}, {pipeline_mode = #tpu.pipeline_mode<synchronous>, transform_indices = @transform_10, window_bounds = array<i64: 5, 128, 128>}, {pipeline_mode = #tpu.pipeline_mode<synchronous>, transform_indices = @transform_11, window_bounds = array<i64: 5, 128, 128>}, {pipeline_mode = #tpu.pipeline_mode<synchronous>, transform_indices = @transform_12, window_bounds = array<i64: 128, 128>}, {pipeline_mode = #tpu.pipeline_mode<synchronous>, transform_indices = @transform_13, window_bounds = array<i64: 1, 128>}, {transform_indices = @transform_14, window_bounds = array<i64: 8, 128>}]} {
    %c0 = arith.constant 0 : index
    %c0_0 = arith.constant 0 : index
    %c0_1 = arith.constant 0 : index
    %0 = vector.load %arg1[%c0, %c0_0, %c0_1] : memref<8x16x3xf32, #tpu.memory_space<vmem>>, vector<8x16x3xf32>
    %1 = vector.shape_cast %0 : vector<8x16x3xf32> to vector<128x3xf32>
    %2 = vector.extract_strided_slice %1 {offsets = [0, 0], sizes = [128, 1], strides = [1, 1]} : vector<128x3xf32> to vector<128x1xf32>
    %3 = vector.extract_strided_slice %1 {offsets = [0, 1], sizes = [128, 1], strides = [1, 1]} : vector<128x3xf32> to vector<128x1xf32>
    %4 = vector.extract_strided_slice %1 {offsets = [0, 2], sizes = [128, 1], strides = [1, 1]} : vector<128x3xf32> to vector<128x1xf32>
    %c0_2 = arith.constant 0 : index
    %c0_3 = arith.constant 0 : index
    %5 = vector.load %arg2[%c0_2, %c0_3] : memref<3x128xf32, #tpu.memory_space<vmem>>, vector<1x128xf32>
    %6 = vector.broadcast %2 : vector<128x1xf32> to vector<128x128xf32>
    %7 = vector.broadcast %5 : vector<1x128xf32> to vector<128x128xf32>
    %8 = arith.mulf %6, %7 : vector<128x128xf32>
    %c1 = arith.constant 1 : index
    %c0_4 = arith.constant 0 : index
    %9 = vector.load %arg2[%c1, %c0_4] : memref<3x128xf32, #tpu.memory_space<vmem>>, vector<1x128xf32>
    %10 = vector.broadcast %3 : vector<128x1xf32> to vector<128x128xf32>
    %11 = vector.broadcast %9 : vector<1x128xf32> to vector<128x128xf32>
    %12 = arith.mulf %10, %11 : vector<128x128xf32>
    %13 = arith.addf %8, %12 : vector<128x128xf32>
    %c2 = arith.constant 2 : index
    %c0_5 = arith.constant 0 : index
    %14 = vector.load %arg2[%c2, %c0_5] : memref<3x128xf32, #tpu.memory_space<vmem>>, vector<1x128xf32>
    %15 = vector.broadcast %4 : vector<128x1xf32> to vector<128x128xf32>
    %16 = vector.broadcast %14 : vector<1x128xf32> to vector<128x128xf32>
    %17 = arith.mulf %15, %16 : vector<128x128xf32>
    %18 = arith.addf %13, %17 : vector<128x128xf32>
    %c0_6 = arith.constant 0 : index
    %c0_7 = arith.constant 0 : index
    %19 = vector.load %arg4[%c0_6, %c0_7] : memref<1x128xf32, #tpu.memory_space<vmem>>, vector<1x128xf32>
    %20 = vector.broadcast %19 : vector<1x128xf32> to vector<128x128xf32>
    %21 = arith.addf %18, %20 : vector<128x128xf32>
    %c0_8 = arith.constant 0 : index
    %c0_9 = arith.constant 0 : index
    %22 = vector.load %arg3[%c0_8, %c0_9] : memref<3x128xf32, #tpu.memory_space<vmem>>, vector<1x128xf32>
    %23 = vector.broadcast %2 : vector<128x1xf32> to vector<128x128xf32>
    %24 = vector.broadcast %22 : vector<1x128xf32> to vector<128x128xf32>
    %25 = arith.mulf %23, %24 : vector<128x128xf32>
    %c1_10 = arith.constant 1 : index
    %c0_11 = arith.constant 0 : index
    %26 = vector.load %arg3[%c1_10, %c0_11] : memref<3x128xf32, #tpu.memory_space<vmem>>, vector<1x128xf32>
    %27 = vector.broadcast %3 : vector<128x1xf32> to vector<128x128xf32>
    %28 = vector.broadcast %26 : vector<1x128xf32> to vector<128x128xf32>
    %29 = arith.mulf %27, %28 : vector<128x128xf32>
    %30 = arith.addf %25, %29 : vector<128x128xf32>
    %c2_12 = arith.constant 2 : index
    %c0_13 = arith.constant 0 : index
    %31 = vector.load %arg3[%c2_12, %c0_13] : memref<3x128xf32, #tpu.memory_space<vmem>>, vector<1x128xf32>
    %32 = vector.broadcast %4 : vector<128x1xf32> to vector<128x128xf32>
    %33 = vector.broadcast %31 : vector<1x128xf32> to vector<128x128xf32>
    %34 = arith.mulf %32, %33 : vector<128x128xf32>
    %35 = arith.addf %30, %34 : vector<128x128xf32>
    %c0_14 = arith.constant 0 : index
    %c0_15 = arith.constant 0 : index
    %36 = vector.load %arg5[%c0_14, %c0_15] : memref<1x128xf32, #tpu.memory_space<vmem>>, vector<1x128xf32>
    %37 = vector.broadcast %36 : vector<1x128xf32> to vector<128x128xf32>
    %38 = arith.addf %35, %37 : vector<128x128xf32>
    %cst = arith.constant 0.000000e+00 : f32
    %39 = vector.broadcast %cst : f32 to vector<128x128xf32>
    %40 = arith.maximumf %21, %39 : vector<128x128xf32>
    %c0_16 = arith.constant 0 : index
    %c0_17 = arith.constant 0 : index
    %c0_18 = arith.constant 0 : index
    %41 = vector.load %arg6[%c0_16, %c0_17, %c0_18] : memref<5x128x128xbf16, #tpu.memory_space<vmem>>, vector<1x128x128xbf16>
    %42 = vector.shape_cast %41 : vector<1x128x128xbf16> to vector<128x128xbf16>
    %43 = arith.truncf %40 : vector<128x128xf32> to vector<128x128xbf16>
    %cst_19 = arith.constant dense<0.000000e+00> : vector<128x128xf32>
    %44 = tpu.matmul %43, %42, %cst_19 {dimension_numbers = #tpu.dot_dimension_numbers<[1], [0], [0], [1], [0, 0, 1, 1], [], []>} : vector<128x128xbf16>, vector<128x128xbf16>, vector<128x128xf32> -> vector<128x128xf32>
    %cst_20 = arith.constant 0.000000e+00 : f32
    %45 = vector.broadcast %cst_20 : f32 to vector<128x128xf32>
    %46 = arith.maximumf %38, %45 : vector<128x128xf32>
    %c0_21 = arith.constant 0 : index
    %c0_22 = arith.constant 0 : index
    %c0_23 = arith.constant 0 : index
    %47 = vector.load %arg7[%c0_21, %c0_22, %c0_23] : memref<5x128x128xbf16, #tpu.memory_space<vmem>>, vector<1x128x128xbf16>
    %48 = vector.shape_cast %47 : vector<1x128x128xbf16> to vector<128x128xbf16>
    %49 = arith.truncf %46 : vector<128x128xf32> to vector<128x128xbf16>
    %cst_24 = arith.constant dense<0.000000e+00> : vector<128x128xf32>
    %50 = tpu.matmul %49, %48, %cst_24 {dimension_numbers = #tpu.dot_dimension_numbers<[1], [0], [0], [1], [0, 0, 1, 1], [], []>} : vector<128x128xbf16>, vector<128x128xbf16>, vector<128x128xf32> -> vector<128x128xf32>
    %51 = arith.addf %44, %50 : vector<128x128xf32>
    %c0_25 = arith.constant 0 : index
    %c0_26 = arith.constant 0 : index
    %c0_27 = arith.constant 0 : index
    %52 = vector.load %arg8[%c0_25, %c0_26, %c0_27] : memref<5x1x128xf32, #tpu.memory_space<vmem>>, vector<1x1x128xf32>
    %53 = vector.shape_cast %52 : vector<1x1x128xf32> to vector<1x128xf32>
    %54 = vector.broadcast %53 : vector<1x128xf32> to vector<128x128xf32>
    %55 = arith.addf %51, %54 : vector<128x128xf32>
    %cst_28 = arith.constant 0.000000e+00 : f32
    %56 = vector.broadcast %cst_28 : f32 to vector<128x128xf32>
    %57 = arith.maximumf %55, %56 : vector<128x128xf32>
    %c0_29 = arith.constant 0 : index
    %c0_30 = arith.constant 0 : index
    %c0_31 = arith.constant 0 : index
    %58 = vector.load %arg9[%c0_29, %c0_30, %c0_31] : memref<5x128x128xbf16, #tpu.memory_space<vmem>>, vector<1x128x128xbf16>
    %59 = vector.shape_cast %58 : vector<1x128x128xbf16> to vector<128x128xbf16>
    %60 = arith.truncf %57 : vector<128x128xf32> to vector<128x128xbf16>
    %cst_32 = arith.constant dense<0.000000e+00> : vector<128x128xf32>
    %61 = tpu.matmul %60, %59, %cst_32 {dimension_numbers = #tpu.dot_dimension_numbers<[1], [0], [0], [1], [0, 0, 1, 1], [], []>} : vector<128x128xbf16>, vector<128x128xbf16>, vector<128x128xf32> -> vector<128x128xf32>
    %c0_33 = arith.constant 0 : index
    %c0_34 = arith.constant 0 : index
    %c0_35 = arith.constant 0 : index
    %62 = vector.load %arg10[%c0_33, %c0_34, %c0_35] : memref<5x1x128xf32, #tpu.memory_space<vmem>>, vector<1x1x128xf32>
    %63 = vector.shape_cast %62 : vector<1x1x128xf32> to vector<1x128xf32>
    %64 = vector.broadcast %63 : vector<1x128xf32> to vector<128x128xf32>
    %65 = arith.addf %61, %64 : vector<128x128xf32>
    %c0_36 = arith.constant 0 : index
    %c0_37 = arith.constant 0 : index
    %c0_38 = arith.constant 0 : index
    %66 = vector.load %arg11[%c0_36, %c0_37, %c0_38] : memref<5x128x128xbf16, #tpu.memory_space<vmem>>, vector<1x128x128xbf16>
    %67 = vector.shape_cast %66 : vector<1x128x128xbf16> to vector<128x128xbf16>
    %68 = arith.truncf %21 : vector<128x128xf32> to vector<128x128xbf16>
    %cst_39 = arith.constant dense<0.000000e+00> : vector<128x128xf32>
    %69 = tpu.matmul %68, %67, %cst_39 {dimension_numbers = #tpu.dot_dimension_numbers<[1], [0], [0], [1], [0, 0, 1, 1], [], []>} : vector<128x128xbf16>, vector<128x128xbf16>, vector<128x128xf32> -> vector<128x128xf32>
    %c0_40 = arith.constant 0 : index
    %c0_41 = arith.constant 0 : index
    %c0_42 = arith.constant 0 : index
    %70 = vector.load %arg12[%c0_40, %c0_41, %c0_42] : memref<5x128x128xbf16, #tpu.memory_space<vmem>>, vector<1x128x128xbf16>
    %71 = vector.shape_cast %70 : vector<1x128x128xbf16> to vector<128x128xbf16>
    %72 = arith.truncf %38 : vector<128x128xf32> to vector<128x128xbf16>
    %cst_43 = arith.constant dense<0.000000e+00> : vector<128x128xf32>
    %73 = tpu.matmul %72, %71, %cst_43 {dimension_numbers = #tpu.dot_dimension_numbers<[1], [0], [0], [1], [0, 0, 1, 1], [], []>} : vector<128x128xbf16>, vector<128x128xbf16>, vector<128x128xf32> -> vector<128x128xf32>
    %74 = arith.addf %69, %73 : vector<128x128xf32>
    %75 = arith.addf %74, %65 : vector<128x128xf32>
    %76 = vector.shape_cast %75 : vector<128x128xf32> to vector<8x16x128xf32>
    %cst_44 = arith.constant dense<0.000000e+00> : vector<8x128xf32>
    %77 = vector.multi_reduction <add>, %76, %cst_44 [1] : vector<8x16x128xf32> to vector<8x128xf32>
    %cst_45 = arith.constant 6.250000e-02 : f32
    %78 = vector.broadcast %cst_45 : f32 to vector<8x128xf32>
    %79 = arith.mulf %77, %78 : vector<8x128xf32>
    %cst_46 = arith.constant 0.000000e+00 : f32
    %80 = vector.broadcast %cst_46 : f32 to vector<128x128xf32>
    %81 = arith.maximumf %75, %80 : vector<128x128xf32>
    %c1_47 = arith.constant 1 : index
    %c0_48 = arith.constant 0 : index
    %c0_49 = arith.constant 0 : index
    %82 = vector.load %arg6[%c1_47, %c0_48, %c0_49] : memref<5x128x128xbf16, #tpu.memory_space<vmem>>, vector<1x128x128xbf16>
    %83 = vector.shape_cast %82 : vector<1x128x128xbf16> to vector<128x128xbf16>
    %84 = arith.truncf %81 : vector<128x128xf32> to vector<128x128xbf16>
    %cst_50 = arith.constant dense<0.000000e+00> : vector<128x128xf32>
    %85 = tpu.matmul %84, %83, %cst_50 {dimension_numbers = #tpu.dot_dimension_numbers<[1], [0], [0], [1], [0, 0, 1, 1], [], []>} : vector<128x128xbf16>, vector<128x128xbf16>, vector<128x128xf32> -> vector<128x128xf32>
    %cst_51 = arith.constant 0.000000e+00 : f32
    %86 = vector.broadcast %cst_51 : f32 to vector<8x128xf32>
    %87 = arith.maximumf %79, %86 : vector<8x128xf32>
    %c1_52 = arith.constant 1 : index
    %c0_53 = arith.constant 0 : index
    %c0_54 = arith.constant 0 : index
    %88 = vector.load %arg7[%c1_52, %c0_53, %c0_54] : memref<5x128x128xbf16, #tpu.memory_space<vmem>>, vector<1x128x128xbf16>
    %89 = vector.shape_cast %88 : vector<1x128x128xbf16> to vector<128x128xbf16>
    %90 = arith.truncf %87 : vector<8x128xf32> to vector<8x128xbf16>
    %cst_55 = arith.constant dense<0.000000e+00> : vector<8x128xf32>
    %91 = tpu.matmul %90, %89, %cst_55 {dimension_numbers = #tpu.dot_dimension_numbers<[1], [0], [0], [1], [0, 0, 1, 1], [], []>} : vector<8x128xbf16>, vector<128x128xbf16>, vector<8x128xf32> -> vector<8x128xf32>
    %92 = vector.shape_cast %91 : vector<8x128xf32> to vector<8x1x128xf32>
    %93 = vector.shape_cast %92 : vector<8x1x128xf32> to vector<8x1x128xf32>
    %94 = vector.broadcast %93 : vector<8x1x128xf32> to vector<8x16x128xf32>
    %95 = vector.shape_cast %94 : vector<8x16x128xf32> to vector<128x128xf32>
    %96 = arith.addf %85, %95 : vector<128x128xf32>
    %c1_56 = arith.constant 1 : index
    %c0_57 = arith.constant 0 : index
    %c0_58 = arith.constant 0 : index
    %97 = vector.load %arg8[%c1_56, %c0_57, %c0_58] : memref<5x1x128xf32, #tpu.memory_space<vmem>>, vector<1x1x128xf32>
    %98 = vector.shape_cast %97 : vector<1x1x128xf32> to vector<1x128xf32>
    %99 = vector.broadcast %98 : vector<1x128xf32> to vector<128x128xf32>
    %100 = arith.addf %96, %99 : vector<128x128xf32>
    %cst_59 = arith.constant 0.000000e+00 : f32
    %101 = vector.broadcast %cst_59 : f32 to vector<128x128xf32>
    %102 = arith.maximumf %100, %101 : vector<128x128xf32>
    %c1_60 = arith.constant 1 : index
    %c0_61 = arith.constant 0 : index
    %c0_62 = arith.constant 0 : index
    %103 = vector.load %arg9[%c1_60, %c0_61, %c0_62] : memref<5x128x128xbf16, #tpu.memory_space<vmem>>, vector<1x128x128xbf16>
    %104 = vector.shape_cast %103 : vector<1x128x128xbf16> to vector<128x128xbf16>
    %105 = arith.truncf %102 : vector<128x128xf32> to vector<128x128xbf16>
    %cst_63 = arith.constant dense<0.000000e+00> : vector<128x128xf32>
    %106 = tpu.matmul %105, %104, %cst_63 {dimension_numbers = #tpu.dot_dimension_numbers<[1], [0], [0], [1], [0, 0, 1, 1], [], []>} : vector<128x128xbf16>, vector<128x128xbf16>, vector<128x128xf32> -> vector<128x128xf32>
    %c1_64 = arith.constant 1 : index
    %c0_65 = arith.constant 0 : index
    %c0_66 = arith.constant 0 : index
    %107 = vector.load %arg10[%c1_64, %c0_65, %c0_66] : memref<5x1x128xf32, #tpu.memory_space<vmem>>, vector<1x1x128xf32>
    %108 = vector.shape_cast %107 : vector<1x1x128xf32> to vector<1x128xf32>
    %109 = vector.broadcast %108 : vector<1x128xf32> to vector<128x128xf32>
    %110 = arith.addf %106, %109 : vector<128x128xf32>
    %c1_67 = arith.constant 1 : index
    %c0_68 = arith.constant 0 : index
    %c0_69 = arith.constant 0 : index
    %111 = vector.load %arg11[%c1_67, %c0_68, %c0_69] : memref<5x128x128xbf16, #tpu.memory_space<vmem>>, vector<1x128x128xbf16>
    %112 = vector.shape_cast %111 : vector<1x128x128xbf16> to vector<128x128xbf16>
    %113 = arith.truncf %75 : vector<128x128xf32> to vector<128x128xbf16>
    %cst_70 = arith.constant dense<0.000000e+00> : vector<128x128xf32>
    %114 = tpu.matmul %113, %112, %cst_70 {dimension_numbers = #tpu.dot_dimension_numbers<[1], [0], [0], [1], [0, 0, 1, 1], [], []>} : vector<128x128xbf16>, vector<128x128xbf16>, vector<128x128xf32> -> vector<128x128xf32>
    %c1_71 = arith.constant 1 : index
    %c0_72 = arith.constant 0 : index
    %c0_73 = arith.constant 0 : index
    %115 = vector.load %arg12[%c1_71, %c0_72, %c0_73] : memref<5x128x128xbf16, #tpu.memory_space<vmem>>, vector<1x128x128xbf16>
    %116 = vector.shape_cast %115 : vector<1x128x128xbf16> to vector<128x128xbf16>
    %117 = arith.truncf %79 : vector<8x128xf32> to vector<8x128xbf16>
    %cst_74 = arith.constant dense<0.000000e+00> : vector<8x128xf32>
    %118 = tpu.matmul %117, %116, %cst_74 {dimension_numbers = #tpu.dot_dimension_numbers<[1], [0], [0], [1], [0, 0, 1, 1], [], []>} : vector<8x128xbf16>, vector<128x128xbf16>, vector<8x128xf32> -> vector<8x128xf32>
    %119 = vector.shape_cast %118 : vector<8x128xf32> to vector<8x1x128xf32>
    %120 = vector.shape_cast %119 : vector<8x1x128xf32> to vector<8x1x128xf32>
    %121 = vector.broadcast %120 : vector<8x1x128xf32> to vector<8x16x128xf32>
    %122 = vector.shape_cast %121 : vector<8x16x128xf32> to vector<128x128xf32>
    %123 = arith.addf %114, %122 : vector<128x128xf32>
    %124 = arith.addf %123, %110 : vector<128x128xf32>
    %125 = vector.shape_cast %124 : vector<128x128xf32> to vector<8x16x128xf32>
    %cst_75 = arith.constant dense<0.000000e+00> : vector<8x128xf32>
    %126 = vector.multi_reduction <add>, %125, %cst_75 [1] : vector<8x16x128xf32> to vector<8x128xf32>
    %cst_76 = arith.constant 6.250000e-02 : f32
    %127 = vector.broadcast %cst_76 : f32 to vector<8x128xf32>
    %128 = arith.mulf %126, %127 : vector<8x128xf32>
    %cst_77 = arith.constant 0.000000e+00 : f32
    %129 = vector.broadcast %cst_77 : f32 to vector<128x128xf32>
    %130 = arith.maximumf %124, %129 : vector<128x128xf32>
    %c2_78 = arith.constant 2 : index
    %c0_79 = arith.constant 0 : index
    %c0_80 = arith.constant 0 : index
    %131 = vector.load %arg6[%c2_78, %c0_79, %c0_80] : memref<5x128x128xbf16, #tpu.memory_space<vmem>>, vector<1x128x128xbf16>
    %132 = vector.shape_cast %131 : vector<1x128x128xbf16> to vector<128x128xbf16>
    %133 = arith.truncf %130 : vector<128x128xf32> to vector<128x128xbf16>
    %cst_81 = arith.constant dense<0.000000e+00> : vector<128x128xf32>
    %134 = tpu.matmul %133, %132, %cst_81 {dimension_numbers = #tpu.dot_dimension_numbers<[1], [0], [0], [1], [0, 0, 1, 1], [], []>} : vector<128x128xbf16>, vector<128x128xbf16>, vector<128x128xf32> -> vector<128x128xf32>
    %cst_82 = arith.constant 0.000000e+00 : f32
    %135 = vector.broadcast %cst_82 : f32 to vector<8x128xf32>
    %136 = arith.maximumf %128, %135 : vector<8x128xf32>
    %c2_83 = arith.constant 2 : index
    %c0_84 = arith.constant 0 : index
    %c0_85 = arith.constant 0 : index
    %137 = vector.load %arg7[%c2_83, %c0_84, %c0_85] : memref<5x128x128xbf16, #tpu.memory_space<vmem>>, vector<1x128x128xbf16>
    %138 = vector.shape_cast %137 : vector<1x128x128xbf16> to vector<128x128xbf16>
    %139 = arith.truncf %136 : vector<8x128xf32> to vector<8x128xbf16>
    %cst_86 = arith.constant dense<0.000000e+00> : vector<8x128xf32>
    %140 = tpu.matmul %139, %138, %cst_86 {dimension_numbers = #tpu.dot_dimension_numbers<[1], [0], [0], [1], [0, 0, 1, 1], [], []>} : vector<8x128xbf16>, vector<128x128xbf16>, vector<8x128xf32> -> vector<8x128xf32>
    %141 = vector.shape_cast %140 : vector<8x128xf32> to vector<8x1x128xf32>
    %142 = vector.shape_cast %141 : vector<8x1x128xf32> to vector<8x1x128xf32>
    %143 = vector.broadcast %142 : vector<8x1x128xf32> to vector<8x16x128xf32>
    %144 = vector.shape_cast %143 : vector<8x16x128xf32> to vector<128x128xf32>
    %145 = arith.addf %134, %144 : vector<128x128xf32>
    %c2_87 = arith.constant 2 : index
    %c0_88 = arith.constant 0 : index
    %c0_89 = arith.constant 0 : index
    %146 = vector.load %arg8[%c2_87, %c0_88, %c0_89] : memref<5x1x128xf32, #tpu.memory_space<vmem>>, vector<1x1x128xf32>
    %147 = vector.shape_cast %146 : vector<1x1x128xf32> to vector<1x128xf32>
    %148 = vector.broadcast %147 : vector<1x128xf32> to vector<128x128xf32>
    %149 = arith.addf %145, %148 : vector<128x128xf32>
    %cst_90 = arith.constant 0.000000e+00 : f32
    %150 = vector.broadcast %cst_90 : f32 to vector<128x128xf32>
    %151 = arith.maximumf %149, %150 : vector<128x128xf32>
    %c2_91 = arith.constant 2 : index
    %c0_92 = arith.constant 0 : index
    %c0_93 = arith.constant 0 : index
    %152 = vector.load %arg9[%c2_91, %c0_92, %c0_93] : memref<5x128x128xbf16, #tpu.memory_space<vmem>>, vector<1x128x128xbf16>
    %153 = vector.shape_cast %152 : vector<1x128x128xbf16> to vector<128x128xbf16>
    %154 = arith.truncf %151 : vector<128x128xf32> to vector<128x128xbf16>
    %cst_94 = arith.constant dense<0.000000e+00> : vector<128x128xf32>
    %155 = tpu.matmul %154, %153, %cst_94 {dimension_numbers = #tpu.dot_dimension_numbers<[1], [0], [0], [1], [0, 0, 1, 1], [], []>} : vector<128x128xbf16>, vector<128x128xbf16>, vector<128x128xf32> -> vector<128x128xf32>
    %c2_95 = arith.constant 2 : index
    %c0_96 = arith.constant 0 : index
    %c0_97 = arith.constant 0 : index
    %156 = vector.load %arg10[%c2_95, %c0_96, %c0_97] : memref<5x1x128xf32, #tpu.memory_space<vmem>>, vector<1x1x128xf32>
    %157 = vector.shape_cast %156 : vector<1x1x128xf32> to vector<1x128xf32>
    %158 = vector.broadcast %157 : vector<1x128xf32> to vector<128x128xf32>
    %159 = arith.addf %155, %158 : vector<128x128xf32>
    %c2_98 = arith.constant 2 : index
    %c0_99 = arith.constant 0 : index
    %c0_100 = arith.constant 0 : index
    %160 = vector.load %arg11[%c2_98, %c0_99, %c0_100] : memref<5x128x128xbf16, #tpu.memory_space<vmem>>, vector<1x128x128xbf16>
    %161 = vector.shape_cast %160 : vector<1x128x128xbf16> to vector<128x128xbf16>
    %162 = arith.truncf %124 : vector<128x128xf32> to vector<128x128xbf16>
    %cst_101 = arith.constant dense<0.000000e+00> : vector<128x128xf32>
    %163 = tpu.matmul %162, %161, %cst_101 {dimension_numbers = #tpu.dot_dimension_numbers<[1], [0], [0], [1], [0, 0, 1, 1], [], []>} : vector<128x128xbf16>, vector<128x128xbf16>, vector<128x128xf32> -> vector<128x128xf32>
    %c2_102 = arith.constant 2 : index
    %c0_103 = arith.constant 0 : index
    %c0_104 = arith.constant 0 : index
    %164 = vector.load %arg12[%c2_102, %c0_103, %c0_104] : memref<5x128x128xbf16, #tpu.memory_space<vmem>>, vector<1x128x128xbf16>
    %165 = vector.shape_cast %164 : vector<1x128x128xbf16> to vector<128x128xbf16>
    %166 = arith.truncf %128 : vector<8x128xf32> to vector<8x128xbf16>
    %cst_105 = arith.constant dense<0.000000e+00> : vector<8x128xf32>
    %167 = tpu.matmul %166, %165, %cst_105 {dimension_numbers = #tpu.dot_dimension_numbers<[1], [0], [0], [1], [0, 0, 1, 1], [], []>} : vector<8x128xbf16>, vector<128x128xbf16>, vector<8x128xf32> -> vector<8x128xf32>
    %168 = vector.shape_cast %167 : vector<8x128xf32> to vector<8x1x128xf32>
    %169 = vector.shape_cast %168 : vector<8x1x128xf32> to vector<8x1x128xf32>
    %170 = vector.broadcast %169 : vector<8x1x128xf32> to vector<8x16x128xf32>
    %171 = vector.shape_cast %170 : vector<8x16x128xf32> to vector<128x128xf32>
    %172 = arith.addf %163, %171 : vector<128x128xf32>
    %173 = arith.addf %172, %159 : vector<128x128xf32>
    %174 = vector.shape_cast %173 : vector<128x128xf32> to vector<8x16x128xf32>
    %cst_106 = arith.constant dense<0.000000e+00> : vector<8x128xf32>
    %175 = vector.multi_reduction <add>, %174, %cst_106 [1] : vector<8x16x128xf32> to vector<8x128xf32>
    %cst_107 = arith.constant 6.250000e-02 : f32
    %176 = vector.broadcast %cst_107 : f32 to vector<8x128xf32>
    %177 = arith.mulf %175, %176 : vector<8x128xf32>
    %cst_108 = arith.constant 0.000000e+00 : f32
    %178 = vector.broadcast %cst_108 : f32 to vector<128x128xf32>
    %179 = arith.maximumf %173, %178 : vector<128x128xf32>
    %c3 = arith.constant 3 : index
    %c0_109 = arith.constant 0 : index
    %c0_110 = arith.constant 0 : index
    %180 = vector.load %arg6[%c3, %c0_109, %c0_110] : memref<5x128x128xbf16, #tpu.memory_space<vmem>>, vector<1x128x128xbf16>
    %181 = vector.shape_cast %180 : vector<1x128x128xbf16> to vector<128x128xbf16>
    %182 = arith.truncf %179 : vector<128x128xf32> to vector<128x128xbf16>
    %cst_111 = arith.constant dense<0.000000e+00> : vector<128x128xf32>
    %183 = tpu.matmul %182, %181, %cst_111 {dimension_numbers = #tpu.dot_dimension_numbers<[1], [0], [0], [1], [0, 0, 1, 1], [], []>} : vector<128x128xbf16>, vector<128x128xbf16>, vector<128x128xf32> -> vector<128x128xf32>
    %cst_112 = arith.constant 0.000000e+00 : f32
    %184 = vector.broadcast %cst_112 : f32 to vector<8x128xf32>
    %185 = arith.maximumf %177, %184 : vector<8x128xf32>
    %c3_113 = arith.constant 3 : index
    %c0_114 = arith.constant 0 : index
    %c0_115 = arith.constant 0 : index
    %186 = vector.load %arg7[%c3_113, %c0_114, %c0_115] : memref<5x128x128xbf16, #tpu.memory_space<vmem>>, vector<1x128x128xbf16>
    %187 = vector.shape_cast %186 : vector<1x128x128xbf16> to vector<128x128xbf16>
    %188 = arith.truncf %185 : vector<8x128xf32> to vector<8x128xbf16>
    %cst_116 = arith.constant dense<0.000000e+00> : vector<8x128xf32>
    %189 = tpu.matmul %188, %187, %cst_116 {dimension_numbers = #tpu.dot_dimension_numbers<[1], [0], [0], [1], [0, 0, 1, 1], [], []>} : vector<8x128xbf16>, vector<128x128xbf16>, vector<8x128xf32> -> vector<8x128xf32>
    %190 = vector.shape_cast %189 : vector<8x128xf32> to vector<8x1x128xf32>
    %191 = vector.shape_cast %190 : vector<8x1x128xf32> to vector<8x1x128xf32>
    %192 = vector.broadcast %191 : vector<8x1x128xf32> to vector<8x16x128xf32>
    %193 = vector.shape_cast %192 : vector<8x16x128xf32> to vector<128x128xf32>
    %194 = arith.addf %183, %193 : vector<128x128xf32>
    %c3_117 = arith.constant 3 : index
    %c0_118 = arith.constant 0 : index
    %c0_119 = arith.constant 0 : index
    %195 = vector.load %arg8[%c3_117, %c0_118, %c0_119] : memref<5x1x128xf32, #tpu.memory_space<vmem>>, vector<1x1x128xf32>
    %196 = vector.shape_cast %195 : vector<1x1x128xf32> to vector<1x128xf32>
    %197 = vector.broadcast %196 : vector<1x128xf32> to vector<128x128xf32>
    %198 = arith.addf %194, %197 : vector<128x128xf32>
    %cst_120 = arith.constant 0.000000e+00 : f32
    %199 = vector.broadcast %cst_120 : f32 to vector<128x128xf32>
    %200 = arith.maximumf %198, %199 : vector<128x128xf32>
    %c3_121 = arith.constant 3 : index
    %c0_122 = arith.constant 0 : index
    %c0_123 = arith.constant 0 : index
    %201 = vector.load %arg9[%c3_121, %c0_122, %c0_123] : memref<5x128x128xbf16, #tpu.memory_space<vmem>>, vector<1x128x128xbf16>
    %202 = vector.shape_cast %201 : vector<1x128x128xbf16> to vector<128x128xbf16>
    %203 = arith.truncf %200 : vector<128x128xf32> to vector<128x128xbf16>
    %cst_124 = arith.constant dense<0.000000e+00> : vector<128x128xf32>
    %204 = tpu.matmul %203, %202, %cst_124 {dimension_numbers = #tpu.dot_dimension_numbers<[1], [0], [0], [1], [0, 0, 1, 1], [], []>} : vector<128x128xbf16>, vector<128x128xbf16>, vector<128x128xf32> -> vector<128x128xf32>
    %c3_125 = arith.constant 3 : index
    %c0_126 = arith.constant 0 : index
    %c0_127 = arith.constant 0 : index
    %205 = vector.load %arg10[%c3_125, %c0_126, %c0_127] : memref<5x1x128xf32, #tpu.memory_space<vmem>>, vector<1x1x128xf32>
    %206 = vector.shape_cast %205 : vector<1x1x128xf32> to vector<1x128xf32>
    %207 = vector.broadcast %206 : vector<1x128xf32> to vector<128x128xf32>
    %208 = arith.addf %204, %207 : vector<128x128xf32>
    %c3_128 = arith.constant 3 : index
    %c0_129 = arith.constant 0 : index
    %c0_130 = arith.constant 0 : index
    %209 = vector.load %arg11[%c3_128, %c0_129, %c0_130] : memref<5x128x128xbf16, #tpu.memory_space<vmem>>, vector<1x128x128xbf16>
    %210 = vector.shape_cast %209 : vector<1x128x128xbf16> to vector<128x128xbf16>
    %211 = arith.truncf %173 : vector<128x128xf32> to vector<128x128xbf16>
    %cst_131 = arith.constant dense<0.000000e+00> : vector<128x128xf32>
    %212 = tpu.matmul %211, %210, %cst_131 {dimension_numbers = #tpu.dot_dimension_numbers<[1], [0], [0], [1], [0, 0, 1, 1], [], []>} : vector<128x128xbf16>, vector<128x128xbf16>, vector<128x128xf32> -> vector<128x128xf32>
    %c3_132 = arith.constant 3 : index
    %c0_133 = arith.constant 0 : index
    %c0_134 = arith.constant 0 : index
    %213 = vector.load %arg12[%c3_132, %c0_133, %c0_134] : memref<5x128x128xbf16, #tpu.memory_space<vmem>>, vector<1x128x128xbf16>
    %214 = vector.shape_cast %213 : vector<1x128x128xbf16> to vector<128x128xbf16>
    %215 = arith.truncf %177 : vector<8x128xf32> to vector<8x128xbf16>
    %cst_135 = arith.constant dense<0.000000e+00> : vector<8x128xf32>
    %216 = tpu.matmul %215, %214, %cst_135 {dimension_numbers = #tpu.dot_dimension_numbers<[1], [0], [0], [1], [0, 0, 1, 1], [], []>} : vector<8x128xbf16>, vector<128x128xbf16>, vector<8x128xf32> -> vector<8x128xf32>
    %217 = vector.shape_cast %216 : vector<8x128xf32> to vector<8x1x128xf32>
    %218 = vector.shape_cast %217 : vector<8x1x128xf32> to vector<8x1x128xf32>
    %219 = vector.broadcast %218 : vector<8x1x128xf32> to vector<8x16x128xf32>
    %220 = vector.shape_cast %219 : vector<8x16x128xf32> to vector<128x128xf32>
    %221 = arith.addf %212, %220 : vector<128x128xf32>
    %222 = arith.addf %221, %208 : vector<128x128xf32>
    %223 = vector.shape_cast %222 : vector<128x128xf32> to vector<8x16x128xf32>
    %cst_136 = arith.constant dense<0.000000e+00> : vector<8x128xf32>
    %224 = vector.multi_reduction <add>, %223, %cst_136 [1] : vector<8x16x128xf32> to vector<8x128xf32>
    %cst_137 = arith.constant 6.250000e-02 : f32
    %225 = vector.broadcast %cst_137 : f32 to vector<8x128xf32>
    %226 = arith.mulf %224, %225 : vector<8x128xf32>
    %cst_138 = arith.constant 0.000000e+00 : f32
    %227 = vector.broadcast %cst_138 : f32 to vector<128x128xf32>
    %228 = arith.maximumf %222, %227 : vector<128x128xf32>
    %c4 = arith.constant 4 : index
    %c0_139 = arith.constant 0 : index
    %c0_140 = arith.constant 0 : index
    %229 = vector.load %arg6[%c4, %c0_139, %c0_140] : memref<5x128x128xbf16, #tpu.memory_space<vmem>>, vector<1x128x128xbf16>
    %230 = vector.shape_cast %229 : vector<1x128x128xbf16> to vector<128x128xbf16>
    %231 = arith.truncf %228 : vector<128x128xf32> to vector<128x128xbf16>
    %cst_141 = arith.constant dense<0.000000e+00> : vector<128x128xf32>
    %232 = tpu.matmul %231, %230, %cst_141 {dimension_numbers = #tpu.dot_dimension_numbers<[1], [0], [0], [1], [0, 0, 1, 1], [], []>} : vector<128x128xbf16>, vector<128x128xbf16>, vector<128x128xf32> -> vector<128x128xf32>
    %cst_142 = arith.constant 0.000000e+00 : f32
    %233 = vector.broadcast %cst_142 : f32 to vector<8x128xf32>
    %234 = arith.maximumf %226, %233 : vector<8x128xf32>
    %c4_143 = arith.constant 4 : index
    %c0_144 = arith.constant 0 : index
    %c0_145 = arith.constant 0 : index
    %235 = vector.load %arg7[%c4_143, %c0_144, %c0_145] : memref<5x128x128xbf16, #tpu.memory_space<vmem>>, vector<1x128x128xbf16>
    %236 = vector.shape_cast %235 : vector<1x128x128xbf16> to vector<128x128xbf16>
    %237 = arith.truncf %234 : vector<8x128xf32> to vector<8x128xbf16>
    %cst_146 = arith.constant dense<0.000000e+00> : vector<8x128xf32>
    %238 = tpu.matmul %237, %236, %cst_146 {dimension_numbers = #tpu.dot_dimension_numbers<[1], [0], [0], [1], [0, 0, 1, 1], [], []>} : vector<8x128xbf16>, vector<128x128xbf16>, vector<8x128xf32> -> vector<8x128xf32>
    %239 = vector.shape_cast %238 : vector<8x128xf32> to vector<8x1x128xf32>
    %240 = vector.shape_cast %239 : vector<8x1x128xf32> to vector<8x1x128xf32>
    %241 = vector.broadcast %240 : vector<8x1x128xf32> to vector<8x16x128xf32>
    %242 = vector.shape_cast %241 : vector<8x16x128xf32> to vector<128x128xf32>
    %243 = arith.addf %232, %242 : vector<128x128xf32>
    %c4_147 = arith.constant 4 : index
    %c0_148 = arith.constant 0 : index
    %c0_149 = arith.constant 0 : index
    %244 = vector.load %arg8[%c4_147, %c0_148, %c0_149] : memref<5x1x128xf32, #tpu.memory_space<vmem>>, vector<1x1x128xf32>
    %245 = vector.shape_cast %244 : vector<1x1x128xf32> to vector<1x128xf32>
    %246 = vector.broadcast %245 : vector<1x128xf32> to vector<128x128xf32>
    %247 = arith.addf %243, %246 : vector<128x128xf32>
    %cst_150 = arith.constant 0.000000e+00 : f32
    %248 = vector.broadcast %cst_150 : f32 to vector<128x128xf32>
    %249 = arith.maximumf %247, %248 : vector<128x128xf32>
    %c4_151 = arith.constant 4 : index
    %c0_152 = arith.constant 0 : index
    %c0_153 = arith.constant 0 : index
    %250 = vector.load %arg9[%c4_151, %c0_152, %c0_153] : memref<5x128x128xbf16, #tpu.memory_space<vmem>>, vector<1x128x128xbf16>
    %251 = vector.shape_cast %250 : vector<1x128x128xbf16> to vector<128x128xbf16>
    %252 = arith.truncf %249 : vector<128x128xf32> to vector<128x128xbf16>
    %cst_154 = arith.constant dense<0.000000e+00> : vector<128x128xf32>
    %253 = tpu.matmul %252, %251, %cst_154 {dimension_numbers = #tpu.dot_dimension_numbers<[1], [0], [0], [1], [0, 0, 1, 1], [], []>} : vector<128x128xbf16>, vector<128x128xbf16>, vector<128x128xf32> -> vector<128x128xf32>
    %c4_155 = arith.constant 4 : index
    %c0_156 = arith.constant 0 : index
    %c0_157 = arith.constant 0 : index
    %254 = vector.load %arg10[%c4_155, %c0_156, %c0_157] : memref<5x1x128xf32, #tpu.memory_space<vmem>>, vector<1x1x128xf32>
    %255 = vector.shape_cast %254 : vector<1x1x128xf32> to vector<1x128xf32>
    %256 = vector.broadcast %255 : vector<1x128xf32> to vector<128x128xf32>
    %257 = arith.addf %253, %256 : vector<128x128xf32>
    %c4_158 = arith.constant 4 : index
    %c0_159 = arith.constant 0 : index
    %c0_160 = arith.constant 0 : index
    %258 = vector.load %arg11[%c4_158, %c0_159, %c0_160] : memref<5x128x128xbf16, #tpu.memory_space<vmem>>, vector<1x128x128xbf16>
    %259 = vector.shape_cast %258 : vector<1x128x128xbf16> to vector<128x128xbf16>
    %260 = arith.truncf %222 : vector<128x128xf32> to vector<128x128xbf16>
    %cst_161 = arith.constant dense<0.000000e+00> : vector<128x128xf32>
    %261 = tpu.matmul %260, %259, %cst_161 {dimension_numbers = #tpu.dot_dimension_numbers<[1], [0], [0], [1], [0, 0, 1, 1], [], []>} : vector<128x128xbf16>, vector<128x128xbf16>, vector<128x128xf32> -> vector<128x128xf32>
    %c4_162 = arith.constant 4 : index
    %c0_163 = arith.constant 0 : index
    %c0_164 = arith.constant 0 : index
    %262 = vector.load %arg12[%c4_162, %c0_163, %c0_164] : memref<5x128x128xbf16, #tpu.memory_space<vmem>>, vector<1x128x128xbf16>
    %263 = vector.shape_cast %262 : vector<1x128x128xbf16> to vector<128x128xbf16>
    %264 = arith.truncf %226 : vector<8x128xf32> to vector<8x128xbf16>
    %cst_165 = arith.constant dense<0.000000e+00> : vector<8x128xf32>
    %265 = tpu.matmul %264, %263, %cst_165 {dimension_numbers = #tpu.dot_dimension_numbers<[1], [0], [0], [1], [0, 0, 1, 1], [], []>} : vector<8x128xbf16>, vector<128x128xbf16>, vector<8x128xf32> -> vector<8x128xf32>
    %266 = vector.shape_cast %265 : vector<8x128xf32> to vector<8x1x128xf32>
    %267 = vector.shape_cast %266 : vector<8x1x128xf32> to vector<8x1x128xf32>
    %268 = vector.broadcast %267 : vector<8x1x128xf32> to vector<8x16x128xf32>
    %269 = vector.shape_cast %268 : vector<8x16x128xf32> to vector<128x128xf32>
    %270 = arith.addf %261, %269 : vector<128x128xf32>
    %271 = arith.addf %270, %257 : vector<128x128xf32>
    %272 = vector.shape_cast %271 : vector<128x128xf32> to vector<8x16x128xf32>
    %cst_166 = arith.constant dense<0.000000e+00> : vector<8x128xf32>
    %273 = vector.multi_reduction <add>, %272, %cst_166 [1] : vector<8x16x128xf32> to vector<8x128xf32>
    %cst_167 = arith.constant 6.250000e-02 : f32
    %274 = vector.broadcast %cst_167 : f32 to vector<8x128xf32>
    %275 = arith.mulf %273, %274 : vector<8x128xf32>
    %cst_168 = arith.constant 0.000000e+00 : f32
    %276 = vector.broadcast %cst_168 : f32 to vector<8x128xf32>
    %277 = arith.maximumf %275, %276 : vector<8x128xf32>
    %c0_169 = arith.constant 0 : index
    %c0_170 = arith.constant 0 : index
    %278 = vector.load %arg13[%c0_169, %c0_170] : memref<128x128xbf16, #tpu.memory_space<vmem>>, vector<128x128xbf16>
    %279 = arith.truncf %277 : vector<8x128xf32> to vector<8x128xbf16>
    %cst_171 = arith.constant dense<0.000000e+00> : vector<8x128xf32>
    %280 = tpu.matmul %279, %278, %cst_171 {dimension_numbers = #tpu.dot_dimension_numbers<[1], [0], [0], [1], [0, 0, 1, 1], [], []>} : vector<8x128xbf16>, vector<128x128xbf16>, vector<8x128xf32> -> vector<8x128xf32>
    %c0_172 = arith.constant 0 : index
    %c0_173 = arith.constant 0 : index
    %281 = vector.load %arg14[%c0_172, %c0_173] : memref<1x128xf32, #tpu.memory_space<vmem>>, vector<1x128xf32>
    %282 = vector.broadcast %281 : vector<1x128xf32> to vector<8x128xf32>
    %283 = arith.addf %280, %282 : vector<8x128xf32>
    %c0_174 = arith.constant 0 : index
    %c0_175 = arith.constant 0 : index
    %284 = vector.load %arg15[%c0_174, %c0_175] : memref<8x128xf32, #tpu.memory_space<vmem>>, vector<8x128xf32>
    tpu.vector_store %arg15[%c0_174, %c0_175], %283 {strides = array<i32>} : memref<8x128xf32, #tpu.memory_space<vmem>>, vector<8x128xf32>,
    return
  }
  func.func @transform_0(%arg0: i32) -> (i32, i32, i32) {
    %c0_i32 = arith.constant 0 : i32
    %c0_i32_0 = arith.constant 0 : i32
    %c0_i32_1 = arith.constant 0 : i32
    return %arg0, %c0_i32, %c0_i32_0 : i32, i32, i32
  }
  func.func @transform_1(%arg0: i32) -> (i32, i32) {
    %c0_i32 = arith.constant 0 : i32
    %c0_i32_0 = arith.constant 0 : i32
    %c0_i32_1 = arith.constant 0 : i32
    return %c0_i32, %c0_i32_0 : i32, i32
  }
  func.func @transform_2(%arg0: i32) -> (i32, i32) {
    %c0_i32 = arith.constant 0 : i32
    %c0_i32_0 = arith.constant 0 : i32
    %c0_i32_1 = arith.constant 0 : i32
    return %c0_i32, %c0_i32_0 : i32, i32
  }
  func.func @transform_3(%arg0: i32) -> (i32, i32) {
    %c0_i32 = arith.constant 0 : i32
    %c0_i32_0 = arith.constant 0 : i32
    %c0_i32_1 = arith.constant 0 : i32
    return %c0_i32, %c0_i32_0 : i32, i32
  }
  func.func @transform_4(%arg0: i32) -> (i32, i32) {
    %c0_i32 = arith.constant 0 : i32
    %c0_i32_0 = arith.constant 0 : i32
    %c0_i32_1 = arith.constant 0 : i32
    return %c0_i32, %c0_i32_0 : i32, i32
  }
  func.func @transform_5(%arg0: i32) -> (i32, i32, i32) {
    %c0_i32 = arith.constant 0 : i32
    %c0_i32_0 = arith.constant 0 : i32
    %c0_i32_1 = arith.constant 0 : i32
    %c0_i32_2 = arith.constant 0 : i32
    return %c0_i32, %c0_i32_0, %c0_i32_1 : i32, i32, i32
  }
  func.func @transform_6(%arg0: i32) -> (i32, i32, i32) {
    %c0_i32 = arith.constant 0 : i32
    %c0_i32_0 = arith.constant 0 : i32
    %c0_i32_1 = arith.constant 0 : i32
    %c0_i32_2 = arith.constant 0 : i32
    return %c0_i32, %c0_i32_0, %c0_i32_1 : i32, i32, i32
  }
  func.func @transform_7(%arg0: i32) -> (i32, i32, i32) {
    %c0_i32 = arith.constant 0 : i32
    %c0_i32_0 = arith.constant 0 : i32
    %c0_i32_1 = arith.constant 0 : i32
    %c0_i32_2 = arith.constant 0 : i32
    return %c0_i32, %c0_i32_0, %c0_i32_1 : i32, i32, i32
  }
  func.func @transform_8(%arg0: i32) -> (i32, i32, i32) {
    %c0_i32 = arith.constant 0 : i32
    %c0_i32_0 = arith.constant 0 : i32
    %c0_i32_1 = arith.constant 0 : i32
    %c0_i32_2 = arith.constant 0 : i32
    return %c0_i32, %c0_i32_0, %c0_i32_1 : i32, i32, i32
  }
  func.func @transform_9(%arg0: i32) -> (i32, i32, i32) {
    %c0_i32 = arith.constant 0 : i32
    %c0_i32_0 = arith.constant 0 : i32
    %c0_i32_1 = arith.constant 0 : i32
    %c0_i32_2 = arith.constant 0 : i32
    return %c0_i32, %c0_i32_0, %c0_i32_1 : i32, i32, i32
  }
  func.func @transform_10(%arg0: i32) -> (i32, i32, i32) {
    %c0_i32 = arith.constant 0 : i32
    %c0_i32_0 = arith.constant 0 : i32
    %c0_i32_1 = arith.constant 0 : i32
    %c0_i32_2 = arith.constant 0 : i32
    return %c0_i32, %c0_i32_0, %c0_i32_1 : i32, i32, i32
  }
  func.func @transform_11(%arg0: i32) -> (i32, i32, i32) {
    %c0_i32 = arith.constant 0 : i32
    %c0_i32_0 = arith.constant 0 : i32
    %c0_i32_1 = arith.constant 0 : i32
    %c0_i32_2 = arith.constant 0 : i32
    return %c0_i32, %c0_i32_0, %c0_i32_1 : i32, i32, i32
  }
  func.func @transform_12(%arg0: i32) -> (i32, i32) {
    %c0_i32 = arith.constant 0 : i32
    %c0_i32_0 = arith.constant 0 : i32
    %c0_i32_1 = arith.constant 0 : i32
    return %c0_i32, %c0_i32_0 : i32, i32
  }
  func.func @transform_13(%arg0: i32) -> (i32, i32) {
    %c0_i32 = arith.constant 0 : i32
    %c0_i32_0 = arith.constant 0 : i32
    %c0_i32_1 = arith.constant 0 : i32
    return %c0_i32, %c0_i32_0 : i32, i32
  }
  func.func @transform_14(%arg0: i32) -> (i32, i32) {
    %c0_i32 = arith.constant 0 : i32
    %c0_i32_0 = arith.constant 0 : i32
    return %arg0, %c0_i32 : i32, i32
  }
}

</mosaic_0001>

<bundles_post_ra>
// kernel: tpu_custom_call.1
= control target key start
LH: loop header
LB: loop body
LE: loop exit
PB: predicated region body
PF: predicated region fallthrough
CT: control target
= control target key end

     0   :  { %s11211_s0 = inlined_call_operand.vmem [shape: f32[16,16,3], index: 0, kind: input, shape index: {}]   ;;  %s11212_s1 = inlined_call_operand.hbm [shape: f32[3,128], index: 1, kind: input, shape index: {}]   ;;  %s11213_s2 = inlined_call_operand.hbm [shape: f32[3,128], index: 2, kind: input, shape index: {}]   ;;  %s11214_s3 = inlined_call_operand.hbm [shape: f32[1,128], index: 3, kind: input, shape index: {}]   ;;  %s11215_s4 = inlined_call_operand.hbm [shape: f32[1,128], index: 4, kind: input, shape index: {}]   ;;  %s11216_s5 = inlined_call_operand.vmem [shape: bf16[5,128,128], index: 5, kind: input, shape index: {}]   ;;  %s11217_s6 = inlined_call_operand.hbm [shape: bf16[5,128,128], index: 6, kind: input, shape index: {}]   ;;  %s11218_s7 = inlined_call_operand.vmem [shape: f32[5,1,128], index: 7, kind: input, shape index: {}]   ;;  %s11219_s8 = inlined_call_operand.hbm [shape: bf16[5,128,128], index: 8, kind: input, shape index: {}]   ;;  %s11220_s9 = inlined_call_operand.vmem [shape: f32[5,1,128], index: 9, kind: input, shape index: {}]   ;;  %s11221_s10 = inlined_call_operand.hbm [shape: bf16[5,128,128], index: 10, kind: input, shape index: {}]   ;;  %s11222_s11 = inlined_call_operand.hbm [shape: bf16[5,128,128], index: 11, kind: input, shape index: {}]   ;;  %s11223_s12 = inlined_call_operand.hbm [shape: bf16[128,128], index: 12, kind: input, shape index: {}]   ;;  %s11224_s13 = inlined_call_operand.vmem [shape: f32[1,128], index: 13, kind: input, shape index: {}]   ;;  %s11225_s14 = inlined_call_operand.hbm [shape: f32[16,128], index: 14, kind: output, shape index: {}]  }
   0x1   :  { %11244 = sst [smem:[#allocation35_spill]] %s11213_s2 }
   0x2   :  { %11245 = sst [smem:[#allocation36_spill]] %s11215_s4 }
   0x3   :  { %11246 = sst [smem:[#allocation37_spill]] %s11224_s13 }
   0x4   :  { %11247 = sst [smem:[#allocation38_spill]] %s11225_s14 }
   0x5   :  { %19 = vsyncpa [#allocation3], 0 }
   0x6   :  { %20 = vsyncpa [#allocation6], 0 }
   0x7   :  { %21 = vsyncpa [#allocation9], 0 }
   0x8   :  { %22 = vsyncpa [#allocation12], 0 }
   0x9   :  { %23 = vsyncpa [#allocation15], 0 }
   0xa   :  { %24 = vsyncpa [#allocation4], 0 }
   0xb   :  { %26 = vsyncpa [#allocation4 + $0x1], 0  ;;  %s9312_s29 = smov 0   ;;  %s9314_s30 = smov 0  }
   0xc   :  { %s9316_s15 = smov 0   ;;  %s9318_s16 = smov 0  }
   0xd LB: > { %11248 = sst [smem:[#allocation24_spill]] %s9205_s29  ;;  %s9333_s17 = sadd.s32 4294967295, %s9217_s16   ;;  %s9217_s16 = sphi %s9318_s16, %s11313_s16   ;;  %s9213_s15 = sphi %s9316_s15, %s11316_s15   ;;  %s9209_s30 = sphi %s9314_s30, %s11315_s30   ;;  %s9205_s29 = sphi %s9312_s29, %s11314_s29  }
   0xe   : > { %11249 = sst [smem:[#allocation25_spill]] %s9209_s30  ;;  %s6851_s18 = sadd.s32 4294967294, %s9217_s16  }
   0xf   : > { %11250 = sst [smem:[#allocation26_spill]] %s9213_s15  ;;  %s9337_s19 = sadd.s32 1, %s9217_s16  }
  0x10   : > { %11251 = sst [smem:[#allocation27_spill]] %s9217_s16  ;;  %s338_s20 = sadd.s32 1, %s9213_s15 }
  0x11   : > { %11252 = sst [smem:[#allocation28_spill]] %s9337_s19  ;;  %s335_s21 = ssub.s32 %s9217_s16, %s9337_s19 }
  0x12   : > { %p348_p0 = scmp.ne.s32.totalorder %s9213_s15, %s9209_s30  ;;  %p336_p1 = scmp.eq.s32.totalorder %s335_s21, 0 }
  0x13   : > { %p349_p2 = scmp.eq.s32.totalorder %s9333_s17, 1  ;;  %p354_p3 = scmp.ne.s32.totalorder %s9209_s30, %s9205_s29 }
  0x14   : > { %p355_p4 = scmp.eq.s32.totalorder %s6851_s18, 1  ;;  %p6852_p7 = scmp.ge.s32.totalorder %s9217_s16, 1 }
  0x15   : > { %s9348_s22 = scalar_select %p336_p1, %s9213_s15, %s338_s20  }
  0x16   : > { %p9350_p5 = por %p349_p2, %p348_p0  ;;  %p9354_p6 = por %p355_p4, %p354_p3 }
  0x17   : > { %11253 = sst [smem:[#allocation29_spill]] %s9348_s22  ;;  %p362_p8 = scmp.lt.s32.totalorder %s9217_s16, 3 }
  0x18   : > { %s11254_s23 = scalar_select %p9350_p5, 1, 0 }
  0x19   : > { %s11256_s24 = scalar_select %p9354_p6, 1, 0 }
  0x1a   : > { %11255 = sst [smem:[#allocation30_spill]] %s11254_s23  ;;  %p11232_p9 = scmp.eq.s32.totalorder %s9333_s17, 0 }
  0x1b   : > { %11257 = sst [smem:[#allocation31_spill]] %s11256_s24  ;;  %p9361_p10 = pnand %p6852_p7, %p362_p8 }
  0x1c   : > { %s9219_s26 = smov [#allocation5]   ;;  %s9220_s28 = smov [#allocation8]  }
  0x1d   : > { %s11258_s25 = scalar_select %p9361_p10, 1, 0 }
  0x1e   : > { %s386_s27 = sshll.u32 %s9219_s26, 4  ;;  %p8552_p11 = pneg %p9361_p10  ;;  %s387_s27 = int_to_ptr.vmem [resolvable:$true] %s386_s27 }
  0x1f   : > { %s408_s18 = sshll.u32 %s9220_s28, 4  ;;  %s9221_s21 = smov [#allocation11]   ;;  %s9373_s18 = int_to_ptr.vmem [resolvable:$true] %s408_s18 }
  0x20   : > { %p9369_p12 = pnand %p11232_p9, %p8552_p11  ;;  %s9375_s22 = sshll.u32 %s9221_s21, 4  ;;  %s438_s22 = int_to_ptr.vmem [resolvable:$true] %s9375_s22 }
  0x21   : > { %s11260_s2 = sld [smem:[#allocation35_spill]] }
  0x22   : > { %p9385_p0 = pneg %p9369_p12 }
  0x27   : > { %s8883_s26 = scalar_lea.hbm %s11260_s2, 64 }
  0x28   : > { %p8884_p13 = scmp.ne.s32.totalorder %s11260_s2, %s8883_s26  ;;  %p8890_p3 = scmp.lt.u32.totalorder %s8883_s26, %s11260_s2 }
  0x2a   : > { %p8886_p1 = pnand %p9385_p0, %p8884_p13 }
  0x2c   : > { %p8887_p2 = pneg %p8886_p1 }
  0x2e   : > { %p8892_p4 = pnand %p8890_p3, %p8887_p2 }
  0x30   : > { %8895 = shalt.err (!%p8892_p4)
}
  0x31   : > { %s8896_s15 = scalar_lea.vmem %s387_s27, 64  ;;  %p8904_p9 = scmp.lt.s32.totalorder %s387_s27, %s387_s27 }
  0x32   : > { %p8897_p7 = scmp.ne.s32.totalorder %s387_s27, %s8896_s15  ;;  %p8905_p6 = scmp.lt.s32.totalorder %s8896_s15, %s8896_s15 }
  0x34   : > { %p8899_p8 = pnand %p8897_p7, %p9385_p0  ;;  %p8906_p5 = por %p8905_p6, %p8904_p9 }
  0x36   : > { %p8900_p11 = pneg %p8899_p8 }
  0x38   : > { %p8907_p10 = pnand %p8906_p5, %p8900_p11 }
  0x3a   : > { %8910 = shalt.err (!%p8907_p10)
}
  0x3b   : > { %8558 = dma.hbm_to_vmem [thread:$0]  (!%p9369_p12), %s11260_s2, 64, %s387_s27, [#allocation6]  }
  0x3c   : > { %s11262_s4 = sld [smem:[#allocation36_spill]] }
  0x42   : > { %s8911_s26 = scalar_lea.hbm %s11262_s4, 16 }
  0x43   : > { %p8912_p13 = scmp.ne.s32.totalorder %s11262_s4, %s8911_s26  ;;  %p8918_p5 = scmp.lt.u32.totalorder %s8911_s26, %s11262_s4 }
  0x45   : > { %p8914_p1 = pnand %p8912_p13, %p9385_p0 }
  0x47   : > { %p8915_p6 = pneg %p8914_p1 }
  0x49   : > { %p8920_p9 = pnand %p8918_p5, %p8915_p6 }
  0x4b   : > { %8923 = shalt.err (!%p8920_p9)
}
  0x4c   : > { %s8924_s27 = scalar_lea.vmem %s9373_s18, 16  ;;  %s8931_s14 = scalar_lea.vmem %s9373_s18, 32 }
  0x4d   : > { %p8925_p10 = scmp.ne.s32.totalorder %s9373_s18, %s8924_s27  ;;  %p8932_p4 = scmp.lt.s32.totalorder %s9373_s18, %s9373_s18 }
  0x4e   : > { %p8933_p7 = scmp.lt.s32.totalorder %s8931_s14, %s8924_s27 }
  0x4f   : > { %p8927_p2 = pnand %p8925_p10, %p9385_p0 }
  0x50   : > { %p8934_p8 = por %p8933_p7, %p8932_p4 }
  0x51   : > { %p8928_p3 = pneg %p8927_p2 }
  0x53   : > { %p8935_p11 = pnand %p8934_p8, %p8928_p3 }
  0x55   : > { %8938 = shalt.err (!%p8935_p11)
}
  0x56   : > { %8564 = dma.hbm_to_vmem [thread:$0]  (!%p9369_p12), %s11262_s4, 16, %s9373_s18, [#allocation9]  }
  0x57   : > { %s8939_s24 = scalar_lea.hbm %s11219_s8, 5120 }
  0x58   : > { %p8940_p13 = scmp.ne.s32.totalorder %s11219_s8, %s8939_s24  ;;  %p8946_p5 = scmp.lt.u32.totalorder %s8939_s24, %s11219_s8 }
  0x5a   : > { %p8942_p1 = pnand %p8940_p13, %p9385_p0 }
  0x5c   : > { %p8943_p6 = pneg %p8942_p1 }
  0x5e   : > { %p8948_p9 = pnand %p8946_p5, %p8943_p6 }
  0x60   : > { %8951 = shalt.err (!%p8948_p9)
}
  0x61   : > { %s8952_s14 = scalar_lea.vmem %s438_s22, 5120  ;;  %p8960_p4 = scmp.lt.s32.totalorder %s438_s22, %s438_s22 }
  0x62   : > { %p8953_p10 = scmp.ne.s32.totalorder %s438_s22, %s8952_s14  ;;  %p8961_p7 = scmp.lt.s32.totalorder %s8952_s14, %s8952_s14 }
  0x64   : > { %p8955_p2 = pnand %p8953_p10, %p9385_p0  ;;  %p8962_p8 = por %p8961_p7, %p8960_p4 }
  0x66   : > { %p8956_p3 = pneg %p8955_p2 }
  0x68   : > { %p8963_p11 = pnand %p8962_p8, %p8956_p3 }
  0x6a   : > { %8966 = shalt.err (!%p8963_p11)
}
  0x6b   : > { %s9222_s18 = smov 64   ;;  %s9223_s23 = smov 4  }
  0x6c   : > { %8570 = dma.hbm_to_vmem [thread:$0]  (!%p9369_p12), %s11219_s8, 5120, %s438_s22, [#allocation12], %s9222_s18, %s9222_s18, %s9223_s23  }
  0x6d   : > { %s9224_s16 = smov [#allocation14]   ;;  %s9225_s26 = smov [#allocation2]  }
  0x6e   : > { %s466_s24 = sshll.u32 %s9224_s16, 4  ;;  %s375_s21 = sshll.u32 %s9225_s26, 4  ;;  %s467_s24 = int_to_ptr.vmem [resolvable:$true] %s466_s24  ;;  %s376_s21 = int_to_ptr.vmem [resolvable:$true] %s375_s21 }
  0x6f   : > { %s8967_s14 = scalar_lea.hbm %s11222_s11, 5120 }
  0x70   : > { %p8968_p13 = scmp.ne.s32.totalorder %s11222_s11, %s8967_s14  ;;  %p8974_p5 = scmp.lt.u32.totalorder %s8967_s14, %s11222_s11 }
  0x72   : > { %p8970_p1 = pnand %p8968_p13, %p9385_p0 }
  0x74   : > { %p8971_p6 = pneg %p8970_p1 }
  0x76   : > { %p8976_p9 = pnand %p8974_p5, %p8971_p6 }
  0x78   : > { %8979 = shalt.err (!%p8976_p9)
}
  0x79   : > { %s8980_s22 = scalar_lea.vmem %s467_s24, 5120  ;;  %p8988_p4 = scmp.lt.s32.totalorder %s467_s24, %s467_s24 }
  0x7a   : > { %p8981_p10 = scmp.ne.s32.totalorder %s467_s24, %s8980_s22  ;;  %p8989_p7 = scmp.lt.s32.totalorder %s8980_s22, %s8980_s22 }
  0x7c   : > { %p8983_p2 = pnand %p8981_p10, %p9385_p0  ;;  %p8990_p8 = por %p8989_p7, %p8988_p4 }
  0x7e   : > { %p8984_p3 = pneg %p8983_p2 }
  0x80   : > { %p8991_p11 = pnand %p8990_p8, %p8984_p3 }
  0x82   : > { %8994 = shalt.err (!%p8991_p11)
}
  0x83   : > { %8576 = dma.hbm_to_vmem [thread:$0]  (!%p9369_p12), %s11222_s11, 5120, %s467_s24, [#allocation15], %s9222_s18, %s9222_s18, %s9223_s23  }
  0x84   : > { %s8995_s29 = scalar_lea.hbm %s11212_s1, 64 }
  0x85   : > { %p8996_p13 = scmp.ne.s32.totalorder %s11212_s1, %s8995_s29  ;;  %p9002_p5 = scmp.lt.u32.totalorder %s8995_s29, %s11212_s1 }
  0x87   : > { %p8998_p1 = pnand %p8996_p13, %p9385_p0 }
  0x89   : > { %p8999_p6 = pneg %p8998_p1 }
  0x8b   : > { %p9004_p9 = pnand %p9002_p5, %p8999_p6 }
  0x8d   : > { %9007 = shalt.err (!%p9004_p9)
}
  0x8e   : > { %s9008_s27 = scalar_lea.vmem %s376_s21, 64  ;;  %p9016_p4 = scmp.lt.s32.totalorder %s376_s21, %s376_s21 }
  0x8f   : > { %p9009_p10 = scmp.ne.s32.totalorder %s376_s21, %s9008_s27  ;;  %p9017_p7 = scmp.lt.s32.totalorder %s9008_s27, %s9008_s27 }
  0x91   : > { %p9011_p2 = pnand %p9009_p10, %p9385_p0  ;;  %p9018_p8 = por %p9017_p7, %p9016_p4 }
  0x93   : > { %p9012_p3 = pneg %p9011_p2 }
  0x95   : > { %p9019_p11 = pnand %p9018_p8, %p9012_p3 }
  0x97   : > { %9022 = shalt.err (!%p9019_p11)
}
  0x98   : > { %8555 = dma.hbm_to_vmem [thread:$0]  (!%p9369_p12), %s11212_s1, 64, %s376_s21, [#allocation3]  }
  0x99   : > { %s9226_s22 = smov [#allocation7]   ;;  %s9227_s4 = smov [#allocation10]  }
  0x9a   : > { %s397_s2 = sshll.u32 %s9226_s22, 4  ;;  %s421_s13 = sshll.u32 %s9227_s4, 4  ;;  %s398_s2 = int_to_ptr.vmem [resolvable:$true] %s397_s2  ;;  %s422_s13 = int_to_ptr.vmem [resolvable:$true] %s421_s13 }
  0x9b   : > { %s9023_s19 = scalar_lea.hbm %s11214_s3, 16 }
  0x9c   : > { %p9024_p13 = scmp.ne.s32.totalorder %s11214_s3, %s9023_s19  ;;  %p9030_p5 = scmp.lt.u32.totalorder %s9023_s19, %s11214_s3 }
  0x9e   : > { %p9026_p1 = pnand %p9024_p13, %p9385_p0 }
  0xa0   : > { %p9027_p6 = pneg %p9026_p1 }
  0xa2   : > { %p9032_p9 = pnand %p9030_p5, %p9027_p6 }
  0xa4   : > { %9035 = shalt.err (!%p9032_p9)
}
  0xa5   : > { %s9036_s21 = scalar_lea.vmem %s398_s2, 16  ;;  %s9043_s24 = scalar_lea.vmem %s398_s2, 32 }
  0xa6   : > { %p9037_p10 = scmp.ne.s32.totalorder %s398_s2, %s9036_s21  ;;  %p9044_p4 = scmp.lt.s32.totalorder %s398_s2, %s398_s2 }
  0xa7   : > { %p9045_p7 = scmp.lt.s32.totalorder %s9043_s24, %s9036_s21 }
  0xa8   : > { %p9039_p2 = pnand %p9037_p10, %p9385_p0 }
  0xa9   : > { %p9046_p8 = por %p9045_p7, %p9044_p4 }
  0xaa   : > { %p9040_p3 = pneg %p9039_p2 }
  0xac   : > { %p9047_p11 = pnand %p9046_p8, %p9040_p3 }
  0xae   : > { %9050 = shalt.err (!%p9047_p11)
}
  0xaf   : > { %8561 = dma.hbm_to_vmem [thread:$0]  (!%p9369_p12), %s11214_s3, 16, %s398_s2, [#allocation6]  }
  0xb0   : > { %s9051_s29 = scalar_lea.hbm %s11217_s6, 5120 }
  0xb1   : > { %p9052_p13 = scmp.ne.s32.totalorder %s11217_s6, %s9051_s29  ;;  %p9058_p5 = scmp.lt.u32.totalorder %s9051_s29, %s11217_s6 }
  0xb3   : > { %p9054_p1 = pnand %p9052_p13, %p9385_p0 }
  0xb5   : > { %p9055_p6 = pneg %p9054_p1 }
  0xb7   : > { %p9060_p9 = pnand %p9058_p5, %p9055_p6 }
  0xb9   : > { %9063 = shalt.err (!%p9060_p9)
}
  0xba   : > { %s9064_s27 = scalar_lea.vmem %s422_s13, 5120  ;;  %p9072_p4 = scmp.lt.s32.totalorder %s422_s13, %s422_s13 }
  0xbb   : > { %p9065_p10 = scmp.ne.s32.totalorder %s422_s13, %s9064_s27  ;;  %p9073_p7 = scmp.lt.s32.totalorder %s9064_s27, %s9064_s27 }
  0xbd   : > { %p9067_p2 = pnand %p9065_p10, %p9385_p0  ;;  %p9074_p8 = por %p9073_p7, %p9072_p4 }
  0xbf   : > { %p9068_p3 = pneg %p9067_p2 }
  0xc1   : > { %p9075_p11 = pnand %p9074_p8, %p9068_p3 }
  0xc3   : > { %9078 = shalt.err (!%p9075_p11)
}
  0xc4   : > { %8567 = dma.hbm_to_vmem [thread:$0]  (!%p9369_p12), %s11217_s6, 5120, %s422_s13, [#allocation9], %s9222_s18, %s9222_s18, %s9223_s23  }
  0xc5   : > { %s9228_s24 = smov [#allocation13]   ;;  %s9229_s22 = smov [#allocation16]  }
  0xc6   : > { %s453_s14 = sshll.u32 %s9228_s24, 4  ;;  %s479_s4 = sshll.u32 %s9229_s22, 4  ;;  %s454_s14 = int_to_ptr.vmem [resolvable:$true] %s453_s14  ;;  %s480_s4 = int_to_ptr.vmem [resolvable:$true] %s479_s4 }
  0xc7   : > { %s9079_s19 = scalar_lea.hbm %s11221_s10, 5120 }
  0xc8   : > { %p9080_p13 = scmp.ne.s32.totalorder %s11221_s10, %s9079_s19  ;;  %p9086_p5 = scmp.lt.u32.totalorder %s9079_s19, %s11221_s10 }
  0xca   : > { %p9082_p1 = pnand %p9080_p13, %p9385_p0 }
  0xcc   : > { %p9083_p6 = pneg %p9082_p1 }
  0xce   : > { %p9088_p9 = pnand %p9086_p5, %p9083_p6 }
  0xd0   : > { %9091 = shalt.err (!%p9088_p9)
}
  0xd1   : > { %s9092_s13 = scalar_lea.vmem %s454_s14, 5120  ;;  %p9100_p4 = scmp.lt.s32.totalorder %s454_s14, %s454_s14 }
  0xd2   : > { %p9093_p10 = scmp.ne.s32.totalorder %s454_s14, %s9092_s13  ;;  %p9101_p7 = scmp.lt.s32.totalorder %s9092_s13, %s9092_s13 }
  0xd4   : > { %p9095_p2 = pnand %p9093_p10, %p9385_p0  ;;  %p9102_p8 = por %p9101_p7, %p9100_p4 }
  0xd6   : > { %p9096_p3 = pneg %p9095_p2 }
  0xd8   : > { %p9103_p11 = pnand %p9102_p8, %p9096_p3 }
  0xda   : > { %9106 = shalt.err (!%p9103_p11)
}
  0xdb   : > { %8573 = dma.hbm_to_vmem [thread:$0]  (!%p9369_p12), %s11221_s10, 5120, %s454_s14, [#allocation12], %s9222_s18, %s9222_s18, %s9223_s23  }
  0xdc   : > { %s9107_s30 = scalar_lea.hbm %s11223_s12, 1024 }
  0xdd   : > { %p9108_p13 = scmp.ne.s32.totalorder %s11223_s12, %s9107_s30  ;;  %p9114_p5 = scmp.lt.u32.totalorder %s9107_s30, %s11223_s12 }
  0xdf   : > { %p9110_p1 = pnand %p9108_p13, %p9385_p0 }
  0xe1   : > { %p9111_p6 = pneg %p9110_p1 }
  0xe3   : > { %p9116_p9 = pnand %p9114_p5, %p9111_p6 }
  0xe5   : > { %9119 = shalt.err (!%p9116_p9)
}
  0xe6   : > { %s9120_s15 = scalar_lea.vmem %s480_s4, 1024  ;;  %p9128_p4 = scmp.lt.s32.totalorder %s480_s4, %s480_s4 }
  0xe7   : > { %p9121_p10 = scmp.ne.s32.totalorder %s480_s4, %s9120_s15  ;;  %p9129_p7 = scmp.lt.s32.totalorder %s9120_s15, %s9120_s15 }
  0xe9   : > { %p9123_p2 = pnand %p9121_p10, %p9385_p0  ;;  %p9130_p8 = por %p9129_p7, %p9128_p4 }
  0xeb   : > { %p9124_p3 = pneg %p9123_p2 }
  0xed   : > { %p9131_p11 = pnand %p9130_p8, %p9124_p3 }
  0xef   : > { %9134 = shalt.err (!%p9131_p11)
}
  0xf0   : > { %8579 = dma.hbm_to_vmem [thread:$0]  (!%p9369_p12), %s11223_s12, 1024, %s480_s4, [#allocation15], %s9222_s18, %s9222_s18, %s9223_s23  }
  0xf1   : > { %p11263_p13 = scmp.ne.s32.totalorder %s11258_s25, 0 }
  0xf3   : > { %508 = sbr.rel (%p11263_p13) target bundleno = 3491 (0xda3), region = 76 }
  0xfa   : > { %p11264_p0 = scmp.eq.s32.totalorder %s9333_s17, 0 }
  0xfc   : > { %9180 = dma.done.wait (%p11264_p0), [#allocation3], 64   ;;  %p11265_p1 = pmov %p11264_p0 }
  0xfd   : > { %p11266_p6 = pmov %p11264_p0 }
  0xfe   : > { %9182 = vsyncadd (%p11265_p1), [#allocation3], 4294967232 }
  0xff   : > { %9184 = dma.done.wait (%p11266_p6), [#allocation6], 80   ;;  %p11267_p5 = pmov %p11264_p0 }
 0x100   : > { %p11268_p9 = pmov %p11264_p0 }
 0x101   : > { %9186 = vsyncadd (%p11267_p5), [#allocation6], 4294967216 }
 0x102   : > { %9188 = dma.done.wait (%p11268_p9), [#allocation9], 5136   ;;  %p11269_p12 = pmov %p11264_p0 }
 0x103   : > { %p11270_p10 = pmov %p11264_p0 }
 0x104   : > { %9190 = vsyncadd (%p11269_p12), [#allocation9], 4294962160 }
 0x105   : > { %9192 = dma.done.wait (%p11270_p10), [#allocation12], 10240   ;;  %p11271_p2 = pmov %p11264_p0 }
 0x106   : > { %p11272_p3 = pmov %p11264_p0 }
 0x107   : > { %9194 = vsyncadd (%p11271_p2), [#allocation12], 4294957056 }
 0x108   : > { %9196 = dma.done.wait (%p11272_p3), [#allocation15], 6144   ;;  %p11273_p4 = pmov %p11264_p0 }
 0x109   : > { %s6874_s25 = sshll.u32 %s9333_s17, 3  ;;  %v9230_v0 = vmov 2   ;;  %v9231_v1 = vmov 1   ;;  %v9232_v7 = vmov 0   ;;  %v8675_v10 = vld [vmem:[#allocation10] sm:$0xff]   ;;  %v8676_v12 = vld [vmem:[#allocation10 + $0x8] sm:$0xff]  }
 0x10a   : > { %9198 = vsyncadd (%p11273_p4), [#allocation15], 4294961152  ;;  %8656 = vset.pattern.permute.xlu0 %v9230_v0  ;;  %8652 = vset.pattern.permute.xlu1 %v9231_v1  ;;  %p588_p7 = scmp.lt.s32.totalorder %s6874_s25, 15  ;;  %v8677_v14 = vld [vmem:[#allocation10 + $0x10] sm:$0xff]   ;;  %v8678_v17 = vld [vmem:[#allocation10 + $0x18] sm:$0xff]   ;;  %vm9234_vm0 = vmmov 0  }
 0x10b   : > { %7534 = vmatprep.subr.bf16.mxu0 %v8675_v10  ;;  %v8679_v18 = vld [vmem:[#allocation10 + $0x20] sm:$0xff]   ;;  %v8680_v19 = vld [vmem:[#allocation10 + $0x28] sm:$0xff]   ;;  %v8681_v20 = vld [vmem:[#allocation10 + $0x30] sm:$0xff]   ;;  %vm2148_vm1 = vcmask 1041409   ;;  %vm2150_vm2 = vcmask 1042434   ;;  %vm2152_vm3 = vcmask 1043459  }
 0x10c   : > { %s11318_s25 = smov (!%p588_p7, %s6874_s25), 15  ;;  %7535 = vmatpush3.bf16.msra.mxu0 %v8675_v10  ;;  %v8682_v21 = vld [vmem:[#allocation10 + $0x38] sm:$0xff]   ;;  %v9651_v34 = vld [vmem:[#allocation2] ss:$0 sm:$0xff]  ;;  %v9653_v35 = vld [vmem:[#allocation2 + $0x1] ss:$0 sm:$0xff] }
 0x10d   : > { %s7180_s20 = sshll.u32 %s11318_s25, 4  ;;  %7536 = vmatprep.subr.bf16.mxu0 %v8676_v12  ;;  %v9640_v27 = vld [vmem:[%s11216_s5] sm:$0xff]   ;;  %v9678_v59 = vld [vmem:[#allocation7] ss:$0 sm:$0xff]  ;;  %v9680_v61 = vld [vmem:[#allocation8] ss:$0 sm:$0xff] }
 0x10e   : > { %s9595_s23 = scalar_lea.vmem %s11211_s0, %s7180_s20  ;;  %v9657_v37 = vld [vmem:[#allocation5 + $0x1] ss:$0 sm:$0xff]  ;;  %v9659_v39 = vld [vmem:[#allocation2 + $0x2] ss:$0 sm:$0xff]  ;;  %v9661_v40 = vld [vmem:[#allocation5 + $0x2] ss:$0 sm:$0xff] }
 0x10f   : > { %v596_v2 = vld [vmem:[%s9595_s23 + $0x8] sm:$0xff]  ;;  %v595_v3 = vld [vmem:[%s9595_s23] sm:$0xff]  ;;  %v602_v5 = vld [vmem:[%s9595_s23 + $0x38] sm:$0xff]  ;;  %vm2154_vm4 = vcmask 1044484   ;;  %vm2156_vm5 = vcmask 1045509   ;;  %vm2158_vm6 = vcmask 1046534  }
 0x110   : > { %819 = vperm.xlu0 %8656, %v596_v2   ;;  %714 = vperm.xlu1 %8652, %v595_v3   ;;  %v599_v4 = vld [vmem:[%s9595_s23 + $0x20] sm:$0xff]  ;;  %v598_v6 = vld [vmem:[%s9595_s23 + $0x18] sm:$0xff]  ;;  %v9604_v8 = vld [vmem:[%s9595_s23 + $0x48] sm:$0xff]  ;;  %vm2160_vm7 = vcmask 1047559   ;;  %s11304_s22 = sld [smem:[#allocation25_spill]]  ;;  %s11305_s26 = sld [smem:[#allocation37_spill]] }
 0x111   : > { %v597_v9 = vld [vmem:[%s9595_s23 + $0x10] sm:$0xff]  ;;  %v600_v11 = vld [vmem:[%s9595_s23 + $0x28] sm:$0xff]  ;;  %7537 = vmatpush3.bf16.msra.mxu0 %v8676_v12  ;;  %v607_v15 = vld [vmem:[%s9595_s23 + $0x60] sm:$0xff]  ;;  %s11306_s15 = sld [smem:[#allocation30_spill]]  ;;  %s7177_s14 = sshll.u32 %s9333_s17, 7 }
 0x112   : > { %v605_v13 = vld [vmem:[%s9595_s23 + $0x50] sm:$0xff]  ;;  %7538 = vmatprep.subr.bf16.mxu0 %v8677_v14  ;;  %v608_v22 = vld [vmem:[%s9595_s23 + $0x68] sm:$0xff]  ;;  %v603_v23 = vld [vmem:[%s9595_s23 + $0x40] sm:$0xff]  ;;  %s11307_s18 = sld [smem:[#allocation38_spill]]  ;;  %s9236_s13 = smov [#allocation17]  }
 0x113   : > { %v601_v16 = vld [vmem:[%s9595_s23 + $0x30] sm:$0xff]  ;;  %v610_v25 = vld [vmem:[%s9595_s23 + $0x78] sm:$0xff]  ;;  %v9663_v41 = vld [vmem:[#allocation5] ss:$0 sm:$0xff]  ;;  %s9139_s2 = sshll.u32 %s9236_s13, 4  ;;  %s9140_s2 = int_to_ptr.vmem [resolvable:$false] %s9139_s2 }
 0x114   : > { %831 = vperm.xlu0 %8656, %v599_v4   ;;  %718 = vperm.xlu1 %8652, %v596_v2   ;;  %v609_v24 = vld [vmem:[%s9595_s23 + $0x70] sm:$0xff]  ;;  %v606_v26 = vld [vmem:[%s9595_s23 + $0x58] sm:$0xff]  ;;  %s9141_s21 = scalar_lea.vmem %s9140_s2, 256 }
 0x115   : > { %7539 = vmatpush3.bf16.msra.mxu0 %v8677_v14 }
 0x116   : > { %7540 = vmatprep.subr.bf16.mxu0 %v8678_v17  ;;  %s584_s30 = sand.u32 1, %s11304_s22  }
 0x117   : > { %s6873_s29 = sshll.u32 %s584_s30, 3  ;;  %s6691_s4 = scalar_lea.sflag [#allocation4], %s584_s30 }
 0x118   : > { %843 = vperm.xlu0 %8656, %v602_v5   ;;  %8653 = vset.pattern.permute.xlu1 %v9232_v7  ;;  %s586_s27 = scalar_lea.vmem [#allocation17], %s6873_s29  ;;  %s11169_s23 = scalar_lea.hbm %s11307_s18, %s7177_s14 }
 0x119   : > { %629 = vperm.xlu1 %8653, %v598_v6   ;;  %7541 = vmatpush3.bf16.msra.mxu0 %v8678_v17  ;;  %s6704_s25 = sshll.u32 %s586_s27, 4  ;;  %p11308_p11 = scmp.ne.s32.totalorder %s11306_s15, 0  ;;  %s11171_s25 = int_to_ptr.vmem [resolvable:$true] %s6704_s25 }
 0x11a   : > { %7542 = vmatprep.subr.bf16.mxu0 %v8679_v18  ;;  %s9135_s17 = scalar_lea.vmem %s11171_s25, 128  ;;  %p9142_p1 = scmp.lt.s32.totalorder %s11171_s25, %s9140_s2 }
 0x11b   : > { %p9136_p8 = scmp.ne.s32.totalorder %s11171_s25, %s9135_s17  ;;  %p9143_p6 = scmp.lt.s32.totalorder %s9141_s21, %s9135_s17 }
 0x11c   : > { %851 = vperm.xlu0 %8656, %v9604_v8  }
 0x11d   : > { %8654 = vset.pattern.permute.xlu1 %v9231_v1  ;;  %7543 = vmatpush3.bf16.msra.mxu0 %v8679_v18  ;;  %p9137_p13 = pnand %p9136_p8, %p11308_p11  ;;  %p9144_p5 = por %p9143_p6, %p9142_p1 }
 0x11e   : > { %726 = vperm.xlu1 %8654, %v598_v6   ;;  %7544 = vmatprep.subr.bf16.mxu0 %v8680_v19 }
 0x11f   : > { %p9138_p0 = pneg %p9137_p13 }
 0x120   : > { %8667 = vset.pattern.permute.xlu0 %v9232_v7 }
 0x121   : > { %614 = vperm.xlu0 %8667, %v595_v3   ;;  %7545 = vmatpush3.bf16.msra.mxu0 %v8680_v19  ;;  %p9145_p9 = pnand %p9144_p5, %p9138_p0 }
 0x122   : > { %8655 = vset.pattern.permute.xlu1 %v9230_v0  ;;  %7546 = vmatprep.subr.bf16.mxu0 %v8681_v20 }
 0x123   : > { %815 = vperm.xlu1 %8655, %v595_v3  }
 0x125   : > { %619 = vperm.xlu0 %8667, %v596_v2   ;;  %7547 = vmatpush3.bf16.msra.mxu0 %v8681_v20 }
 0x126   : > { %7548 = vmatprep.subr.bf16.mxu0 %v8682_v21 }
 0x127   : > { %823 = vperm.xlu1 %8655, %v597_v9  }
 0x129   : > { %624 = vperm.xlu0 %8667, %v597_v9   ;;  %7549 = vmatpush3.bf16.msra.mxu0 %v8682_v21 }
 0x12a   : > { %7566 = vmatprep.subr.bf16.mxu0 %v9640_v27 }
 0x12b   : > { %827 = vperm.xlu1 %8655, %v598_v6  }
 0x12d   : > { %634 = vperm.xlu0 %8667, %v599_v4  }
 0x12f   : > { %8657 = vset.pattern.permute.xlu1 %v9232_v7 }
 0x130   : > { %639 = vperm.xlu1 %8657, %v600_v11  }
 0x131   : > { %659 = vperm.xlu0 %8667, %v9604_v8  }
 0x134   : > { %8658 = vset.pattern.permute.xlu1 %v9231_v1 }
 0x135   : > { %664 = vperm.xlu0 %8667, %v605_v13   ;;  %730 = vperm.xlu1 %8658, %v599_v4  }
 0x139   : > { %674 = vperm.xlu0 %8667, %v607_v15   ;;  %8659 = vset.pattern.permute.xlu1 %v9232_v7 }
 0x13a   : > { %644 = vperm.xlu1 %8659, %v601_v16  }
 0x13d   : > { %8668 = vset.pattern.permute.xlu0 %v9231_v1 }
 0x13e   : > { %722 = vperm.xlu0 %8668, %v597_v9   ;;  %649 = vperm.xlu1 %8659, %v602_v5  }
 0x142   : > { %734 = vperm.xlu0 %8668, %v600_v11   ;;  %8660 = vset.pattern.permute.xlu1 %v9231_v1 }
 0x143   : > { %742 = vperm.xlu1 %8660, %v602_v5  }
 0x146   : > { %738 = vperm.xlu0 %8668, %v601_v16  }
 0x147   : > { %8661 = vset.pattern.permute.xlu1 %v9230_v0 }
 0x148   : > { %835 = vperm.xlu1 %8661, %v600_v11  }
 0x14a   : > { %754 = vperm.xlu0 %8668, %v605_v13  }
 0x14c   : > { %839 = vperm.xlu1 %8661, %v601_v16  }
 0x14e   : > { %766 = vperm.xlu0 %8668, %v608_v22  }
 0x150   : > { %8662 = vset.pattern.permute.xlu1 %v9232_v7 }
 0x151   : > { %654 = vperm.xlu1 %8662, %v603_v23  }
 0x152   : > { %770 = vperm.xlu0 %8668, %v609_v24  }
 0x155   : > { %8663 = vset.pattern.permute.xlu1 %v9231_v1 }
 0x156   : > { %746 = vperm.xlu1 %8663, %v603_v23   ;;  %8673 = vset.pattern.permute.xlu0 %v9230_v0 }
 0x157   : > { %863 = vperm.xlu0 %8673, %v607_v15  }
 0x15a   : > { %750 = vperm.xlu1 %8663, %v9604_v8  }
 0x15b   : > { %875 = vperm.xlu0 %8673, %v610_v25  }
 0x15e   : > { %8664 = vset.pattern.permute.xlu1 %v9232_v7 }
 0x15f   : > { %669 = vperm.xlu1 %8664, %v606_v26  }
 0x163   : > { %8665 = vset.pattern.permute.xlu1 %v9231_v1 }
 0x164   : > { %758 = vperm.xlu1 %8665, %v606_v26  }
 0x168   : > { %8666 = vset.pattern.permute.xlu1 %v9230_v0 }
 0x169   : > { %847 = vperm.xlu1 %8666, %v603_v23  }
 0x16d   : > { %855 = vperm.xlu1 %8666, %v605_v13  }
 0x171   : > { %859 = vperm.xlu1 %8666, %v606_v26  }
 0x175   : > { %8669 = vset.pattern.permute.xlu1 %v9232_v7 }
 0x176   : > { %679 = vperm.xlu1 %8669, %v608_v22  }
 0x17a   : > { %8670 = vset.pattern.permute.xlu1 %v9231_v1 }
 0x17b   : > { %762 = vperm.xlu1 %8670, %v607_v15  }
 0x17f   : > { %8671 = vset.pattern.permute.xlu1 %v9232_v7 }
 0x180   : > { %684 = vperm.xlu1 %8671, %v609_v24  }
 0x184   : > { %689 = vperm.xlu1 %8671, %v610_v25  }
 0x188   : > { %8672 = vset.pattern.permute.xlu1 %v9231_v1 }
 0x189   : > { %774 = vperm.xlu1 %8672, %v610_v25  }
 0x18d   : > { %8674 = vset.pattern.permute.xlu1 %v9230_v0 }
 0x18e   : > { %867 = vperm.xlu1 %8674, %v608_v22  }
 0x18f   : > { %v715_v28 = vpop.permute.xlu1 %714  ;;  %v820_v29 = vpop.permute.xlu0 %819 }
 0x190   : > { %v781_v46 = vmul.f32 %v9653_v35, %v715_v28  ;;  %v963_v47 = vmul.f32 %v9657_v37, %v715_v28  ;;  %v883_v55 = vmul.f32 %v9659_v39, %v820_v29  ;;  %v1001_v56 = vmul.f32 %v9661_v40, %v820_v29 }
 0x192   : > { %871 = vperm.xlu1 %8674, %v609_v24  }
 0x193   : > { %v719_v30 = vpop.permute.xlu1 %718  ;;  %v9645_v31 = vpop.permute.xlu0 %831 }
 0x194   : > { %v782_v57 = vmul.f32 %v9653_v35, %v719_v30  ;;  %v964_v58 = vmul.f32 %v9657_v37, %v719_v30  ;;  %v886_v30 = vmul.f32 %v9659_v39, %v9645_v31 }
 0x197   : > { %v9647_v32 = vpop.permute.xlu0 %843 }
 0x198   : > { %v9649_v33 = vpop.permute.xlu1 %629 }
 0x199   : > { %v699_v42 = vmul.f32 %v9651_v34, %v9649_v33 }
 0x19b   : > { %v9655_v36 = vpop.permute.xlu0 %851 }
 0x19d   : > { %v727_v38 = vpop.permute.xlu1 %726 }
 0x19e   : > { %v784_v43 = vmul.f32 %v9653_v35, %v727_v38 }
 0x1a0   : > { %v800_v44 = vadd.f32 %v784_v43, %v699_v42  ;;  %v615_v45 = vpop.permute.xlu0 %614  ;;  %v966_v43 = vmul.f32 %v9657_v37, %v727_v38  ;;  %v8692_v38 = vld [vmem:[#allocation11 + $0x8] sm:$0xff]  }
 0x1a1   : > { %v696_v48 = vmul.f32 %v9651_v34, %v615_v45  ;;  %v942_v49 = vmul.f32 %v9663_v41, %v615_v45  ;;  %v945_v45 = vmul.f32 %v9663_v41, %v9649_v33 }
 0x1a2   : > { %v816_v50 = vpop.permute.xlu1 %815 }
 0x1a3   : > { %v797_v51 = vadd.f32 %v781_v46, %v696_v48  ;;  %v979_v52 = vadd.f32 %v963_v47, %v942_v49  ;;  %v882_v53 = vmul.f32 %v9659_v39, %v816_v50  ;;  %v1000_v54 = vmul.f32 %v9661_v40, %v816_v50 }
 0x1a4   : > { %v620_v60 = vpop.permute.xlu0 %619  ;;  %v982_v50 = vadd.f32 %v966_v43, %v945_v45  ;;  %v8694_v45 = vld [vmem:[#allocation11 + $0x18] sm:$0xff]  }
 0x1a5   : > { %v898_v62 = vadd.f32 %v882_v53, %v797_v51  ;;  %v1016_v63 = vadd.f32 %v1000_v54, %v979_v52  ;;  %v697_v0 = vmul.f32 %v9651_v34, %v620_v60  ;;  %v943_v1 = vmul.f32 %v9663_v41, %v620_v60  ;;  %v8691_v54 = vld [vmem:[#allocation11] sm:$0xff]  }
 0x1a6   : > { %v824_v2 = vpop.permute.xlu1 %823  ;;  %7598 = vmatprep.subr.bf16.mxu1 %v8691_v54 }
 0x1a7   : > { %v798_v3 = vadd.f32 %v782_v57, %v697_v0  ;;  %v980_v4 = vadd.f32 %v964_v58, %v943_v1  ;;  %v9685_v6 = vadd.f32 %v9678_v59, %v898_v62  ;;  %v9688_v9 = vadd.f32 %v9680_v61, %v1016_v63  ;;  %7599 = vmatpush3.bf16.msra.mxu1 %v8691_v54 }
 0x1a8   : > { %v625_v5 = vpop.permute.xlu0 %624  ;;  %v1004_v63 = vmul.f32 %v9661_v40, %v9645_v31  ;;  %v889_v0 = vmul.f32 %v9659_v39, %v9647_v32  ;;  %v1007_v1 = vmul.f32 %v9661_v40, %v9647_v32  ;;  %7600 = vmatprep.subr.bf16.mxu1 %v8692_v38 }
 0x1a9   : > { %v899_v7 = vadd.f32 %v883_v55, %v798_v3  ;;  %v1017_v8 = vadd.f32 %v1001_v56, %v980_v4  ;;  %v1095_v16 = vmax.f32 %v9688_v9, 0.0  ;;  %v1055_v17 = vmax.f32 %v9685_v6, 0.0 }
 0x1aa   : > { %v828_v10 = vpop.permute.xlu1 %827  ;;  %v698_v51 = vmul.f32 %v9651_v34, %v625_v5  ;;  %v944_v52 = vmul.f32 %v9663_v41, %v625_v5  ;;  %v884_v3 = vmul.f32 %v9659_v39, %v824_v2  ;;  %v1002_v4 = vmul.f32 %v9661_v40, %v824_v2 }
 0x1ab   : > { %v9691_v11 = vadd.f32 %v9678_v59, %v899_v7  ;;  %v885_v12 = vmul.f32 %v9659_v39, %v828_v10  ;;  %v9695_v13 = vadd.f32 %v9680_v61, %v1017_v8  ;;  %v1003_v46 = vmul.f32 %v9661_v40, %v828_v10  ;;  %v8693_v10 = vld [vmem:[#allocation11 + $0x10] sm:$0xff]   ;;  %7601 = vmatpush3.bf16.msra.mxu1 %v8692_v38 }
 0x1ac   : > { %v635_v14 = vpop.permute.xlu0 %634  ;;  %7602 = vmatprep.subr.bf16.mxu1 %v8693_v10 }
 0x1ad   : > { %v901_v15 = vadd.f32 %v885_v12, %v800_v44  ;;  %v1096_v18 = vmax.f32 %v9695_v13, 0.0  ;;  %v1056_v19 = vmax.f32 %v9691_v11, 0.0  ;;  %v700_v26 = vmul.f32 %v9651_v34, %v635_v14 }
 0x1ae   : > { %v1019_v53 = vadd.f32 %v1003_v46, %v982_v50  ;;  %v946_v33 = vmul.f32 %v9663_v41, %v635_v14 }
 0x1af   : > { %v640_v22 = vpop.permute.xlu1 %639  ;;  %v1127_v24 = vpack.c.bf16 %v1096_v18, %v1095_v16  ;;  %v9707_v25 = vpack.c.bf16 %v1056_v19, %v1055_v17  ;;  %v9728_v55 = vadd.f32 %v9678_v59, %v901_v15  ;;  %7603 = vmatpush3.bf16.msra.mxu1 %v8693_v10  ;;  %v8695_v10 = vld [vmem:[#allocation11 + $0x20] sm:$0xff]  }
 0x1b0   : > { %v9705_v23 = vpop.permute.xlu0 %659  ;;  %v9743_v5 = vadd.f32 %v9680_v61, %v1019_v53  ;;  %v701_v12 = vmul.f32 %v9651_v34, %v640_v22  ;;  %v947_v14 = vmul.f32 %v9663_v41, %v640_v22  ;;  %7604 = vmatprep.subr.bf16.mxu1 %v8694_v45 }
 0x1b1   : > { %7550 = vmatprep.mubr.bf16.mxu0 %v1127_v24  ;;  %v1058_v31 = vmax.f32 %v9728_v55, 0.0 }
 0x1b3   : > { %7605 = vmatpush3.bf16.msra.mxu1 %v8694_v45 }
 0x1b4   : > { %v731_v28 = vpop.permute.xlu1 %730  ;;  %v9710_v29 = vpop.permute.xlu0 %664  ;;  %7606 = vmatprep.subr.bf16.mxu1 %v8695_v10 }
 0x1b5   : > { %v785_v42 = vmul.f32 %v9653_v35, %v731_v28  ;;  %v967_v56 = vmul.f32 %v9657_v37, %v731_v28 }
 0x1b7   : > { %v801_v44 = vadd.f32 %v785_v42, %v700_v26  ;;  %v983_v15 = vadd.f32 %v967_v56, %v946_v33  ;;  %7607 = vmatpush3.bf16.msra.mxu1 %v8695_v10 }
 0x1b8   : > { %v9719_v47 = vpop.permute.xlu0 %674 }
 0x1b9   : > { %v9721_v48 = vadd.f32 %v886_v30, %v801_v44  ;;  %v9723_v49 = vpop.permute.xlu1 %644  ;;  %v1098_v44 = vmax.f32 %v9743_v5, 0.0  ;;  %v1020_v46 = vadd.f32 %v1004_v63, %v983_v15  ;;  %v8684_v15 = vld [vmem:[%s11216_s5 + $0x8] sm:$0xff]  }
 0x1ba   : > { %v702_v50 = vmul.f32 %v9651_v34, %v9723_v49 }
 0x1bd   : > { %v723_v57 = vpop.permute.xlu0 %722  ;;  %v650_v58 = vpop.permute.xlu1 %649 }
 0x1be   : > { %v783_v60 = vmul.f32 %v9653_v35, %v723_v57  ;;  %v965_v62 = vmul.f32 %v9657_v37, %v723_v57  ;;  %v703_v18 = vmul.f32 %v9651_v34, %v650_v58  ;;  %v949_v24 = vmul.f32 %v9663_v41, %v650_v58 }
 0x1c0   : > { %v799_v7 = vadd.f32 %v783_v60, %v698_v51  ;;  %v981_v8 = vadd.f32 %v965_v62, %v944_v52 }
 0x1c1   : > { %v735_v32 = vpop.permute.xlu0 %734 }
 0x1c2   : > { %v900_v16 = vadd.f32 %v884_v3, %v799_v7  ;;  %v1018_v17 = vadd.f32 %v1002_v4, %v981_v8  ;;  %v786_v2 = vmul.f32 %v9653_v35, %v735_v32  ;;  %v743_v19 = vpop.permute.xlu1 %742  ;;  %v968_v26 = vmul.f32 %v9657_v37, %v735_v32 }
 0x1c3   : > { %v788_v28 = vmul.f32 %v9653_v35, %v743_v19  ;;  %v970_v30 = vmul.f32 %v9657_v37, %v743_v19 }
 0x1c4   : > { %v9755_v22 = vadd.f32 %v9678_v59, %v900_v16  ;;  %v9758_v42 = vadd.f32 %v9680_v61, %v1018_v17  ;;  %v802_v43 = vadd.f32 %v786_v2, %v701_v12  ;;  %v984_v57 = vadd.f32 %v968_v26, %v947_v14  ;;  %v8696_v26 = vld [vmem:[#allocation11 + $0x28] sm:$0xff]  }
 0x1c5   : > { %v804_v51 = vadd.f32 %v788_v28, %v703_v18  ;;  %v986_v52 = vadd.f32 %v970_v30, %v949_v24  ;;  %v739_v53 = vpop.permute.xlu0 %738  ;;  %v9776_v12 = vadd.f32 %v9680_v61, %v1020_v46  ;;  %v9785_v17 = vadd.f32 %v9678_v59, %v9721_v48  ;;  %v8685_v30 = vld [vmem:[%s11216_s5 + $0x10] sm:$0xff]   ;;  %7608 = vmatprep.subr.bf16.mxu1 %v8696_v26 }
 0x1c6   : > { %v1057_v54 = vmax.f32 %v9755_v22, 0.0  ;;  %v787_v56 = vmul.f32 %v9653_v35, %v739_v53  ;;  %v969_v60 = vmul.f32 %v9657_v37, %v739_v53  ;;  %v1097_v63 = vmax.f32 %v9758_v42, 0.0  ;;  %7609 = vmatpush3.bf16.msra.mxu1 %v8696_v26 }
 0x1c7   : > { %v905_v58 = vadd.f32 %v889_v0, %v804_v51  ;;  %v836_v62 = vpop.permute.xlu1 %835  ;;  %v948_v0 = vmul.f32 %v9663_v41, %v9723_v49  ;;  %v1099_v28 = vmax.f32 %v9776_v12, 0.0 }
 0x1c8   : > { %v9771_v3 = vpack.c.bf16 %v1058_v31, %v1057_v54  ;;  %v803_v4 = vadd.f32 %v787_v56, %v702_v50  ;;  %v887_v7 = vmul.f32 %v9659_v39, %v836_v62  ;;  %v1005_v8 = vmul.f32 %v9661_v40, %v836_v62 }
 0x1c9   : > { %v1128_v14 = vpack.c.bf16 %v1098_v44, %v1097_v63  ;;  %v1023_v31 = vadd.f32 %v1007_v1, %v986_v52  ;;  %v985_v18 = vadd.f32 %v969_v60, %v948_v0  ;;  %v9797_v48 = vadd.f32 %v9678_v59, %v905_v58  ;;  %v8686_v58 = vld [vmem:[%s11216_s5 + $0x18] sm:$0xff]  }
 0x1ca   : > { %v903_v32 = vadd.f32 %v887_v7, %v802_v43  ;;  %v1021_v16 = vadd.f32 %v1005_v8, %v984_v57 }
 0x1cb   : > { %7551 = vmatmul.mubr.bf16.vlgmr.msra.gmra.mrb[0].mxu0 %v1128_v14  ;;  %v840_v2 = vpop.permute.xlu1 %839  ;;  %v9804_v43 = vadd.f32 %v9680_v61, %v1023_v31  ;;  %v1062_v7 = vmax.f32 %v9797_v48, 0.0  ;;  %v8687_v31 = vld [vmem:[%s11216_s5 + $0x20] sm:$0xff]  }
 0x1cc   : > { %v9788_v19 = vadd.f32 %v9678_v59, %v903_v32  ;;  %v9791_v49 = vadd.f32 %v9680_v61, %v1021_v16  ;;  %v888_v24 = vmul.f32 %v9659_v39, %v840_v2  ;;  %v1006_v1 = vmul.f32 %v9661_v40, %v840_v2  ;;  %7567 = vmatpush3.bf16.msra.mxu0 %v9640_v27 }
 0x1cd   : > { %7568 = vmatprep.subr.bf16.mxu0 %v8684_v15  ;;  %v1059_v27 = vmax.f32 %v9785_v17, 0.0  ;;  %v1102_v63 = vmax.f32 %v9804_v43, 0.0 }
 0x1ce   : > { %v904_v44 = vadd.f32 %v888_v24, %v803_v4  ;;  %v1022_v45 = vadd.f32 %v1006_v1, %v985_v18  ;;  %v1100_v46 = vmax.f32 %v9791_v49, 0.0  ;;  %v1060_v50 = vmax.f32 %v9788_v19, 0.0  ;;  %v8688_v24 = vld [vmem:[%s11216_s5 + $0x28] sm:$0xff]  }
 0x1cf   : > { %v705_v1 = vmul.f32 %v9651_v34, %v9705_v23 }
 0x1d0   : > { %v9814_v53 = vadd.f32 %v9678_v59, %v904_v44  ;;  %v9817_v54 = vadd.f32 %v9680_v61, %v1022_v45  ;;  %v655_v56 = vpop.permute.xlu1 %654  ;;  %v1129_v57 = vpack.c.bf16 %v1100_v46, %v1099_v28  ;;  %7569 = vmatpush3.bf16.msra.mxu0 %v8684_v15  ;;  %v9822_v60 = vpack.c.bf16 %v1060_v50, %v1059_v27  ;;  %v8689_v44 = vld [vmem:[%s11216_s5 + $0x30] sm:$0xff]   ;;  %v8690_v50 = vld [vmem:[%s11216_s5 + $0x38] sm:$0xff]  }
 0x1d1   : > { %7570 = vmatprep.subr.bf16.mxu0 %v8685_v30  ;;  %v704_v32 = vmul.f32 %v9651_v34, %v655_v56  ;;  %v891_v28 = vmul.f32 %v9659_v39, %v9655_v36 }
 0x1d2   : > { %7554 = vmatprep.mubr.bf16.mxu0 %v1129_v57  ;;  %v1101_v62 = vmax.f32 %v9817_v54, 0.0  ;;  %v1061_v4 = vmax.f32 %v9814_v53, 0.0  ;;  %v951_v57 = vmul.f32 %v9663_v41, %v9705_v23  ;;  %v950_v23 = vmul.f32 %v9663_v41, %v655_v56 }
 0x1d4   : > { %v1130_v14 = vpack.c.bf16 %v1102_v63, %v1101_v62  ;;  %7571 = vmatpush3.bf16.msra.mxu0 %v8685_v30  ;;  %v9832_v15 = vpack.c.bf16 %v1062_v7, %v1061_v4  ;;  %v755_v62 = vpop.permute.xlu0 %754 }
 0x1d5   : > { %v747_v10 = vpop.permute.xlu1 %746  ;;  %7572 = vmatprep.subr.bf16.mxu0 %v8686_v58 }
 0x1d6   : > { %v789_v16 = vmul.f32 %v9653_v35, %v747_v10  ;;  %7555 = vmatmul.mubr.bf16.gmra.mrb[4].mxu0 %v1130_v14  ;;  %v971_v14 = vmul.f32 %v9657_v37, %v747_v10 }
 0x1d8   : > { %v805_v18 = vadd.f32 %v789_v16, %v704_v32  ;;  %7573 = vmatpush3.bf16.msra.mxu0 %v8686_v58  ;;  %v706_v16 = vmul.f32 %v9651_v34, %v9710_v29  ;;  %v987_v10 = vadd.f32 %v971_v14, %v950_v23 }
 0x1d9   : > { %v751_v2 = vpop.permute.xlu1 %750  ;;  %7574 = vmatprep.subr.bf16.mxu0 %v8687_v31 }
 0x1da   : > { %v790_v26 = vmul.f32 %v9653_v35, %v751_v2  ;;  %v972_v27 = vmul.f32 %v9657_v37, %v751_v2  ;;  %v791_v2 = vmul.f32 %v9653_v35, %v755_v62 }
 0x1dc   : > { %v806_v30 = vadd.f32 %v790_v26, %v705_v1  ;;  %7575 = vmatpush3.bf16.msra.mxu0 %v8687_v31  ;;  %v988_v63 = vadd.f32 %v972_v27, %v951_v57  ;;  %v1009_v31 = vmul.f32 %v9661_v40, %v9655_v36  ;;  %v973_v1 = vmul.f32 %v9657_v37, %v755_v62 }
 0x1dd   : > { %7576 = vmatprep.subr.bf16.mxu0 %v8688_v24 }
 0x1de   : > { %v907_v45 = vadd.f32 %v891_v28, %v806_v30  ;;  %v670_v46 = vpop.permute.xlu1 %669  ;;  %v1025_v26 = vadd.f32 %v1009_v31, %v988_v63 }
 0x1df   : > { %v707_v4 = vmul.f32 %v9651_v34, %v670_v46  ;;  %v953_v31 = vmul.f32 %v9663_v41, %v670_v46 }
 0x1e0   : > { %7577 = vmatpush3.bf16.msra.mxu0 %v8688_v24  ;;  %v952_v24 = vmul.f32 %v9663_v41, %v9710_v29  ;;  %v9871_v56 = vadd.f32 %v9678_v59, %v907_v45 }
 0x1e1   : > { %7578 = vmatprep.subr.bf16.mxu0 %v8689_v44 }
 0x1e3   : > { %v759_v58 = vpop.permute.xlu1 %758 }
 0x1e4   : > { %v792_v7 = vmul.f32 %v9653_v35, %v759_v58  ;;  %7579 = vmatpush3.bf16.msra.mxu0 %v8689_v44  ;;  %v807_v44 = vadd.f32 %v791_v2, %v706_v16  ;;  %v974_v29 = vmul.f32 %v9657_v37, %v759_v58 }
 0x1e5   : > { %7580 = vmatprep.subr.bf16.mxu0 %v8690_v50 }
 0x1e6   : > { %v808_v32 = vadd.f32 %v792_v7, %v707_v4  ;;  %v989_v4 = vadd.f32 %v973_v1, %v952_v24  ;;  %v9874_v7 = vadd.f32 %v9680_v61, %v1025_v26  ;;  %v1064_v1 = vmax.f32 %v9871_v56, 0.0 }
 0x1e8   : > { %v848_v28 = vpop.permute.xlu1 %847  ;;  %7581 = vmatpush3.bf16.msra.mxu0 %v8690_v50  ;;  %v1104_v24 = vmax.f32 %v9874_v7, 0.0 }
 0x1e9   : > { %v890_v30 = vmul.f32 %v9659_v39, %v848_v28  ;;  %v1008_v36 = vmul.f32 %v9661_v40, %v848_v28  ;;  %v954_v28 = vmul.f32 %v9663_v41, %v9719_v47 }
 0x1eb   : > { %v906_v27 = vadd.f32 %v890_v30, %v805_v18  ;;  %v1024_v57 = vadd.f32 %v1008_v36, %v987_v10  ;;  %v990_v10 = vadd.f32 %v974_v29, %v953_v31 }
 0x1ec   : > { %v856_v62 = vpop.permute.xlu1 %855 }
 0x1ed   : > { %v9878_v50 = vadd.f32 %v9678_v59, %v906_v27  ;;  %v9881_v63 = vadd.f32 %v9680_v61, %v1024_v57  ;;  %v892_v14 = vmul.f32 %v9659_v39, %v856_v62  ;;  %v1010_v18 = vmul.f32 %v9661_v40, %v856_v62 }
 0x1ef   : > { %11274 = vst [vmem:[#allocation32_spill] sm:$0xff] %v9878_v50  ;;  %v908_v45 = vadd.f32 %v892_v14, %v807_v44  ;;  %v1026_v16 = vadd.f32 %v1010_v18, %v989_v4  ;;  %v1103_v23 = vmax.f32 %v9881_v63, 0.0  ;;  %v1063_v2 = vmax.f32 %v9878_v50, 0.0 }
 0x1f0   : > { %v860_v58 = vpop.permute.xlu1 %859 }
 0x1f1   : > { %v893_v46 = vmul.f32 %v9659_v39, %v860_v58  ;;  %v1011_v30 = vmul.f32 %v9661_v40, %v860_v58  ;;  %v9897_v36 = vadd.f32 %v9678_v59, %v908_v45  ;;  %v9900_v44 = vadd.f32 %v9680_v61, %v1026_v16 }
 0x1f2   : > { %v1131_v27 = vpack.c.bf16 %v1104_v24, %v1103_v23  ;;  %v9902_v57 = vpack.c.bf16 %v1064_v1, %v1063_v2  ;;  %v767_v1 = vpop.permute.xlu0 %766 }
 0x1f3   : > { %11275 = vst [vmem:[#allocation33_spill] sm:$0xff] %v9897_v36  ;;  %v909_v4 = vadd.f32 %v893_v46, %v808_v32  ;;  %v1027_v62 = vadd.f32 %v1011_v30, %v990_v10  ;;  %v1105_v31 = vmax.f32 %v9900_v44, 0.0  ;;  %v1065_v45 = vmax.f32 %v9897_v36, 0.0 }
 0x1f4   : > { %7558 = vmatprep.mubr.bf16.mxu0 %v1131_v27  ;;  %v976_v21 = vmul.f32 %v9657_v37, %v767_v1 }
 0x1f5   : > { %v9905_v14 = vadd.f32 %v9678_v59, %v909_v4  ;;  %v9908_v29 = vadd.f32 %v9680_v61, %v1027_v62  ;;  %v680_v18 = vpop.permute.xlu1 %679 }
 0x1f6   : > { %v771_v30 = vpop.permute.xlu0 %770  ;;  %v709_v32 = vmul.f32 %v9651_v34, %v680_v18 }
 0x1f7   : > { %11276 = vst [vmem:[#allocation34_spill] sm:$0xff] %v9905_v14  ;;  %v1106_v16 = vmax.f32 %v9908_v29, 0.0  ;;  %v1066_v23 = vmax.f32 %v9905_v14, 0.0 }
 0x1f9   : > { %v1132_v58 = vpack.c.bf16 %v1106_v16, %v1105_v31  ;;  %v9918_v24 = vpack.c.bf16 %v1066_v23, %v1065_v45  ;;  %v708_v45 = vmul.f32 %v9651_v34, %v9719_v47  ;;  %v794_v16 = vmul.f32 %v9653_v35, %v767_v1 }
 0x1fa   : > { %v763_v10 = vpop.permute.xlu1 %762  ;;  %v864_v62 = vpop.permute.xlu0 %863 }
 0x1fb   : > { %7559 = vmatmul.mubr.bf16.gmra.mrb[8].mxu0 %v1132_v58  ;;  %v975_v27 = vmul.f32 %v9657_v37, %v763_v10  ;;  %v793_v0 = vmul.f32 %v9653_v35, %v763_v10  ;;  %v1012_v2 = vmul.f32 %v9661_v40, %v864_v62  ;;  %v955_v10 = vmul.f32 %v9663_v41, %v680_v18 }
 0x1fc   : > { %v894_v26 = vmul.f32 %v9659_v39, %v864_v62  ;;  %v810_v18 = vadd.f32 %v794_v16, %v709_v32 }
 0x1fd   : > { %v991_v52 = vadd.f32 %v975_v27, %v954_v28  ;;  %v809_v27 = vadd.f32 %v793_v0, %v708_v45  ;;  %v992_v50 = vadd.f32 %v976_v21, %v955_v10 }
 0x1fe   : > { %v876_v38 = vpop.permute.xlu0 %875 }
 0x1ff   : > { %v685_v46 = vpop.permute.xlu1 %684  ;;  %v1028_v8 = vadd.f32 %v1012_v2, %v991_v52  ;;  %v1015_v33 = vmul.f32 %v9661_v40, %v876_v38  ;;  %v897_v36 = vmul.f32 %v9659_v39, %v876_v38  ;;  %v795_v52 = vmul.f32 %v9653_v35, %v771_v30 }
 0x200   : > { %v956_v20 = vmul.f32 %v9663_v41, %v685_v46  ;;  %v977_v2 = vmul.f32 %v9657_v37, %v771_v30 }
 0x201   : > { %v9945_v45 = vadd.f32 %v9680_v61, %v1028_v8 }
 0x202   : > { %v993_v38 = vadd.f32 %v977_v2, %v956_v20 }
 0x203   : > { %v690_v4 = vpop.permute.xlu1 %689 }
 0x204   : > { %v957_v28 = vmul.f32 %v9663_v41, %v690_v4  ;;  %v711_v47 = vmul.f32 %v9651_v34, %v690_v4  ;;  %v910_v4 = vadd.f32 %v894_v26, %v809_v27 }
 0x206   : > { %v9956_v8 = vadd.f32 %v9678_v59, %v910_v4 }
 0x208   : > { %v775_v31 = vpop.permute.xlu1 %774 }
 0x209   : > { %v796_v23 = vmul.f32 %v9653_v35, %v775_v31  ;;  %v978_v58 = vmul.f32 %v9657_v37, %v775_v31  ;;  %v710_v31 = vmul.f32 %v9651_v34, %v685_v46 }
 0x20b   : > { %v994_v51 = vadd.f32 %v978_v58, %v957_v28  ;;  %v812_v1 = vadd.f32 %v796_v23, %v711_v47  ;;  %v811_v23 = vadd.f32 %v795_v52, %v710_v31 }
 0x20d   : > { %v868_v14 = vpop.permute.xlu1 %867  ;;  %v1031_v34 = vadd.f32 %v1015_v33, %v994_v51  ;;  %v913_v58 = vadd.f32 %v897_v36, %v812_v1  ;;  %v1107_v33 = vmax.f32 %v9945_v45, 0.0 }
 0x20e   : > { %v895_v0 = vmul.f32 %v9659_v39, %v868_v14  ;;  %v1013_v62 = vmul.f32 %v9661_v40, %v868_v14 }
 0x20f   : > { %v9960_v51 = vadd.f32 %v9680_v61, %v1031_v34 }
 0x210   : > { %v911_v41 = vadd.f32 %v895_v0, %v810_v18  ;;  %v1029_v46 = vadd.f32 %v1013_v62, %v992_v50 }
 0x211   : > { %v872_v32 = vpop.permute.xlu1 %871  ;;  %v1110_v27 = vmax.f32 %v9960_v51, 0.0 }
 0x212   : > { %v9948_v21 = vadd.f32 %v9678_v59, %v911_v41  ;;  %v9951_v14 = vadd.f32 %v9680_v61, %v1029_v46  ;;  %v896_v35 = vmul.f32 %v9659_v39, %v872_v32  ;;  %v1014_v37 = vmul.f32 %v9661_v40, %v872_v32 }
 0x213   : > { %v9968_v40 = vadd.f32 %v9678_v59, %v913_v58 }
 0x214   : > { %v912_v20 = vadd.f32 %v896_v35, %v811_v23  ;;  %v1030_v50 = vadd.f32 %v1014_v37, %v993_v38  ;;  %v1108_v26 = vmax.f32 %v9951_v14, 0.0  ;;  %v1686_v36 = vpack.c.bf16 %v9951_v14, %v9945_v45 }
 0x215   : > { %v1662_v39 = vpack.c.bf16 %v9948_v21, %v9956_v8 }
 0x216   : > { %v9971_v30 = vadd.f32 %v9678_v59, %v912_v20  ;;  %v9974_v16 = vadd.f32 %v9680_v61, %v1030_v50  ;;  %v1133_v10 = vpack.c.bf16 %v1108_v26, %v1107_v33  ;;  %v1068_v59 = vmax.f32 %v9948_v21, 0.0  ;;  %v8721_v21 = vld [vmem:[#allocation10 + $0x70] sm:$0xff]  }
 0x217   : > { %v1067_v61 = vmax.f32 %v9956_v8, 0.0  ;;  %v8722_v8 = vld [vmem:[#allocation10 + $0x78] sm:$0xff]  }
 0x218   : > { %7562 = vmatprep.mubr.bf16.mxu0 %v1133_v10  ;;  %v1109_v28 = vmax.f32 %v9974_v16, 0.0  ;;  %v1687_v47 = vpack.c.bf16 %v9960_v51, %v9974_v16  ;;  %v1663_v31 = vpack.c.bf16 %v9968_v40, %v9971_v30  ;;  %v1069_v0 = vmax.f32 %v9971_v30, 0.0  ;;  %v8700_v10 = vld [vmem:[#allocation14 + $0x8] sm:$0xff]   ;;  %v10072_v51 = vld [vmem:[%s11216_s5 + $0x40] sm:$0xff]  }
 0x219   : > { %v1093_v18 = vpack.c.bf16 %v1068_v59, %v1067_v61 }
 0x21a   : > { %v1134_v1 = vpack.c.bf16 %v1110_v27, %v1109_v28 }
 0x21c   : > { %7563 = vmatmul.mubr.bf16.gmra.mrb[12].mxu0 %v1134_v1 }
 0x21d   : > { %7582 = vmatprep.mubr.bf16.mxu0 %v9707_v25  ;;  %v1070_v25 = vmax.f32 %v9968_v40, 0.0 }
 0x21f   : > { %v1094_v62 = vpack.c.bf16 %v1070_v25, %v1069_v0  ;;  %v8701_v25 = vld [vmem:[#allocation14 + $0x10] sm:$0xff]  }
 0x224   : > { %7583 = vmatmul.mubr.bf16.vlgmr.msra.gmra.mrb[0].mxu0 %v9771_v3  ;;  %v8697_v3 = vld [vmem:[#allocation11 + $0x30] sm:$0xff]  }
 0x225   : > { %7586 = vmatprep.mubr.bf16.mxu0 %v9822_v60  ;;  %7610 = vmatprep.subr.bf16.mxu1 %v8697_v3  ;;  %v8698_v60 = vld [vmem:[#allocation11 + $0x38] sm:$0xff]  }
 0x226   : > { %7611 = vmatpush3.bf16.msra.mxu1 %v8697_v3 }
 0x227   : > { %7612 = vmatprep.subr.bf16.mxu1 %v8698_v60 }
 0x22a   : > { %7613 = vmatpush3.bf16.msra.mxu1 %v8698_v60 }
 0x22c   : > { %7587 = vmatmul.mubr.bf16.gmra.mrb[4].mxu0 %v9832_v15  ;;  %v8699_v15 = vld [vmem:[#allocation14] sm:$0xff]  }
 0x22d   : > { %7590 = vmatprep.mubr.bf16.mxu0 %v9902_v57  ;;  %7630 = vmatprep.subr.bf16.mxu1 %v8699_v15  ;;  %v9995_v57 = vld [vmem:[%s11218_s7] ss:$0 sm:$0xff] }
 0x234   : > { %7591 = vmatmul.mubr.bf16.gmra.mrb[8].mxu0 %v9918_v24 }
 0x235   : > { %7594 = vmatprep.mubr.bf16.mxu0 %v1093_v18 }
 0x23c   : > { %7595 = vmatmul.mubr.bf16.gmra.mrb[12].mxu0 %v1094_v62 }
 0x2f7   : > { %v7584_v24 = vpop.f32.mrb[0].mxu0 }
 0x2f8   : > { %v1434_v52 = vadd.f32 %v7584_v24, %v9995_v57  ;;  %v1362_v2 = vpop.f32.mrb[1].mxu0 }
 0x2f9   : > { %v1432_v4 = vadd.f32 %v9995_v57, %v1362_v2  ;;  %v7585_v34 = vpop.f32.mrb[2].mxu0 }
 0x2fa   : > { %v1435_v41 = vadd.f32 %v7585_v34, %v9995_v57  ;;  %v1365_v46 = vpop.f32.mrb[3].mxu0  ;;  %v1450_v38 = vmax.f32 %v1434_v52, 0.0  ;;  %v8702_v34 = vld [vmem:[#allocation14 + $0x18] sm:$0xff]  }
 0x2fb   : > { %v1433_v23 = vadd.f32 %v9995_v57, %v1365_v46  ;;  %v1448_v32 = vmax.f32 %v1432_v4, 0.0 }
 0x2fc   : > { %v1451_v58 = vmax.f32 %v1435_v41, 0.0 }
 0x2fd   : > { %v1449_v35 = vmax.f32 %v1433_v23, 0.0 }
 0x2fe   : > { %v1481_v37 = vpack.c.bf16 %v1451_v58, %v1450_v38 }
 0x2ff   : > { %v7588_v33 = vpop.f32.mrb[4].mxu0  ;;  %v1480_v20 = vpack.c.bf16 %v1449_v35, %v1448_v32  ;;  %v8703_v35 = vld [vmem:[#allocation14 + $0x20] sm:$0xff]  }
 0x300   : > { %v1438_v50 = vadd.f32 %v7588_v33, %v9995_v57  ;;  %v1378_v26 = vpop.f32.mrb[5].mxu0 }
 0x301   : > { %v1436_v28 = vadd.f32 %v9995_v57, %v1378_v26  ;;  %v7589_v27 = vpop.f32.mrb[6].mxu0  ;;  %7614 = vmatprep.mubr.bf16.mxu1 %v1480_v20 }
 0x302   : > { %v1439_v1 = vadd.f32 %v7589_v27, %v9995_v57  ;;  %v1381_v59 = vpop.f32.mrb[7].mxu0  ;;  %7615 = vmatmul.mubr.bf16.vlgmr.msra.gmra.mrb[0].mxu1 %v1481_v37  ;;  %v1454_v18 = vmax.f32 %v1438_v50, 0.0  ;;  %v8704_v27 = vld [vmem:[#allocation14 + $0x28] sm:$0xff]  }
 0x303   : > { %v1437_v61 = vadd.f32 %v9995_v57, %v1381_v59  ;;  %7631 = vmatpush3.bf16.msra.mxu1 %v8699_v15  ;;  %v1452_v62 = vmax.f32 %v1436_v28, 0.0 }
 0x304   : > { %v1455_v0 = vmax.f32 %v1439_v1, 0.0  ;;  %7632 = vmatprep.subr.bf16.mxu1 %v8700_v10 }
 0x305   : > { %v1453_v3 = vmax.f32 %v1437_v61, 0.0 }
 0x306   : > { %v1483_v60 = vpack.c.bf16 %v1455_v0, %v1454_v18 }
 0x307   : > { %v1482_v24 = vpack.c.bf16 %v1453_v3, %v1452_v62  ;;  %7633 = vmatpush3.bf16.msra.mxu1 %v8700_v10  ;;  %v7592_v52 = vpop.f32.mrb[8].mxu0  ;;  %v8705_v3 = vld [vmem:[#allocation14 + $0x30] sm:$0xff]  }
 0x308   : > { %v1442_v2 = vadd.f32 %v7592_v52, %v9995_v57  ;;  %v1394_v4 = vpop.f32.mrb[9].mxu0  ;;  %7634 = vmatprep.subr.bf16.mxu1 %v8701_v25 }
 0x309   : > { %v1440_v41 = vadd.f32 %v9995_v57, %v1394_v4  ;;  %v7593_v46 = vpop.f32.mrb[10].mxu0  ;;  %7618 = vmatprep.mubr.bf16.mxu1 %v1482_v24  ;;  %v8706_v4 = vld [vmem:[#allocation14 + $0x38] sm:$0xff]  }
 0x30a   : > { %v1443_v15 = vadd.f32 %v7593_v46, %v9995_v57  ;;  %v1397_v23 = vpop.f32.mrb[11].mxu0  ;;  %7619 = vmatmul.mubr.bf16.gmra.mrb[4].mxu1 %v1483_v60  ;;  %v1458_v58 = vmax.f32 %v1442_v2, 0.0  ;;  %v11278_v46 = vpack.c.bf16 %v9743_v5, %v9758_v42  ;;  %v8711_v5 = vld [vmem:[#allocation13 + $0x20] sm:$0xff]   ;;  %v8712_v42 = vld [vmem:[#allocation13 + $0x28] sm:$0xff]  }
 0x30b   : > { %v1441_v38 = vadd.f32 %v9995_v57, %v1397_v23  ;;  %7635 = vmatpush3.bf16.msra.mxu1 %v8701_v25  ;;  %v1456_v37 = vmax.f32 %v1440_v41, 0.0  ;;  %v8708_v41 = vld [vmem:[#allocation13 + $0x8] sm:$0xff]   ;;  %v8709_v23 = vld [vmem:[#allocation13 + $0x10] sm:$0xff]  }
 0x30c   : > { %v1459_v32 = vmax.f32 %v1443_v15, 0.0  ;;  %7636 = vmatprep.subr.bf16.mxu1 %v8702_v34  ;;  %v11279_v15 = vpack.c.bf16 %v9791_v49, %v9776_v12  ;;  %v11282_v12 = vpack.c.bf16 %v9908_v29, %v9900_v44  ;;  %v8713_v49 = vld [vmem:[#allocation13 + $0x30] sm:$0xff]   ;;  %v11286_v44 = vpack.c.bf16 %v9797_v48, %v9814_v53  ;;  %v8718_v48 = vld [vmem:[#allocation10 + $0x58] sm:$0xff]   ;;  %v8719_v53 = vld [vmem:[#allocation10 + $0x60] sm:$0xff]  }
 0x30d   : > { %v1457_v33 = vmax.f32 %v1441_v38, 0.0  ;;  %v11281_v38 = vpack.c.bf16 %v9874_v7, %v9881_v63  ;;  %v11284_v7 = vpack.c.bf16 %v9728_v55, %v9755_v22  ;;  %v11285_v63 = vpack.c.bf16 %v9788_v19, %v9785_v17  ;;  %v11287_v29 = vld [vmem:[#allocation32_spill] sm:$0xff]  ;;  %v8715_v55 = vld [vmem:[#allocation10 + $0x40] sm:$0xff]   ;;  %v8716_v17 = vld [vmem:[#allocation10 + $0x48] sm:$0xff]  }
 0x30e   : > { %v1485_v20 = vpack.c.bf16 %v1459_v32, %v1458_v58  ;;  %v11288_v45 = vpack.c.bf16 %v9871_v56, %v11287_v29  ;;  %v11242_v22 = vmov 0.0   ;;  %v8717_v19 = vld [vmem:[#allocation10 + $0x50] sm:$0xff]   ;;  %v8720_v56 = vld [vmem:[#allocation10 + $0x68] sm:$0xff]  }
 0x30f   : > { %v1484_v50 = vpack.c.bf16 %v1457_v33, %v1456_v37  ;;  %7637 = vmatpush3.bf16.msra.mxu1 %v8702_v34  ;;  %v7596_v26 = vpop.f32.mrb[12].mxu0  ;;  %v11277_v34 = vpack.c.bf16 %v9695_v13, %v9688_v9  ;;  %v8710_v9 = vld [vmem:[#allocation13 + $0x18] sm:$0xff]   ;;  %v11280_v13 = vpack.c.bf16 %v9804_v43, %v9817_v54  ;;  %v11283_v54 = vpack.c.bf16 %v9691_v11, %v9685_v6  ;;  %v11289_v6 = vld [vmem:[#allocation34_spill] sm:$0xff] }
 0x310   : > { %v1446_v10 = vadd.f32 %v7596_v26, %v9995_v57  ;;  %v1410_v28 = vpop.f32.mrb[13].mxu0  ;;  %7638 = vmatprep.subr.bf16.mxu1 %v8703_v35  ;;  %v8714_v43 = vld [vmem:[#allocation13 + $0x38] sm:$0xff]   ;;  %7694 = vmatprep.subr.bf16.mxu0 %v11242_v22 }
 0x311   : > { %v1444_v1 = vadd.f32 %v9995_v57, %v1410_v28  ;;  %v7597_v59 = vpop.f32.mrb[14].mxu0  ;;  %7622 = vmatprep.mubr.bf16.mxu1 %v1484_v50  ;;  %v11290_v11 = vld [vmem:[#allocation33_spill] sm:$0xff]  ;;  %7695 = vmatpush3.bf16.msra.mxu0 %v8715_v55 }
 0x312   : > { %v1447_v61 = vadd.f32 %v7597_v59, %v9995_v57  ;;  %v1413_v18 = vpop.f32.mrb[15].mxu0  ;;  %7623 = vmatmul.mubr.bf16.gmra.mrb[8].mxu1 %v1485_v20  ;;  %v1462_v25 = vmax.f32 %v1446_v10, 0.0  ;;  %v11291_v14 = vpack.c.bf16 %v11289_v6, %v11290_v11  ;;  %7696 = vmatprep.subr.bf16.mxu0 %v11242_v22 }
 0x313   : > { %v1445_v0 = vadd.f32 %v9995_v57, %v1413_v18  ;;  %7639 = vmatpush3.bf16.msra.mxu1 %v8703_v35  ;;  %v1460_v60 = vmax.f32 %v1444_v1, 0.0  ;;  %v8707_v57 = vld [vmem:[#allocation13] sm:$0xff]   ;;  %7710 = vmatprep.mubr.msk.bf16.mxu0 %vm9234_vm0, %v11242_v22 }
 0x314   : > { %v1463_v62 = vmax.f32 %v1447_v61, 0.0  ;;  %7640 = vmatprep.subr.bf16.mxu1 %v8704_v27 }
 0x315   : > { %v1461_v24 = vmax.f32 %v1445_v0, 0.0  ;;  %7697 = vmatpush3.bf16.msra.mxu0 %v8716_v17 }
 0x316   : > { %v1487_v52 = vpack.c.bf16 %v1463_v62, %v1462_v25  ;;  %7698 = vmatprep.subr.bf16.mxu0 %v11242_v22 }
 0x317   : > { %v1486_v2 = vpack.c.bf16 %v1461_v24, %v1460_v60  ;;  %7641 = vmatpush3.bf16.msra.mxu1 %v8704_v27 }
 0x318   : > { %7642 = vmatprep.subr.bf16.mxu1 %v8705_v3 }
 0x319   : > { %7626 = vmatprep.mubr.bf16.mxu1 %v1486_v2  ;;  %7699 = vmatpush3.bf16.msra.mxu0 %v8717_v19 }
 0x31a   : > { %7627 = vmatmul.mubr.bf16.gmra.mrb[12].mxu1 %v1487_v52  ;;  %7700 = vmatprep.subr.bf16.mxu0 %v11242_v22 }
 0x31b   : > { %7643 = vmatpush3.bf16.msra.mxu1 %v8705_v3  ;;  %7646 = vmatprep.mubr.bf16.mxu1 %v11277_v34 }
 0x31c   : > { %7644 = vmatprep.subr.bf16.mxu1 %v8706_v4 }
 0x31d   : > { %7701 = vmatpush3.bf16.msra.mxu0 %v8718_v48 }
 0x31e   : > { %7702 = vmatprep.subr.bf16.mxu0 %v11242_v22 }
 0x31f   : > { %7645 = vmatpush3.bf16.msra.mxu1 %v8706_v4 }
 0x320   : > { %7662 = vmatprep.subr.bf16.mxu1 %v8707_v57 }
 0x321   : > { %7703 = vmatpush3.bf16.msra.mxu0 %v8719_v53 }
 0x322   : > { %7647 = vmatmul.mubr.bf16.vlgmr.msra.gmra.mrb[0].mxu1 %v11278_v46  ;;  %7704 = vmatprep.subr.bf16.mxu0 %v11242_v22 }
 0x323   : > { %7663 = vmatpush3.bf16.msra.mxu1 %v8707_v57  ;;  %7650 = vmatprep.mubr.bf16.mxu1 %v11279_v15 }
 0x324   : > { %7664 = vmatprep.subr.bf16.mxu1 %v8708_v41 }
 0x325   : > { %7705 = vmatpush3.bf16.msra.mxu0 %v8720_v56 }
 0x326   : > { %7706 = vmatprep.subr.bf16.mxu0 %v11242_v22 }
 0x327   : > { %7665 = vmatpush3.bf16.msra.mxu1 %v8708_v41 }
 0x328   : > { %7666 = vmatprep.subr.bf16.mxu1 %v8709_v23 }
 0x329   : > { %7707 = vmatpush3.bf16.msra.mxu0 %v8721_v21 }
 0x32a   : > { %7651 = vmatmul.mubr.bf16.gmra.mrb[4].mxu1 %v11280_v13  ;;  %7708 = vmatprep.subr.bf16.mxu0 %v11242_v22 }
 0x32b   : > { %7667 = vmatpush3.bf16.msra.mxu1 %v8709_v23  ;;  %7654 = vmatprep.mubr.bf16.mxu1 %v11281_v38 }
 0x32c   : > { %7668 = vmatprep.subr.bf16.mxu1 %v8710_v9 }
 0x32d   : > { %7709 = vmatpush3.bf16.msra.mxu0 %v8722_v8 }
 0x32e   : > { %7714 = vmatprep.subr.bf16.mxu0 %v10072_v51 }
 0x32f   : > { %7669 = vmatpush3.bf16.msra.mxu1 %v8710_v9 }
 0x330   : > { %7670 = vmatprep.subr.bf16.mxu1 %v8711_v5 }
 0x332   : > { %7655 = vmatmul.mubr.bf16.gmra.mrb[8].mxu1 %v11282_v12 }
 0x333   : > { %7671 = vmatpush3.bf16.msra.mxu1 %v8711_v5  ;;  %7658 = vmatprep.mubr.bf16.mxu1 %v1686_v36  ;;  %v10080_v36 = vld [vmem:[%s11220_s9] ss:$0 sm:$0xff] }
 0x334   : > { %7672 = vmatprep.subr.bf16.mxu1 %v8712_v42 }
 0x337   : > { %7673 = vmatpush3.bf16.msra.mxu1 %v8712_v42 }
 0x338   : > { %7674 = vmatprep.subr.bf16.mxu1 %v8713_v49 }
 0x33a   : > { %7659 = vmatmul.mubr.bf16.gmra.mrb[12].mxu1 %v1687_v47 }
 0x33b   : > { %7675 = vmatpush3.bf16.msra.mxu1 %v8713_v49  ;;  %7678 = vmatprep.mubr.bf16.mxu1 %v11283_v54 }
 0x33c   : > { %7676 = vmatprep.subr.bf16.mxu1 %v8714_v43 }
 0x33f   : > { %7677 = vmatpush3.bf16.msra.mxu1 %v8714_v43 }
 0x342   : > { %7679 = vmatmul.mubr.bf16.vlgmr.msra.gmra.mrb[0].mxu1 %v11284_v7 }
 0x343   : > { %7682 = vmatprep.mubr.bf16.mxu1 %v11285_v63 }
 0x34a   : > { %7683 = vmatmul.mubr.bf16.gmra.mrb[4].mxu1 %v11286_v44 }
 0x34b   : > { %7686 = vmatprep.mubr.bf16.mxu1 %v11288_v45 }
 0x352   : > { %7687 = vmatmul.mubr.bf16.gmra.mrb[8].mxu1 %v11291_v14 }
 0x353   : > { %7690 = vmatprep.mubr.bf16.mxu1 %v1662_v39 }
 0x35a   : > { %7691 = vmatmul.mubr.bf16.gmra.mrb[12].mxu1 %v1663_v31 }
 0x415   : > { %v7680_v39 = vpop.f32.mrb[0].mxu1 }
 0x416   : > { %v10083_v40 = vadd.f32 %v7680_v39, %v10080_v36  ;;  %v1915_v30 = vpop.f32.mrb[1].mxu1 }
 0x417   : > { %v10086_v16 = vadd.f32 %v10080_v36, %v1915_v30  ;;  %v7681_v47 = vpop.f32.mrb[2].mxu1 }
 0x418   : > { %v10089_v31 = vadd.f32 %v7681_v47, %v10080_v36  ;;  %v1918_v58 = vpop.f32.mrb[3].mxu1  ;;  %v2060_v35 = vmax.f32 %v10083_v40, 0.0 }
 0x419   : > { %v10092_v32 = vadd.f32 %v10080_v36, %v1918_v58  ;;  %v2058_v50 = vmax.f32 %v10086_v16, 0.0 }
 0x41a   : > { %v2001_v37 = vadd.f32 %v10089_v31, %v10083_v40  ;;  %v2061_v33 = vmax.f32 %v10089_v31, 0.0  ;;  %v2723_v20 = vpack.c.bf16 %v10089_v31, %v10083_v40  ;;  %v8759_v40 = vld [vmem:[%s11216_s5 + $0xa0] sm:$0xff]   ;;  %v8760_v31 = vld [vmem:[%s11216_s5 + $0xa8] sm:$0xff]  }
 0x41b   : > { %v1994_v26 = vadd.f32 %v10092_v32, %v10086_v16  ;;  %v2059_v10 = vmax.f32 %v10092_v32, 0.0  ;;  %v2722_v28 = vpack.c.bf16 %v10092_v32, %v10086_v16  ;;  %v8757_v16 = vld [vmem:[%s11216_s5 + $0x90] sm:$0xff]   ;;  %v8758_v32 = vld [vmem:[%s11216_s5 + $0x98] sm:$0xff]  }
 0x41c   : > { %v2002_v27 = vrot.slane %v2001_v37, 4  ;;  %v10106_v1 = vpack.c.bf16 %v2061_v33, %v2060_v35 }
 0x41d   : > { %v1995_v59 = vrot.slane %v1994_v26, 4  ;;  %v7684_v61 = vpop.f32.mrb[4].mxu1  ;;  %v10108_v18 = vpack.c.bf16 %v2059_v10, %v2058_v50 }
 0x41e   : > { %v2003_v0 = vadd.f32 %v2002_v27, %v2001_v37  ;;  %v10111_v25 = vadd.f32 %v7684_v61, %v10080_v36  ;;  %v1931_v62 = vpop.f32.mrb[5].mxu1 }
 0x41f   : > { %v1996_v3 = vadd.f32 %v1995_v59, %v1994_v26  ;;  %v10114_v60 = vadd.f32 %v10080_v36, %v1931_v62  ;;  %v7685_v24 = vpop.f32.mrb[6].mxu1 }
 0x420   : > { %v2004_v52 = vrot.slane %v2003_v0, 2  ;;  %v10117_v2 = vadd.f32 %v7685_v24, %v10080_v36  ;;  %v1934_v4 = vpop.f32.mrb[7].mxu1  ;;  %v2064_v57 = vmax.f32 %v10111_v25, 0.0 }
 0x421   : > { %v1997_v34 = vrot.slane %v1996_v3, 2  ;;  %v2062_v41 = vmax.f32 %v10114_v60, 0.0  ;;  %v10122_v46 = vadd.f32 %v10080_v36, %v1934_v4 }
 0x422   : > { %v2005_v15 = vadd.f32 %v2004_v52, %v2003_v0  ;;  %v2015_v23 = vadd.f32 %v10117_v2, %v10111_v25  ;;  %v2065_v9 = vmax.f32 %v10117_v2, 0.0  ;;  %v2725_v13 = vpack.c.bf16 %v10117_v2, %v10111_v25  ;;  %v8764_v25 = vld [vmem:[#allocation10 + $0x80] sm:$0xff]   ;;  %v8768_v2 = vld [vmem:[#allocation10 + $0x90] sm:$0xff]  }
 0x423   : > { %v1998_v38 = vadd.f32 %v1997_v34, %v1996_v3  ;;  %v2008_v5 = vadd.f32 %v10122_v46, %v10114_v60  ;;  %v2063_v42 = vmax.f32 %v10122_v46, 0.0  ;;  %v2724_v12 = vpack.c.bf16 %v10122_v46, %v10114_v60  ;;  %v8766_v60 = vld [vmem:[#allocation10 + $0x88] sm:$0xff]   ;;  %v8770_v46 = vld [vmem:[#allocation10 + $0x98] sm:$0xff]  }
 0x424   : > { %v2006_v49 = vrot.slane %v2005_v15, 1  ;;  %v2016_v43 = vrot.slane %v2015_v23, 4  ;;  %v10134_v54 = vpack.c.bf16 %v2065_v9, %v2064_v57 }
 0x425   : > { %v1999_v7 = vrot.slane %v1998_v38, 1  ;;  %v2009_v63 = vrot.slane %v2008_v5, 4  ;;  %v7688_v44 = vpop.f32.mrb[8].mxu1  ;;  %v10136_v29 = vpack.c.bf16 %v2063_v42, %v2062_v41 }
 0x426   : > { %v2007_v45 = vadd.f32 %v2006_v49, %v2005_v15  ;;  %v2017_v6 = vadd.f32 %v2016_v43, %v2015_v23  ;;  %v10139_v11 = vadd.f32 %v7688_v44, %v10080_v36  ;;  %v1947_v14 = vpop.f32.mrb[9].mxu1 }
 0x427   : > { %v2000_v55 = vadd.f32 %v1999_v7, %v1998_v38  ;;  %v2010_v17 = vadd.f32 %v2009_v63, %v2008_v5  ;;  %v10142_v19 = vadd.f32 %v10080_v36, %v1947_v14  ;;  %v7689_v48 = vpop.f32.mrb[10].mxu1 }
 0x428   : > { %v2051_v53 = vmul.f32 0.0625, %v2007_v45  ;;  %v2018_v56 = vrot.slane %v2017_v6, 2  ;;  %v2068_v21 = vmax.f32 %v10139_v11, 0.0  ;;  %v10146_v8 = vadd.f32 %v7689_v48, %v10080_v36  ;;  %v1950_v39 = vpop.f32.mrb[11].mxu1 }
 0x429   : > { %v2050_v30 = vmul.f32 0.0625, %v2000_v55  ;;  %v2011_v47 = vrot.slane %v2010_v17, 2  ;;  %v2066_v58 = vmax.f32 %v10142_v19, 0.0  ;;  %v10150_v35 = vadd.f32 %v10080_v36, %v1950_v39 }
 0x42a   : > { %v2100_v37 = vmax.f32 %v2051_v53, 0.0  ;;  %v2748_v33 = vpack.c.bf16 %v2051_v53, %v2051_v53  ;;  %v2019_v50 = vadd.f32 %v2018_v56, %v2017_v6  ;;  %v2029_v26 = vadd.f32 %v10146_v8, %v10139_v11 }
 0x42b   : > { %v2099_v10 = vmax.f32 %v2050_v30, 0.0  ;;  %v2747_v27 = vpack.c.bf16 %v2050_v30, %v2050_v30  ;;  %v2012_v59 = vadd.f32 %v2011_v47, %v2010_v17  ;;  %v2069_v61 = vmax.f32 %v10146_v8, 0.0 }
 0x42c   : > { %v2125_v0 = vpack.c.bf16 %v2100_v37, %v2100_v37  ;;  %v2764_v62 = vunpack.c.l.b16 %v2748_v33  ;;  %v2020_v3 = vrot.slane %v2019_v50, 1  ;;  %v2030_v24 = vrot.slane %v2029_v26, 4 }
 0x42d   : > { %v2124_v52 = vpack.c.bf16 %v2099_v10, %v2099_v10  ;;  %v2763_v4 = vunpack.c.l.b16 %v2747_v27  ;;  %v2013_v34 = vrot.slane %v2012_v59, 1  ;;  %v2022_v57 = vadd.f32 %v10150_v35, %v10142_v19  ;;  %v7692_v41 = vpop.f32.mrb[12].mxu1 }
 0x42e   : > { %v2141_v15 = vunpack.c.l.b16 %v2125_v0  ;;  %v2021_v23 = vadd.f32 %v2020_v3, %v2019_v50  ;;  %v2031_v9 = vadd.f32 %v2030_v24, %v2029_v26  ;;  %v2067_v38 = vmax.f32 %v10150_v35, 0.0  ;;  %v1963_v5 = vpop.f32.mrb[13].mxu1 }
 0x42f   : > { %v2140_v42 = vunpack.c.l.b16 %v2124_v52  ;;  %v2771_v49 = vsel %vm2148_vm1, %v2764_v62, %v2763_v4  ;;  %v2014_v43 = vadd.f32 %v2013_v34, %v2012_v59  ;;  %v2023_v7 = vrot.slane %v2022_v57, 4  ;;  %v7693_v63 = vpop.f32.mrb[14].mxu1 }
 0x430   : > { %v2053_v44 = vmul.f32 0.0625, %v2021_v23  ;;  %v2032_v45 = vrot.slane %v2031_v9, 2  ;;  %v10160_v6 = vadd.f32 %v7692_v41, %v10080_v36  ;;  %v10163_v14 = vadd.f32 %v10080_v36, %v1963_v5  ;;  %v1966_v55 = vpop.f32.mrb[15].mxu1 }
 0x431   : > { %v2149_v17 = vsel %vm2148_vm1, %v2141_v15, %v2140_v42  ;;  %v2052_v48 = vmul.f32 0.0625, %v2014_v43  ;;  %v2024_v53 = vadd.f32 %v2023_v7, %v2022_v57  ;;  %v10167_v56 = vadd.f32 %v7693_v63, %v10080_v36 }
 0x432   : > { %v2102_v39 = vmax.f32 %v2053_v44, 0.0  ;;  %v2750_v30 = vpack.c.bf16 %v2053_v44, %v2053_v44  ;;  %v2033_v47 = vadd.f32 %v2032_v45, %v2031_v9  ;;  %v2072_v37 = vmax.f32 %v10160_v6, 0.0 }
 0x433   : > { %v2101_v33 = vmax.f32 %v2052_v48, 0.0  ;;  %v2749_v50 = vpack.c.bf16 %v2052_v48, %v2052_v48  ;;  %v2025_v26 = vrot.slane %v2024_v53, 2  ;;  %v2070_v10 = vmax.f32 %v10163_v14, 0.0 }
 0x434   : > { %v2127_v27 = vpack.c.bf16 %v2102_v39, %v2102_v39  ;;  %v2766_v59 = vunpack.c.l.b16 %v2750_v30  ;;  %v2034_v0 = vrot.slane %v2033_v47, 1  ;;  %v2043_v62 = vadd.f32 %v10167_v56, %v10160_v6 }
 0x435   : > { %v2126_v3 = vpack.c.bf16 %v2101_v33, %v2101_v33  ;;  %v2765_v24 = vunpack.c.l.b16 %v2749_v50  ;;  %v2026_v52 = vadd.f32 %v2025_v26, %v2024_v53  ;;  %v2073_v4 = vmax.f32 %v10167_v56, 0.0 }
 0x436   : > { %v2143_v34 = vunpack.c.l.b16 %v2127_v27  ;;  %v2035_v57 = vadd.f32 %v2034_v0, %v2033_v47  ;;  %v2044_v41 = vrot.slane %v2043_v62, 4  ;;  %v10175_v15 = vadd.f32 %v10080_v36, %v1966_v55 }
 0x437   : > { %v2142_v23 = vunpack.c.l.b16 %v2126_v3  ;;  %v2772_v9 = vsel %vm2150_vm2, %v2765_v24, %v2771_v49  ;;  %v2027_v5 = vrot.slane %v2026_v52, 1  ;;  %v10180_v42 = vpack.c.bf16 %v2067_v38, %v2066_v58 }
 0x438   : > { %v2055_v43 = vmul.f32 0.0625, %v2035_v57  ;;  %v2773_v7 = vsel %vm2152_vm3, %v2766_v59, %v2772_v9  ;;  %v2045_v63 = vadd.f32 %v2044_v41, %v2043_v62  ;;  %v2036_v44 = vadd.f32 %v10175_v15, %v10163_v14 }
 0x439   : > { %v2151_v45 = vsel %vm2150_vm2, %v2142_v23, %v2149_v17  ;;  %v2028_v48 = vadd.f32 %v2027_v5, %v2026_v52  ;;  %v2071_v36 = vmax.f32 %v10175_v15, 0.0  ;;  %v10189_v49 = vpack.c.bf16 %v2069_v61, %v2068_v21 }
 0x43a   : > { %v2104_v55 = vmax.f32 %v2055_v43, 0.0  ;;  %v2046_v53 = vrot.slane %v2045_v63, 2  ;;  %v2037_v58 = vrot.slane %v2036_v44, 4  ;;  %v2153_v39 = vsel %vm2152_vm3, %v2143_v34, %v2151_v45 }
 0x43b   : > { %v2054_v38 = vmul.f32 0.0625, %v2028_v48  ;;  %v10192_v30 = vpack.c.bf16 %v2071_v36, %v2070_v10  ;;  %v10194_v47 = vpack.c.bf16 %v2073_v4, %v2072_v37  ;;  %v2752_v33 = vpack.c.bf16 %v2055_v43, %v2055_v43 }
 0x43c   : > { %v2047_v17 = vadd.f32 %v2046_v53, %v2045_v63  ;;  %v2038_v50 = vadd.f32 %v2037_v58, %v2036_v44  ;;  %v2726_v21 = vpack.c.bf16 %v10150_v35, %v10142_v19  ;;  %v2727_v61 = vpack.c.bf16 %v10146_v8, %v10139_v11  ;;  %v8776_v11 = vld [vmem:[#allocation10 + $0xb0] sm:$0xff]   ;;  %v8778_v19 = vld [vmem:[#allocation10 + $0xb8] sm:$0xff]  }
 0x43d   : > { %v2103_v26 = vmax.f32 %v2054_v38, 0.0  ;;  %v2751_v27 = vpack.c.bf16 %v2054_v38, %v2054_v38  ;;  %v2129_v59 = vpack.c.bf16 %v2104_v55, %v2104_v55  ;;  %v2728_v10 = vpack.c.bf16 %v10175_v15, %v10163_v14 }
 0x43e   : > { %v2048_v0 = vrot.slane %v2047_v17, 1  ;;  %v2039_v62 = vrot.slane %v2038_v50, 2  ;;  %v2729_v24 = vpack.c.bf16 %v10167_v56, %v10160_v6  ;;  %v2768_v52 = vunpack.c.l.b16 %v2752_v33 }
 0x43f   : > { %v2128_v37 = vpack.c.bf16 %v2103_v26, %v2103_v26  ;;  %v2767_v3 = vunpack.c.l.b16 %v2751_v27  ;;  %v2145_v23 = vunpack.c.l.b16 %v2129_v59 }
 0x440   : > { %v2049_v4 = vadd.f32 %v2048_v0, %v2047_v17  ;;  %v2040_v34 = vadd.f32 %v2039_v62, %v2038_v50 }
 0x441   : > { %v2144_v57 = vunpack.c.l.b16 %v2128_v37  ;;  %v2774_v41 = vsel %vm2154_vm4, %v2767_v3, %v2773_v7  ;;  %v8724_v37 = vld [vmem:[%s11216_s5 + $0x48] sm:$0xff]   ;;  %v8725_v3 = vld [vmem:[%s11216_s5 + $0x50] sm:$0xff]  }
 0x442   : > { %v2057_v9 = vmul.f32 0.0625, %v2049_v4  ;;  %v2041_v5 = vrot.slane %v2040_v34, 1  ;;  %v2775_v43 = vsel %vm2156_vm5, %v2768_v52, %v2774_v41  ;;  %v8726_v52 = vld [vmem:[%s11216_s5 + $0x58] sm:$0xff]   ;;  %v8727_v4 = vld [vmem:[%s11216_s5 + $0x60] sm:$0xff]  }
 0x443   : > { %v2155_v63 = vsel %vm2154_vm4, %v2144_v57, %v2153_v39  ;;  %v8731_v57 = vld [vmem:[#allocation14 + $0x40] sm:$0xff]   ;;  %v8732_v41 = vld [vmem:[#allocation14 + $0x48] sm:$0xff]  }
 0x444   : > { %v2042_v44 = vadd.f32 %v2041_v5, %v2040_v34  ;;  %v2157_v45 = vsel %vm2156_vm5, %v2145_v23, %v2155_v63  ;;  %v2106_v48 = vmax.f32 %v2057_v9, 0.0  ;;  %v2754_v55 = vpack.c.bf16 %v2057_v9, %v2057_v9  ;;  %v8730_v34 = vld [vmem:[%s11216_s5 + $0x78] sm:$0xff]   ;;  %v8734_v9 = vld [vmem:[#allocation14 + $0x58] sm:$0xff]   ;;  %v8743_v63 = vld [vmem:[#allocation11 + $0x60] sm:$0xff]  }
 0x445   : > { %v8733_v23 = vld [vmem:[#allocation14 + $0x50] sm:$0xff]   ;;  %v8740_v5 = vld [vmem:[#allocation11 + $0x48] sm:$0xff]  }
 0x446   : > { %v2056_v36 = vmul.f32 0.0625, %v2042_v44  ;;  %v2131_v38 = vpack.c.bf16 %v2106_v48, %v2106_v48  ;;  %v2770_v7 = vunpack.c.l.b16 %v2754_v55  ;;  %v8744_v44 = vld [vmem:[#allocation11 + $0x68] sm:$0xff]   ;;  %v8746_v48 = vld [vmem:[#allocation11 + $0x78] sm:$0xff]  }
 0x448   : > { %v2105_v53 = vmax.f32 %v2056_v36, 0.0  ;;  %v2753_v58 = vpack.c.bf16 %v2056_v36, %v2056_v36  ;;  %v2147_v27 = vunpack.c.l.b16 %v2131_v38  ;;  %v8747_v36 = vld [vmem:[#allocation13 + $0x40] sm:$0xff]  }
 0x44a   : > { %v2130_v33 = vpack.c.bf16 %v2105_v53, %v2105_v53  ;;  %v2769_v17 = vunpack.c.l.b16 %v2753_v58 }
 0x44c   : > { %v2146_v50 = vunpack.c.l.b16 %v2130_v33  ;;  %v2776_v26 = vsel %vm2158_vm6, %v2769_v17, %v2775_v43  ;;  %v8742_v43 = vld [vmem:[#allocation11 + $0x58] sm:$0xff]   ;;  %v9235_v33 = vmov 1966171168  }
 0x44d   : > { %v2777_v39 = vsel %vm2160_vm7, %v2770_v7, %v2776_v26  ;;  %v2255_v17 = vunpack.c.l.s4 %v9235_v33  ;;  %v2257_v7 = vlaneseq }
 0x44e   : > { %v2159_v59 = vsel %vm2158_vm6, %v2146_v50, %v2157_v45  ;;  %v8745_v45 = vld [vmem:[#allocation11 + $0x70] sm:$0xff]  }
 0x44f   : > { %v2161_v0 = vsel %vm2160_vm7, %v2147_v27, %v2159_v59  ;;  %v2256_v50 = vunpack.c.0.s8 %v2255_v17  ;;  %v2258_v26 = vshrl.u32 %v2257_v7, 7 }
 0x450   : > { %v2162_v62 = vpack.c.b16 %v2161_v0, %v2161_v0 }
 0x451   : > { %v10255_v27 = vsub.s32 %v2256_v50, %v2258_v26 }
 0x452   : > { %7711 = vmatmul.mubr.bf16.vlgmr.msra.gmra.mrb[16].mxu0 %v2162_v62 }
 0x453   : > { %7715 = vmatpush3.bf16.msra.mxu0 %v10072_v51  ;;  %7730 = vmatprep.mubr.bf16.mxu0 %v10108_v18  ;;  %v8728_v51 = vld [vmem:[%s11216_s5 + $0x68] sm:$0xff]   ;;  %v8729_v18 = vld [vmem:[%s11216_s5 + $0x70] sm:$0xff]  }
 0x454   : > { %7716 = vmatprep.subr.bf16.mxu0 %v8724_v37 }
 0x457   : > { %7717 = vmatpush3.bf16.msra.mxu0 %v8724_v37  ;;  %v10260_v37 = vsub.s32 0, %v2258_v26 }
 0x458   : > { %7718 = vmatprep.subr.bf16.mxu0 %v8725_v3 }
 0x45b   : > { %7719 = vmatpush3.bf16.msra.mxu0 %v8725_v3 }
 0x45c   : > { %7720 = vmatprep.subr.bf16.mxu0 %v8726_v52 }
 0x45f   : > { %7721 = vmatpush3.bf16.msra.mxu0 %v8726_v52 }
 0x460   : > { %7722 = vmatprep.subr.bf16.mxu0 %v8727_v4 }
 0x463   : > { %7723 = vmatpush3.bf16.msra.mxu0 %v8727_v4 }
 0x464   : > { %7724 = vmatprep.subr.bf16.mxu0 %v8728_v51 }
 0x467   : > { %7725 = vmatpush3.bf16.msra.mxu0 %v8728_v51  ;;  %v10266_v51 = vld [vmem:[%s11218_s7 + $0x1] ss:$0 sm:$0xff] }
 0x468   : > { %7726 = vmatprep.subr.bf16.mxu0 %v8729_v18 }
 0x46b   : > { %7727 = vmatpush3.bf16.msra.mxu0 %v8729_v18 }
 0x46c   : > { %7728 = vmatprep.subr.bf16.mxu0 %v8730_v34 }
 0x46f   : > { %7729 = vmatpush3.bf16.msra.mxu0 %v8730_v34 }
 0x470   : > { %7778 = vmatprep.subr.bf16.mxu0 %v11242_v22 }
 0x472   : > { %7731 = vmatmul.mubr.bf16.vlgmr.msra.gmra.mrb[20].mxu0 %v10106_v1  ;;  %v8735_v1 = vld [vmem:[#allocation14 + $0x60] sm:$0xff]  }
 0x473   : > { %7734 = vmatprep.mubr.bf16.mxu0 %v10136_v29  ;;  %7779 = vmatpush3.bf16.msra.mxu0 %v8731_v57  ;;  %v8736_v29 = vld [vmem:[#allocation14 + $0x68] sm:$0xff]  }
 0x474   : > { %7780 = vmatprep.subr.bf16.mxu0 %v11242_v22 }
 0x477   : > { %7781 = vmatpush3.bf16.msra.mxu0 %v8732_v41 }
 0x478   : > { %7782 = vmatprep.subr.bf16.mxu0 %v11242_v22 }
 0x47a   : > { %7735 = vmatmul.mubr.bf16.gmra.mrb[24].mxu0 %v10134_v54  ;;  %v8737_v54 = vld [vmem:[#allocation14 + $0x70] sm:$0xff]  }
 0x47b   : > { %7738 = vmatprep.mubr.bf16.mxu0 %v10180_v42  ;;  %7783 = vmatpush3.bf16.msra.mxu0 %v8733_v23  ;;  %v8738_v42 = vld [vmem:[#allocation14 + $0x78] sm:$0xff]  }
 0x47c   : > { %7784 = vmatprep.subr.bf16.mxu0 %v11242_v22 }
 0x47f   : > { %7785 = vmatpush3.bf16.msra.mxu0 %v8734_v9 }
 0x480   : > { %7786 = vmatprep.subr.bf16.mxu0 %v11242_v22 }
 0x482   : > { %7739 = vmatmul.mubr.bf16.gmra.mrb[28].mxu0 %v10189_v49  ;;  %v2778_v49 = vpack.c.b16 %v2777_v39, %v2777_v39 }
 0x483   : > { %7742 = vmatprep.mubr.bf16.mxu0 %v10192_v30  ;;  %7787 = vmatpush3.bf16.msra.mxu0 %v8735_v1  ;;  %v8739_v30 = vld [vmem:[#allocation11 + $0x40] sm:$0xff]  }
 0x484   : > { %7788 = vmatprep.subr.bf16.mxu0 %v11242_v22  ;;  %7746 = vmatprep.subr.bf16.mxu1 %v8739_v30 }
 0x485   : > { %7747 = vmatpush3.bf16.msra.mxu1 %v8739_v30 }
 0x486   : > { %7748 = vmatprep.subr.bf16.mxu1 %v8740_v5 }
 0x487   : > { %7789 = vmatpush3.bf16.msra.mxu0 %v8736_v29 }
 0x488   : > { %7790 = vmatprep.subr.bf16.mxu0 %v11242_v22 }
 0x489   : > { %7749 = vmatpush3.bf16.msra.mxu1 %v8740_v5 }
 0x48a   : > { %7743 = vmatmul.mubr.bf16.gmra.mrb[32].mxu0 %v10194_v47  ;;  %v8741_v47 = vld [vmem:[#allocation11 + $0x50] sm:$0xff]  }
 0x48b   : > { %7791 = vmatpush3.bf16.msra.mxu0 %v8737_v54  ;;  %7794 = vmatprep.mubr.msk.bf16.mxu0 %vm9234_vm0, %v11242_v22 }
 0x48c   : > { %7792 = vmatprep.subr.bf16.mxu0 %v11242_v22  ;;  %7750 = vmatprep.subr.bf16.mxu1 %v8741_v47 }
 0x48d   : > { %7751 = vmatpush3.bf16.msra.mxu1 %v8741_v47 }
 0x48e   : > { %7752 = vmatprep.subr.bf16.mxu1 %v8742_v43 }
 0x48f   : > { %7793 = vmatpush3.bf16.msra.mxu0 %v8738_v42 }
 0x490   : > { %7830 = vmatprep.subr.bf16.mxu0 %v11242_v22 }
 0x491   : > { %7753 = vmatpush3.bf16.msra.mxu1 %v8742_v43 }
 0x492   : > { %7795 = vmatmul.mubr.bf16.vlgmr.msra.gmra.mrb[36].mxu0 %v2778_v49  ;;  %7754 = vmatprep.subr.bf16.mxu1 %v8743_v63 }
 0x493   : > { %7846 = vmatprep.mubr.msk.bf16.mxu0 %vm9234_vm0, %v11242_v22  ;;  %7831 = vmatpush3.bf16.msra.mxu0 %v8764_v25 }
 0x494   : > { %7832 = vmatprep.subr.bf16.mxu0 %v11242_v22 }
 0x495   : > { %7755 = vmatpush3.bf16.msra.mxu1 %v8743_v63 }
 0x496   : > { %7756 = vmatprep.subr.bf16.mxu1 %v8744_v44 }
 0x497   : > { %7833 = vmatpush3.bf16.msra.mxu0 %v8766_v60 }
 0x498   : > { %7834 = vmatprep.subr.bf16.mxu0 %v11242_v22 }
 0x499   : > { %7757 = vmatpush3.bf16.msra.mxu1 %v8744_v44 }
 0x49a   : > { %7758 = vmatprep.subr.bf16.mxu1 %v8745_v45 }
 0x49b   : > { %7835 = vmatpush3.bf16.msra.mxu0 %v8768_v2 }
 0x49c   : > { %7836 = vmatprep.subr.bf16.mxu0 %v11242_v22 }
 0x49d   : > { %7759 = vmatpush3.bf16.msra.mxu1 %v8745_v45 }
 0x49e   : > { %7760 = vmatprep.subr.bf16.mxu1 %v8746_v48 }
 0x49f   : > { %7837 = vmatpush3.bf16.msra.mxu0 %v8770_v46 }
 0x4a0   : > { %7838 = vmatprep.subr.bf16.mxu0 %v11242_v22 }
 0x4a1   : > { %7761 = vmatpush3.bf16.msra.mxu1 %v8746_v48 }
 0x4a2   : > { %7798 = vmatprep.subr.bf16.mxu1 %v8747_v36 }
 0x525   : > { %v2246_v55 = vpop.f32.mrb[16].mxu0 }
 0x526   : > { %v7712_v53 = vpop.f32.mrb[17].mxu0  ;;  %v2260_v39 = vrot.slane %v2246_v55, %v10255_v27  ;;  %v2253_v3 = vcombine.high %v2246_v55, %v2246_v55 }
 0x527   : > { %v2249_v58 = vpop.f32.mrb[18].mxu0 }
 0x528   : > { %v7713_v38 = vpop.f32.mrb[19].mxu0  ;;  %v2268_v59 = vcombine.high %v2260_v39, %v2260_v39  ;;  %v2276_v62 = vrot.slane %v2260_v39, %v10255_v27  ;;  %v2267_v9 = vrot.slane %v2253_v3, %v10255_v27 }
 0x52a   : > { %v2290_v0 = vrot.slane %v2268_v59, %v10255_v27  ;;  %v2305_v18 = vrot.slane %v2276_v62, %v10260_v37  ;;  %v2298_v5 = vcombine.high %v2276_v62, %v2276_v62  ;;  %v2269_v63 = vcombine.high %v2267_v9, %v2267_v9 }
 0x52c   : > { %v2309_v52 = vrot.slane %v2290_v0, %v10260_v37  ;;  %v2300_v42 = vcombine.high %v2290_v0, %v2290_v0  ;;  %v2313_v38 = vrot.slane %v2298_v5, %v10260_v37  ;;  %v2297_v3 = vrot.slane %v2269_v63, %v10255_v27 }
 0x52e   : > { %v2317_v48 = vrot.slane %v2300_v42, %v10260_v37 }
 0x545   : > { %v7732_v4 = vpop.f32.mrb[20].mxu0 }
 0x546   : > { %v2433_v34 = vadd.f32 %v7732_v4, %v2309_v52  ;;  %v2424_v57 = vpop.f32.mrb[21].mxu0 }
 0x547   : > { %v2425_v41 = vadd.f32 %v2424_v57, %v2305_v18  ;;  %v7733_v23 = vpop.f32.mrb[22].mxu0 }
 0x548   : > { %v2497_v1 = vadd.f32 %v10266_v51, %v2433_v34  ;;  %v2436_v29 = vadd.f32 %v7733_v23, %v2309_v52  ;;  %v2427_v54 = vpop.f32.mrb[23].mxu0  ;;  %v8748_v52 = vld [vmem:[#allocation13 + $0x48] sm:$0xff]   ;;  %v2283_v34 = vrot.slane %v2267_v9, %v10255_v27 }
 0x549   : > { %v2495_v49 = vadd.f32 %v10266_v51, %v2425_v41  ;;  %v2428_v30 = vadd.f32 %v2427_v54, %v2305_v18  ;;  %v8749_v54 = vld [vmem:[#allocation13 + $0x50] sm:$0xff]  }
 0x54a   : > { %v2498_v47 = vadd.f32 %v10266_v51, %v2436_v29  ;;  %v2513_v44 = vmax.f32 %v2497_v1, 0.0  ;;  %v2325_v29 = vrot.slane %v2297_v3, %v10260_v37  ;;  %v2321_v5 = vrot.slane %v2283_v34, %v10260_v37 }
 0x54b   : > { %v2496_v43 = vadd.f32 %v10266_v51, %v2428_v30  ;;  %v2511_v55 = vmax.f32 %v2495_v49, 0.0 }
 0x54c   : > { %v2514_v45 = vmax.f32 %v2498_v47, 0.0 }
 0x54d   : > { %v2512_v53 = vmax.f32 %v2496_v43, 0.0  ;;  %v7736_v58 = vpop.f32.mrb[24].mxu0 }
 0x54e   : > { %v2545_v33 = vpack.c.bf16 %v2514_v45, %v2513_v44  ;;  %v2449_v17 = vadd.f32 %v7736_v58, %v2317_v48  ;;  %v2440_v7 = vpop.f32.mrb[25].mxu0  ;;  %v8750_v58 = vld [vmem:[#allocation13 + $0x58] sm:$0xff]  }
 0x54f   : > { %v2441_v50 = vadd.f32 %v2440_v7, %v2313_v38  ;;  %v7737_v26 = vpop.f32.mrb[26].mxu0  ;;  %v2544_v39 = vpack.c.bf16 %v2512_v53, %v2511_v55  ;;  %v2301_v53 = vcombine.high %v2297_v3, %v2297_v3 }
 0x550   : > { %v2501_v59 = vadd.f32 %v10266_v51, %v2449_v17  ;;  %v2452_v0 = vadd.f32 %v7737_v26, %v2317_v48  ;;  %v2443_v62 = vpop.f32.mrb[27].mxu0  ;;  %v2299_v17 = vcombine.high %v2283_v34, %v2283_v34 }
 0x551   : > { %v2499_v4 = vadd.f32 %v10266_v51, %v2441_v50  ;;  %v2444_v18 = vadd.f32 %v2443_v62, %v2313_v38  ;;  %7762 = vmatprep.mubr.bf16.mxu1 %v2544_v39 }
 0x552   : > { %v2502_v57 = vadd.f32 %v10266_v51, %v2452_v0  ;;  %7763 = vmatmul.mubr.bf16.vlgmr.msra.gmra.mrb[16].mxu1 %v2545_v33  ;;  %v2517_v23 = vmax.f32 %v2501_v59, 0.0  ;;  %v2333_v59 = vrot.slane %v2301_v53, %v10260_v37  ;;  %v8751_v0 = vld [vmem:[#allocation13 + $0x60] sm:$0xff]  }
 0x553   : > { %v2500_v41 = vadd.f32 %v10266_v51, %v2444_v18  ;;  %7799 = vmatpush3.bf16.msra.mxu1 %v8747_v36  ;;  %v2515_v42 = vmax.f32 %v2499_v4, 0.0  ;;  %v2329_v4 = vrot.slane %v2299_v17, %v10260_v37  ;;  %v8754_v17 = vld [vmem:[#allocation13 + $0x78] sm:$0xff]  }
 0x554   : > { %v2518_v1 = vmax.f32 %v2502_v57, 0.0  ;;  %7800 = vmatprep.subr.bf16.mxu1 %v8748_v52 }
 0x555   : > { %v2516_v49 = vmax.f32 %v2500_v41, 0.0  ;;  %v7740_v30 = vpop.f32.mrb[28].mxu0 }
 0x556   : > { %v2465_v47 = vadd.f32 %v7740_v30, %v2325_v29  ;;  %v2456_v43 = vpop.f32.mrb[29].mxu0  ;;  %v2547_v9 = vpack.c.bf16 %v2518_v1, %v2517_v23 }
 0x557   : > { %v2457_v63 = vadd.f32 %v2456_v43, %v2321_v5  ;;  %7801 = vmatpush3.bf16.msra.mxu1 %v8748_v52  ;;  %v7741_v44 = vpop.f32.mrb[30].mxu0  ;;  %v2546_v45 = vpack.c.bf16 %v2516_v49, %v2515_v42  ;;  %v8752_v49 = vld [vmem:[#allocation13 + $0x68] sm:$0xff]  }
 0x558   : > { %v2505_v36 = vadd.f32 %v10266_v51, %v2465_v47  ;;  %v2468_v48 = vadd.f32 %v7741_v44, %v2325_v29  ;;  %v2459_v55 = vpop.f32.mrb[31].mxu0  ;;  %7802 = vmatprep.subr.bf16.mxu1 %v8749_v54  ;;  %v8753_v44 = vld [vmem:[#allocation13 + $0x70] sm:$0xff]  }
 0x559   : > { %v2503_v38 = vadd.f32 %v10266_v51, %v2457_v63  ;;  %v2460_v33 = vadd.f32 %v2459_v55, %v2321_v5  ;;  %7766 = vmatprep.mubr.bf16.mxu1 %v2546_v45 }
 0x55a   : > { %v2506_v7 = vadd.f32 %v10266_v51, %v2468_v48  ;;  %7767 = vmatmul.mubr.bf16.gmra.mrb[20].mxu1 %v2547_v9  ;;  %v2521_v26 = vmax.f32 %v2505_v36, 0.0 }
 0x55b   : > { %v2504_v50 = vadd.f32 %v10266_v51, %v2460_v33  ;;  %7803 = vmatpush3.bf16.msra.mxu1 %v8749_v54  ;;  %v2519_v62 = vmax.f32 %v2503_v38, 0.0 }
 0x55c   : > { %v2522_v39 = vmax.f32 %v2506_v7, 0.0  ;;  %7804 = vmatprep.subr.bf16.mxu1 %v8750_v58  ;;  %v8756_v7 = vld [vmem:[%s11216_s5 + $0x88] sm:$0xff]  }
 0x55d   : > { %v2520_v3 = vmax.f32 %v2504_v50, 0.0  ;;  %v7744_v52 = vpop.f32.mrb[32].mxu0 }
 0x55e   : > { %v2481_v18 = vadd.f32 %v7744_v52, %v2333_v59  ;;  %v2472_v57 = vpop.f32.mrb[33].mxu0  ;;  %v2549_v34 = vpack.c.bf16 %v2522_v39, %v2521_v26 }
 0x55f   : > { %v2473_v41 = vadd.f32 %v2472_v57, %v2329_v4  ;;  %7805 = vmatpush3.bf16.msra.mxu1 %v8750_v58  ;;  %v7745_v23 = vpop.f32.mrb[34].mxu0  ;;  %v2548_v1 = vpack.c.bf16 %v2520_v3, %v2519_v62 }
 0x560   : > { %v2509_v29 = vadd.f32 %v10266_v51, %v2481_v18  ;;  %v2484_v54 = vadd.f32 %v7745_v23, %v2333_v59  ;;  %v2475_v42 = vpop.f32.mrb[35].mxu0  ;;  %7806 = vmatprep.subr.bf16.mxu1 %v8751_v0 }
 0x561   : > { %v2507_v30 = vadd.f32 %v10266_v51, %v2473_v41  ;;  %v2476_v5 = vadd.f32 %v2475_v42, %v2329_v4  ;;  %7770 = vmatprep.mubr.bf16.mxu1 %v2548_v1 }
 0x562   : > { %v2510_v47 = vadd.f32 %v10266_v51, %v2484_v54  ;;  %7771 = vmatmul.mubr.bf16.gmra.mrb[24].mxu1 %v2549_v34  ;;  %v2525_v9 = vmax.f32 %v2509_v29, 0.0 }
 0x563   : > { %v2508_v43 = vadd.f32 %v10266_v51, %v2476_v5  ;;  %7807 = vmatpush3.bf16.msra.mxu1 %v8751_v0  ;;  %v2523_v45 = vmax.f32 %v2507_v30, 0.0  ;;  %v8755_v51 = vld [vmem:[%s11216_s5 + $0x80] sm:$0xff]  }
 0x564   : > { %v2526_v63 = vmax.f32 %v2510_v47, 0.0  ;;  %7808 = vmatprep.subr.bf16.mxu1 %v8752_v49 }
 0x565   : > { %v2524_v36 = vmax.f32 %v2508_v43, 0.0  ;;  %v10294_v48 = vpop.f32.mrb[36].mxu0 }
 0x566   : > { %v7796_v55 = vpop.f32.mrb[37].mxu0  ;;  %v2551_v53 = vpack.c.bf16 %v2526_v63, %v2525_v9  ;;  %v2876_v8 = vrot.slane %v10294_v48, %v10255_v27  ;;  %v2869_v6 = vcombine.high %v10294_v48, %v10294_v48 }
 0x567   : > { %7809 = vmatpush3.bf16.msra.mxu1 %v8752_v49  ;;  %v2865_v58 = vpop.f32.mrb[38].mxu0  ;;  %v2550_v38 = vpack.c.bf16 %v2524_v36, %v2523_v45 }
 0x568   : > { %v7797_v33 = vpop.f32.mrb[39].mxu0  ;;  %7810 = vmatprep.subr.bf16.mxu1 %v8753_v44  ;;  %v2884_v35 = vcombine.high %v2876_v8, %v2876_v8  ;;  %v2892_v56 = vrot.slane %v2876_v8, %v10255_v27  ;;  %v2883_v15 = vrot.slane %v2869_v6, %v10255_v27  ;;  %v8765_v8 = vld [vmem:[#allocation14 + $0x88] sm:$0xff]  }
 0x569   : > { %7774 = vmatprep.mubr.bf16.mxu1 %v2550_v38  ;;  %v8763_v33 = vld [vmem:[#allocation14 + $0x80] sm:$0xff]  }
 0x56a   : > { %7775 = vmatmul.mubr.bf16.gmra.mrb[28].mxu1 %v2551_v53  ;;  %v2906_v14 = vrot.slane %v2884_v35, %v10255_v27  ;;  %v10368_v39 = vrot.slane %v2883_v15, %v10255_v27  ;;  %v2914_v59 = vcombine.high %v2892_v56, %v2892_v56 }
 0x56b   : > { %7811 = vmatpush3.bf16.msra.mxu1 %v8753_v44  ;;  %7814 = vmatprep.mubr.bf16.mxu1 %v2722_v28  ;;  %v8762_v28 = vld [vmem:[%s11216_s5 + $0xb8] sm:$0xff]  }
 0x56c   : > { %7812 = vmatprep.subr.bf16.mxu1 %v8754_v17  ;;  %v2916_v26 = vcombine.high %v2906_v14, %v2906_v14  ;;  %v2929_v29 = vrot.slane %v2914_v59, %v10260_v37  ;;  %v2915_v54 = vcombine.high %v10368_v39, %v10368_v39 }
 0x56e   : > { %v2933_v41 = vrot.slane %v2916_v26, %v10260_v37  ;;  %v2945_v46 = vrot.slane %v2915_v54, %v10260_v37 }
 0x56f   : > { %7813 = vmatpush3.bf16.msra.mxu1 %v8754_v17 }
 0x570   : > { %7850 = vmatprep.subr.bf16.mxu1 %v8755_v51 }
 0x572   : > { %7815 = vmatmul.mubr.bf16.vlgmr.msra.gmra.mrb[16].mxu1 %v2723_v20  ;;  %v8761_v20 = vld [vmem:[%s11216_s5 + $0xb0] sm:$0xff]  }
 0x573   : > { %7818 = vmatprep.mubr.bf16.mxu1 %v2724_v12  ;;  %7851 = vmatpush3.bf16.msra.mxu1 %v8755_v51  ;;  %v8774_v12 = vld [vmem:[#allocation10 + $0xa8] sm:$0xff]  }
 0x574   : > { %7852 = vmatprep.subr.bf16.mxu1 %v8756_v7 }
 0x577   : > { %7853 = vmatpush3.bf16.msra.mxu1 %v8756_v7 }
 0x578   : > { %7854 = vmatprep.subr.bf16.mxu1 %v8757_v16 }
 0x57a   : > { %7819 = vmatmul.mubr.bf16.gmra.mrb[20].mxu1 %v2725_v13  ;;  %v8772_v13 = vld [vmem:[#allocation10 + $0xa0] sm:$0xff]  }
 0x57b   : > { %7822 = vmatprep.mubr.bf16.mxu1 %v2726_v21  ;;  %7855 = vmatpush3.bf16.msra.mxu1 %v8757_v16  ;;  %v2925_v21 = vrot.slane %v2906_v14, %v10260_v37 }
 0x57c   : > { %7856 = vmatprep.subr.bf16.mxu1 %v8758_v32  ;;  %7839 = vmatpush3.bf16.msra.mxu0 %v8772_v13 }
 0x57d   : > { %7840 = vmatprep.subr.bf16.mxu0 %v11242_v22 }
 0x57f   : > { %7857 = vmatpush3.bf16.msra.mxu1 %v8758_v32 }
 0x580   : > { %7858 = vmatprep.subr.bf16.mxu1 %v8759_v40  ;;  %7841 = vmatpush3.bf16.msra.mxu0 %v8774_v12 }
 0x581   : > { %7842 = vmatprep.subr.bf16.mxu0 %v11242_v22 }
 0x582   : > { %7823 = vmatmul.mubr.bf16.gmra.mrb[24].mxu1 %v2727_v61  ;;  %v2921_v61 = vrot.slane %v2892_v56, %v10260_v37 }
 0x583   : > { %7826 = vmatprep.mubr.bf16.mxu1 %v2728_v10  ;;  %7859 = vmatpush3.bf16.msra.mxu1 %v8759_v40  ;;  %v10364_v10 = vld [vmem:[%s11220_s9 + $0x1] ss:$0 sm:$0xff] }
 0x584   : > { %7860 = vmatprep.subr.bf16.mxu1 %v8760_v31  ;;  %7843 = vmatpush3.bf16.msra.mxu0 %v8776_v11  ;;  %v8274_v50 = vadd.f32 %v10364_v10, %v2925_v21  ;;  %v8276_v62 = vadd.f32 %v10364_v10, %v2921_v61  ;;  %v8282_v36 = vadd.f32 %v10364_v10, %v2933_v41  ;;  %v8767_v41 = vld [vmem:[#allocation14 + $0x90] sm:$0xff]  }
 0x585   : > { %7844 = vmatprep.subr.bf16.mxu0 %v11242_v22  ;;  %v8284_v58 = vadd.f32 %v10364_v10, %v2929_v29 }
 0x587   : > { %7861 = vmatpush3.bf16.msra.mxu1 %v8760_v31 }
 0x588   : > { %7862 = vmatprep.subr.bf16.mxu1 %v8761_v20  ;;  %7845 = vmatpush3.bf16.msra.mxu0 %v8778_v19 }
 0x58a   : > { %7827 = vmatmul.mubr.bf16.gmra.mrb[28].mxu1 %v2729_v24  ;;  %v2885_v24 = vcombine.high %v2883_v15, %v2883_v15 }
 0x58b   : > { %7863 = vmatpush3.bf16.msra.mxu1 %v8761_v20  ;;  %v2937_v20 = vrot.slane %v10368_v39, %v10260_v37 }
 0x58c   : > { %7864 = vmatprep.subr.bf16.mxu1 %v8762_v28  ;;  %v2913_v23 = vrot.slane %v2885_v24, %v10255_v27 }
 0x58e   : > { %v2917_v48 = vcombine.high %v2913_v23, %v2913_v23  ;;  %v2941_v31 = vrot.slane %v2913_v23, %v10260_v37 }
 0x58f   : > { %7865 = vmatpush3.bf16.msra.mxu1 %v8762_v28 }
 0x590   : > { %7914 = vmatprep.subr.bf16.mxu1 %v11242_v22  ;;  %v2949_v2 = vrot.slane %v2917_v48, %v10260_v37  ;;  %v8290_v39 = vadd.f32 %v10364_v10, %v2941_v31 }
 0x645   : > { %v7816_v0 = vpop.f32.mrb[16].mxu1 }
 0x646   : > { %v10371_v3 = vadd.f32 %v8274_v50, %v7816_v0  ;;  %v3040_v52 = vpop.f32.mrb[17].mxu1 }
 0x647   : > { %v10373_v4 = vadd.f32 %v8276_v62, %v3040_v52  ;;  %v7817_v18 = vpop.f32.mrb[18].mxu1 }
 0x648   : > { %v10375_v57 = vadd.f32 %v8274_v50, %v7817_v18  ;;  %v3043_v34 = vpop.f32.mrb[19].mxu1  ;;  %v3185_v42 = vmax.f32 %v10371_v3, 0.0  ;;  %v8292_v18 = vadd.f32 %v10364_v10, %v2937_v20 }
 0x649   : > { %v10379_v1 = vadd.f32 %v8276_v62, %v3043_v34  ;;  %v3183_v47 = vmax.f32 %v10373_v4, 0.0 }
 0x64a   : > { %v3126_v49 = vadd.f32 %v10375_v57, %v10371_v3  ;;  %v3186_v30 = vmax.f32 %v10375_v57, 0.0  ;;  %v3841_v5 = vpack.c.bf16 %v10375_v57, %v10371_v3  ;;  %v8799_v3 = vld [vmem:[%s11216_s5 + $0xe0] sm:$0xff]   ;;  %v8800_v57 = vld [vmem:[%s11216_s5 + $0xe8] sm:$0xff]  }
 0x64b   : > { %v3119_v43 = vadd.f32 %v10379_v1, %v10373_v4  ;;  %v3184_v9 = vmax.f32 %v10379_v1, 0.0  ;;  %v3840_v63 = vpack.c.bf16 %v10379_v1, %v10373_v4  ;;  %v8797_v4 = vld [vmem:[%s11216_s5 + $0xd0] sm:$0xff]   ;;  %v8798_v1 = vld [vmem:[%s11216_s5 + $0xd8] sm:$0xff]  }
 0x64c   : > { %v3127_v44 = vrot.slane %v3126_v49, 4  ;;  %v3217_v45 = vpack.c.bf16 %v3186_v30, %v3185_v42 }
 0x64d   : > { %v3120_v55 = vrot.slane %v3119_v43, 4  ;;  %v7820_v53 = vpop.f32.mrb[20].mxu1  ;;  %v3216_v38 = vpack.c.bf16 %v3184_v9, %v3183_v47 }
 0x64e   : > { %v3128_v17 = vadd.f32 %v3127_v44, %v3126_v49  ;;  %v10398_v51 = vadd.f32 %v8282_v36, %v7820_v53  ;;  %v3056_v7 = vpop.f32.mrb[21].mxu1  ;;  %v10429_v49 = vadd.f32 %v10364_v10, %v2945_v46  ;;  %v8298_v44 = vadd.f32 %v10364_v10, %v2949_v2 }
 0x64f   : > { %v3121_v16 = vadd.f32 %v3120_v55, %v3119_v43  ;;  %v10400_v32 = vadd.f32 %v8284_v58, %v3056_v7  ;;  %v7821_v40 = vpop.f32.mrb[22].mxu1  ;;  %7866 = vmatprep.mubr.bf16.mxu1 %v3216_v38  ;;  %v8769_v7 = vld [vmem:[#allocation14 + $0x98] sm:$0xff]  }
 0x650   : > { %v3129_v28 = vrot.slane %v3128_v17, 2  ;;  %v10405_v25 = vadd.f32 %v8282_v36, %v7821_v40  ;;  %v3059_v60 = vpop.f32.mrb[23].mxu1  ;;  %7867 = vmatmul.mubr.bf16.vlgmr.msra.gmra.mrb[32].mxu1 %v3217_v45  ;;  %v3189_v12 = vmax.f32 %v10398_v51, 0.0 }
 0x651   : > { %v3122_v13 = vrot.slane %v3121_v16, 2  ;;  %v3187_v11 = vmax.f32 %v10400_v32, 0.0  ;;  %v10411_v19 = vadd.f32 %v8284_v58, %v3059_v60  ;;  %7915 = vmatpush3.bf16.msra.mxu1 %v8763_v33 }
 0x652   : > { %v3130_v35 = vadd.f32 %v3129_v28, %v3128_v17  ;;  %v3140_v6 = vadd.f32 %v10405_v25, %v10398_v51  ;;  %v3190_v14 = vmax.f32 %v10405_v25, 0.0  ;;  %7916 = vmatprep.subr.bf16.mxu1 %v11242_v22  ;;  %v3843_v56 = vpack.c.bf16 %v10405_v25, %v10398_v51  ;;  %v8802_v25 = vld [vmem:[%s11216_s5 + $0xf8] sm:$0xff]  }
 0x653   : > { %v3123_v15 = vadd.f32 %v3122_v13, %v3121_v16  ;;  %v3133_v21 = vadd.f32 %v10411_v19, %v10400_v32  ;;  %v3188_v61 = vmax.f32 %v10411_v19, 0.0  ;;  %v3842_v24 = vpack.c.bf16 %v10411_v19, %v10400_v32  ;;  %v8801_v32 = vld [vmem:[%s11216_s5 + $0xf0] sm:$0xff]  }
 0x654   : > { %v3131_v50 = vrot.slane %v3130_v35, 1  ;;  %v3141_v26 = vrot.slane %v3140_v6, 4  ;;  %v3219_v59 = vpack.c.bf16 %v3190_v14, %v3189_v12  ;;  %v11295_v19 = vmov 0.0  }
 0x655   : > { %v3124_v0 = vrot.slane %v3123_v15, 1  ;;  %v3134_v62 = vrot.slane %v3133_v21, 4  ;;  %v7824_v52 = vpop.f32.mrb[24].mxu1  ;;  %v3218_v34 = vpack.c.bf16 %v3188_v61, %v3187_v11  ;;  %7917 = vmatpush3.bf16.msra.mxu1 %v8765_v8 }
 0x656   : > { %v3132_v23 = vadd.f32 %v3131_v50, %v3130_v35  ;;  %v3142_v29 = vadd.f32 %v3141_v26, %v3140_v6  ;;  %v10426_v54 = vadd.f32 %v8290_v39, %v7824_v52  ;;  %v3072_v42 = vpop.f32.mrb[25].mxu1  ;;  %7918 = vmatprep.subr.bf16.mxu1 %v11242_v22 }
 0x657   : > { %v3125_v30 = vadd.f32 %v3124_v0, %v3123_v15  ;;  %v3135_v47 = vadd.f32 %v3134_v62, %v3133_v21  ;;  %v10432_v43 = vadd.f32 %v8292_v18, %v3072_v42  ;;  %v7825_v9 = vpop.f32.mrb[26].mxu1  ;;  %7870 = vmatprep.mubr.bf16.mxu1 %v3218_v34  ;;  %v8771_v21 = vld [vmem:[#allocation14 + $0xa0] sm:$0xff]  }
 0x658   : > { %v3176_v45 = vmul.f32 0.0625, %v3132_v23  ;;  %v3143_v36 = vrot.slane %v3142_v29, 2  ;;  %v3193_v48 = vmax.f32 %v10426_v54, 0.0  ;;  %v10436_v55 = vadd.f32 %v8290_v39, %v7825_v9  ;;  %v3075_v53 = vpop.f32.mrb[27].mxu1  ;;  %7871 = vmatmul.mubr.bf16.gmra.mrb[36].mxu1 %v3219_v59 }
 0x659   : > { %v3175_v58 = vmul.f32 0.0625, %v3125_v30  ;;  %v3136_v38 = vrot.slane %v3135_v47, 2  ;;  %v3191_v33 = vmax.f32 %v10432_v43, 0.0  ;;  %v10439_v17 = vadd.f32 %v8292_v18, %v3075_v53  ;;  %7919 = vmatpush3.bf16.msra.mxu1 %v8767_v41  ;;  %v8773_v53 = vld [vmem:[#allocation14 + $0xa8] sm:$0xff]  }
 0x65a   : > { %v3225_v16 = vmax.f32 %v3176_v45, 0.0  ;;  %v3866_v40 = vpack.c.bf16 %v3176_v45, %v3176_v45  ;;  %v3144_v31 = vadd.f32 %v3143_v36, %v3142_v29  ;;  %v3154_v10 = vadd.f32 %v10436_v55, %v10426_v54  ;;  %7920 = vmatprep.subr.bf16.mxu1 %v11242_v22 }
 0x65b   : > { %v3224_v20 = vmax.f32 %v3175_v58, 0.0  ;;  %v3865_v28 = vpack.c.bf16 %v3175_v58, %v3175_v58  ;;  %v3137_v60 = vadd.f32 %v3136_v38, %v3135_v47  ;;  %v3194_v2 = vmax.f32 %v10436_v55, 0.0 }
 0x65c   : > { %v3250_v46 = vpack.c.bf16 %v3225_v16, %v3225_v16  ;;  %v3882_v13 = vunpack.c.l.b16 %v3866_v40  ;;  %v3145_v12 = vrot.slane %v3144_v31, 1  ;;  %v3155_v11 = vrot.slane %v3154_v10, 4 }
 0x65d   : > { %v3249_v8 = vpack.c.bf16 %v3224_v20, %v3224_v20  ;;  %v3881_v35 = vunpack.c.l.b16 %v3865_v28  ;;  %v3138_v6 = vrot.slane %v3137_v60, 1  ;;  %v3147_v14 = vadd.f32 %v10439_v17, %v10432_v43  ;;  %v7828_v15 = vpop.f32.mrb[28].mxu1  ;;  %7921 = vmatpush3.bf16.msra.mxu1 %v8769_v7 }
 0x65e   : > { %v3266_v61 = vunpack.c.l.b16 %v3250_v46  ;;  %v3146_v50 = vadd.f32 %v3145_v12, %v3144_v31  ;;  %v3156_v26 = vadd.f32 %v3155_v11, %v3154_v10  ;;  %v3192_v39 = vmax.f32 %v10439_v17, 0.0  ;;  %v3088_v59 = vpop.f32.mrb[29].mxu1  ;;  %7922 = vmatprep.subr.bf16.mxu1 %v11242_v22 }
 0x65f   : > { %v3265_v0 = vunpack.c.l.b16 %v3249_v8  ;;  %v3889_v62 = vsel %vm2148_vm1, %v3882_v13, %v3881_v35  ;;  %v3139_v52 = vadd.f32 %v3138_v6, %v3137_v60  ;;  %v3148_v18 = vrot.slane %v3147_v14, 4  ;;  %v7829_v34 = vpop.f32.mrb[30].mxu1  ;;  %v8775_v35 = vld [vmem:[#allocation14 + $0xb0] sm:$0xff]  }
 0x660   : > { %v3178_v41 = vmul.f32 0.0625, %v3146_v50  ;;  %v3157_v23 = vrot.slane %v3156_v26, 2  ;;  %v10450_v29 = vadd.f32 %v8298_v44, %v7828_v15  ;;  %v10453_v42 = vadd.f32 %v10429_v49, %v3088_v59  ;;  %v3091_v30 = vpop.f32.mrb[31].mxu1 }
 0x661   : > { %v3273_v47 = vsel %vm2148_vm1, %v3266_v61, %v3265_v0  ;;  %v3177_v9 = vmul.f32 0.0625, %v3139_v52  ;;  %v3149_v45 = vadd.f32 %v3148_v18, %v3147_v14  ;;  %v10456_v36 = vadd.f32 %v8298_v44, %v7829_v34  ;;  %7923 = vmatpush3.bf16.msra.mxu1 %v8771_v21 }
 0x662   : > { %v3227_v58 = vmax.f32 %v3178_v41, 0.0  ;;  %v3868_v38 = vpack.c.bf16 %v3178_v41, %v3178_v41  ;;  %v3158_v7 = vadd.f32 %v3157_v23, %v3156_v26  ;;  %v3197_v16 = vmax.f32 %v10450_v29, 0.0  ;;  %7924 = vmatprep.subr.bf16.mxu1 %v11242_v22 }
 0x663   : > { %v3226_v40 = vmax.f32 %v3177_v9, 0.0  ;;  %v3867_v31 = vpack.c.bf16 %v3177_v9, %v3177_v9  ;;  %v3150_v10 = vrot.slane %v3149_v45, 2  ;;  %v3195_v20 = vmax.f32 %v10453_v42, 0.0 }
 0x664   : > { %v3252_v28 = vpack.c.bf16 %v3227_v58, %v3227_v58  ;;  %v3884_v60 = vunpack.c.l.b16 %v3868_v38  ;;  %v3159_v46 = vrot.slane %v3158_v7, 1  ;;  %v3168_v44 = vadd.f32 %v10456_v36, %v10450_v29 }
 0x665   : > { %v3251_v13 = vpack.c.bf16 %v3226_v40, %v3226_v40  ;;  %v3883_v12 = vunpack.c.l.b16 %v3867_v31  ;;  %v3151_v11 = vadd.f32 %v3150_v10, %v3149_v45  ;;  %v3198_v8 = vmax.f32 %v10456_v36, 0.0  ;;  %7925 = vmatpush3.bf16.msra.mxu1 %v8773_v53 }
 0x666   : > { %v3268_v6 = vunpack.c.l.b16 %v3252_v28  ;;  %v3160_v14 = vadd.f32 %v3159_v46, %v3158_v7  ;;  %v3169_v15 = vrot.slane %v3168_v44, 4  ;;  %v3220_v21 = vpack.c.bf16 %v3192_v39, %v3191_v33  ;;  %7926 = vmatprep.subr.bf16.mxu1 %v11242_v22 }
 0x667   : > { %v3267_v61 = vunpack.c.l.b16 %v3251_v13  ;;  %v3890_v50 = vsel %vm2150_vm2, %v3883_v12, %v3889_v62  ;;  %v3152_v26 = vrot.slane %v3151_v11, 1  ;;  %v10469_v59 = vadd.f32 %v10429_v49, %v3091_v30  ;;  %v8777_v49 = vld [vmem:[#allocation14 + $0xb8] sm:$0xff]  }
 0x668   : > { %v3180_v0 = vmul.f32 0.0625, %v3160_v14  ;;  %v3891_v52 = vsel %vm2152_vm3, %v3884_v60, %v3890_v50  ;;  %v3170_v18 = vadd.f32 %v3169_v15, %v3168_v44  ;;  %7874 = vmatprep.mubr.bf16.mxu1 %v3220_v21  ;;  %v3221_v34 = vpack.c.bf16 %v3194_v2, %v3193_v48 }
 0x669   : > { %v3153_v33 = vadd.f32 %v3152_v26, %v3151_v11  ;;  %v3161_v39 = vadd.f32 %v10469_v59, %v10453_v42  ;;  %v3196_v62 = vmax.f32 %v10469_v59, 0.0  ;;  %v3223_v41 = vpack.c.bf16 %v3198_v8, %v3197_v16  ;;  %7927 = vmatpush3.bf16.msra.mxu1 %v8775_v35 }
 0x66a   : > { %v3229_v23 = vmax.f32 %v3180_v0, 0.0  ;;  %v3171_v30 = vrot.slane %v3170_v18, 2  ;;  %7875 = vmatmul.mubr.bf16.gmra.mrb[40].mxu1 %v3221_v34  ;;  %7928 = vmatprep.subr.bf16.mxu1 %v11242_v22  ;;  %v3274_v9 = vsel %vm2150_vm2, %v3267_v61, %v3273_v47  ;;  %v3870_v2 = vpack.c.bf16 %v3180_v0, %v3180_v0 }
 0x66b   : > { %v3179_v45 = vmul.f32 0.0625, %v3153_v33  ;;  %v3162_v53 = vrot.slane %v3161_v39, 4  ;;  %v3222_v58 = vpack.c.bf16 %v3196_v62, %v3195_v20  ;;  %v3275_v48 = vsel %vm2152_vm3, %v3268_v6, %v3274_v9 }
 0x66c   : > { %v3172_v38 = vadd.f32 %v3171_v30, %v3170_v18  ;;  %v3844_v7 = vpack.c.bf16 %v10439_v17, %v10432_v43  ;;  %v3254_v28 = vpack.c.bf16 %v3229_v23, %v3229_v23  ;;  %v3886_v12 = vunpack.c.l.b16 %v3870_v2  ;;  %v8810_v43 = vld [vmem:[#allocation10 + $0xd8] sm:$0xff]   ;;  %v8814_v17 = vld [vmem:[#allocation10 + $0xe8] sm:$0xff]  }
 0x66d   : > { %v3228_v16 = vmax.f32 %v3179_v45, 0.0  ;;  %v3869_v40 = vpack.c.bf16 %v3179_v45, %v3179_v45  ;;  %v3163_v31 = vadd.f32 %v3162_v53, %v3161_v39  ;;  %7878 = vmatprep.mubr.bf16.mxu1 %v3222_v58  ;;  %7929 = vmatpush3.bf16.msra.mxu1 %v8777_v49  ;;  %v11294_v51 = vpack.c.bf16 %v10456_v36, %v10450_v29  ;;  %v8816_v29 = vld [vmem:[#allocation10 + $0xf0] sm:$0xff]  }
 0x66e   : > { %v3173_v47 = vrot.slane %v3172_v38, 1  ;;  %7966 = vmatprep.subr.bf16.mxu1 %v11242_v22  ;;  %v3270_v14 = vunpack.c.l.b16 %v3254_v28  ;;  %v8782_v28 = vld [vmem:[#allocation11 + $0x98] sm:$0xff]  }
 0x66f   : > { %v3253_v46 = vpack.c.bf16 %v3228_v16, %v3228_v16  ;;  %v3885_v44 = vunpack.c.l.b16 %v3869_v40  ;;  %v3164_v13 = vrot.slane %v3163_v31, 2  ;;  %v8779_v16 = vld [vmem:[#allocation11 + $0x80] sm:$0xff]   ;;  %v8780_v40 = vld [vmem:[#allocation11 + $0x88] sm:$0xff]  }
 0x670   : > { %v3174_v11 = vadd.f32 %v3173_v47, %v3172_v38  ;;  %7882 = vmatprep.subr.bf16.mxu0 %v8779_v16  ;;  %v8783_v47 = vld [vmem:[#allocation11 + $0xa0] sm:$0xff]  }
 0x671   : > { %v3269_v8 = vunpack.c.l.b16 %v3253_v46  ;;  %v3892_v35 = vsel %vm2154_vm4, %v3885_v44, %v3891_v52  ;;  %v3165_v6 = vadd.f32 %v3164_v13, %v3163_v31  ;;  %v8781_v31 = vld [vmem:[#allocation11 + $0x90] sm:$0xff]   ;;  %v8784_v46 = vld [vmem:[#allocation11 + $0xa8] sm:$0xff]   ;;  %v8786_v13 = vld [vmem:[#allocation11 + $0xb8] sm:$0xff]  }
 0x672   : > { %v3182_v15 = vmul.f32 0.0625, %v3174_v11  ;;  %7879 = vmatmul.mubr.bf16.gmra.mrb[44].mxu1 %v3223_v41  ;;  %v3893_v21 = vsel %vm2156_vm5, %v3886_v12, %v3892_v35  ;;  %v8785_v44 = vld [vmem:[#allocation11 + $0xb0] sm:$0xff]   ;;  %v10503_v12 = vld [vmem:[#allocation13 + $0x80] sm:$0xff]  }
 0x673   : > { %v3166_v61 = vrot.slane %v3165_v6, 1  ;;  %7930 = vmatprep.mubr.msk.bf16.mxu1 %vm9234_vm0, %v11242_v22  ;;  %v3276_v50 = vsel %vm2154_vm4, %v3269_v8, %v3275_v48 }
 0x674   : > { %v3277_v26 = vsel %vm2156_vm5, %v3270_v14, %v3276_v50  ;;  %v3231_v18 = vmax.f32 %v3182_v15, 0.0  ;;  %v3872_v33 = vpack.c.bf16 %v3182_v15, %v3182_v15 }
 0x675   : > { %v3167_v0 = vadd.f32 %v3166_v61, %v3165_v6 }
 0x676   : > { %v3256_v62 = vpack.c.bf16 %v3231_v18, %v3231_v18  ;;  %v3888_v41 = vunpack.c.l.b16 %v3872_v33 }
 0x677   : > { %v3181_v34 = vmul.f32 0.0625, %v3167_v0 }
 0x678   : > { %v3272_v53 = vunpack.c.l.b16 %v3256_v62 }
 0x679   : > { %v3230_v39 = vmax.f32 %v3181_v34, 0.0  ;;  %v3871_v52 = vpack.c.bf16 %v3181_v34, %v3181_v34 }
 0x67b   : > { %v3255_v49 = vpack.c.bf16 %v3230_v39, %v3230_v39  ;;  %v3887_v23 = vunpack.c.l.b16 %v3871_v52 }
 0x67d   : > { %v3894_v30 = vsel %vm2158_vm6, %v3887_v23, %v3893_v21  ;;  %v3271_v9 = vunpack.c.l.b16 %v3255_v49 }
 0x67e   : > { %v3895_v45 = vsel %vm2160_vm7, %v3888_v41, %v3894_v30 }
 0x67f   : > { %v3896_v58 = vpack.c.b16 %v3895_v45, %v3895_v45  ;;  %v3278_v48 = vsel %vm2158_vm6, %v3271_v9, %v3277_v26 }
 0x680   : > { %v3279_v2 = vsel %vm2160_vm7, %v3272_v53, %v3278_v48 }
 0x681   : > { %7931 = vmatmul.mubr.bf16.vlgmr.msra.gmra.mrb[48].mxu1 %v3896_v58  ;;  %v3280_v38 = vpack.c.b16 %v3279_v2, %v3279_v2 }
 0x682   : > { %7982 = vmatprep.mubr.msk.bf16.mxu1 %vm9234_vm0, %v11242_v22 }
 0x683   : > { %7847 = vmatmul.mubr.bf16.vlgmr.msra.gmra.mrb[40].mxu0 %v3280_v38 }
 0x684   : > { %7883 = vmatpush3.bf16.msra.mxu0 %v8779_v16 }
 0x685   : > { %7884 = vmatprep.subr.bf16.mxu0 %v8780_v40 }
 0x688   : > { %7885 = vmatpush3.bf16.msra.mxu0 %v8780_v40 }
 0x689   : > { %7886 = vmatprep.subr.bf16.mxu0 %v8781_v31 }
 0x68c   : > { %7887 = vmatpush3.bf16.msra.mxu0 %v8781_v31 }
 0x68d   : > { %7888 = vmatprep.subr.bf16.mxu0 %v8782_v28 }
 0x690   : > { %7889 = vmatpush3.bf16.msra.mxu0 %v8782_v28 }
 0x691   : > { %7890 = vmatprep.subr.bf16.mxu0 %v8783_v47 }
 0x694   : > { %7891 = vmatpush3.bf16.msra.mxu0 %v8783_v47 }
 0x695   : > { %7892 = vmatprep.subr.bf16.mxu0 %v8784_v46 }
 0x698   : > { %7893 = vmatpush3.bf16.msra.mxu0 %v8784_v46 }
 0x699   : > { %7894 = vmatprep.subr.bf16.mxu0 %v8785_v44 }
 0x69c   : > { %7895 = vmatpush3.bf16.msra.mxu0 %v8785_v44 }
 0x69d   : > { %7896 = vmatprep.subr.bf16.mxu0 %v8786_v13 }
 0x6a0   : > { %7897 = vmatpush3.bf16.msra.mxu0 %v8786_v13 }
 0x6a1   : > { %7934 = vmatprep.subr.bf16.mxu0 %v10503_v12 }
 0x723   : > { %v7868_v11 = vpop.f32.mrb[32].mxu1 }
 0x724   : > { %v3542_v8 = vpop.f32.mrb[33].mxu1 }
 0x725   : > { %v7869_v35 = vpop.f32.mrb[34].mxu1 }
 0x726   : > { %v3545_v6 = vpop.f32.mrb[35].mxu1 }
 0x72b   : > { %v7872_v14 = vpop.f32.mrb[36].mxu1 }
 0x72c   : > { %v3558_v15 = vpop.f32.mrb[37].mxu1 }
 0x72d   : > { %v7873_v21 = vpop.f32.mrb[38].mxu1 }
 0x72e   : > { %v3561_v61 = vpop.f32.mrb[39].mxu1 }
 0x73d   : > { %v10506_v50 = vpop.f32.mrb[40].mxu1 }
 0x73e   : > { %v3574_v26 = vpop.f32.mrb[41].mxu1 }
 0x73f   : > { %v10508_v0 = vpop.f32.mrb[42].mxu1 }
 0x740   : > { %v10510_v18 = vpop.f32.mrb[43].mxu1 }
 0x745   : > { %v10512_v34 = vpop.f32.mrb[44].mxu1 }
 0x746   : > { %v10514_v33 = vpop.f32.mrb[45].mxu1 }
 0x747   : > { %v10516_v39 = vpop.f32.mrb[46].mxu1 }
 0x748   : > { %v10518_v52 = vpop.f32.mrb[47].mxu1 }
 0x754   : > { %v10520_v62 = vpop.f32.mrb[48].mxu1 }
 0x755   : > { %v7932_v49 = vpop.f32.mrb[49].mxu1  ;;  %v3994_v36 = vrot.slane %v10520_v62, %v10255_v27 }
 0x756   : > { %v3364_v23 = vpop.f32.mrb[40].mxu0  ;;  %v3983_v41 = vpop.f32.mrb[50].mxu1 }
 0x757   : > { %v3371_v30 = vcombine.high %v3364_v23, %v3364_v23  ;;  %v7848_v9 = vpop.f32.mrb[41].mxu0  ;;  %v7933_v45 = vpop.f32.mrb[51].mxu1  ;;  %v3378_v53 = vrot.slane %v3364_v23, %v10255_v27  ;;  %v10533_v41 = vld [vmem:[%s11218_s7 + $0x2] ss:$0 sm:$0xff] }
 0x758   : > { %v3367_v58 = vpop.f32.mrb[42].mxu0 }
 0x759   : > { %v7849_v48 = vpop.f32.mrb[43].mxu0  ;;  %v3385_v2 = vrot.slane %v3371_v30, %v10255_v27  ;;  %v3386_v38 = vcombine.high %v3378_v53, %v3378_v53  ;;  %v3394_v16 = vrot.slane %v3378_v53, %v10255_v27 }
 0x75b   : > { %v3387_v40 = vcombine.high %v3385_v2, %v3385_v2  ;;  %v3401_v31 = vrot.slane %v3385_v2, %v10255_v27  ;;  %v3408_v28 = vrot.slane %v3386_v38, %v10255_v27  ;;  %v3416_v47 = vcombine.high %v3394_v16, %v3394_v16 }
 0x75c   : > { %v3423_v46 = vrot.slane %v3394_v16, %v10260_v37 }
 0x75d   : > { %v3415_v44 = vrot.slane %v3387_v40, %v10255_v27  ;;  %v3417_v13 = vcombine.high %v3401_v31, %v3401_v31  ;;  %v3418_v49 = vcombine.high %v3408_v28, %v3408_v28  ;;  %v3427_v23 = vrot.slane %v3408_v28, %v10260_v37 }
 0x75e   : > { %v3431_v30 = vrot.slane %v3416_v47, %v10260_v37  ;;  %v3439_v9 = vrot.slane %v3401_v31, %v10260_v37  ;;  %v3543_v45 = vadd.f32 %v3542_v8, %v3423_v46  ;;  %v3546_v53 = vadd.f32 %v3545_v6, %v3423_v46 }
 0x75f   : > { %v3419_v58 = vcombine.high %v3415_v44, %v3415_v44  ;;  %v3435_v48 = vrot.slane %v3418_v49, %v10260_v37  ;;  %v3443_v2 = vrot.slane %v3415_v44, %v10260_v37  ;;  %v3447_v38 = vrot.slane %v3417_v13, %v10260_v37 }
 0x760   : > { %v3551_v16 = vadd.f32 %v7868_v11, %v3427_v23  ;;  %v3554_v40 = vadd.f32 %v7869_v35, %v3427_v23  ;;  %v3613_v28 = vadd.f32 %v10533_v41, %v3543_v45  ;;  %v3614_v22 = vadd.f32 %v10533_v41, %v3546_v53  ;;  %v8788_v53 = vld [vmem:[#allocation13 + $0x88] sm:$0xff]  }
 0x761   : > { %v3559_v60 = vadd.f32 %v3558_v15, %v3431_v30  ;;  %v3562_v20 = vadd.f32 %v3561_v61, %v3431_v30  ;;  %v3567_v47 = vadd.f32 %v7872_v14, %v3435_v48  ;;  %v3570_v10 = vadd.f32 %v7873_v21, %v3435_v48 }
 0x762   : > { %v3629_v31 = vmax.f32 %v3613_v28, 0.0  ;;  %v3630_v8 = vmax.f32 %v3614_v22, 0.0  ;;  %v3615_v6 = vadd.f32 %v10533_v41, %v3551_v16  ;;  %v3616_v46 = vadd.f32 %v10533_v41, %v3554_v40 }
 0x763   : > { %v3617_v44 = vadd.f32 %v10533_v41, %v3559_v60  ;;  %v3618_v13 = vadd.f32 %v10533_v41, %v3562_v20  ;;  %v3619_v11 = vadd.f32 %v10533_v41, %v3567_v47  ;;  %v3620_v35 = vadd.f32 %v10533_v41, %v3570_v10 }
 0x764   : > { %v3662_v49 = vpack.c.bf16 %v3630_v8, %v3629_v31  ;;  %v3631_v23 = vmax.f32 %v3615_v6, 0.0  ;;  %v3632_v15 = vmax.f32 %v3616_v46, 0.0  ;;  %v3575_v61 = vadd.f32 %v3574_v26, %v3439_v9 }
 0x765   : > { %v3633_v14 = vmax.f32 %v3617_v44, 0.0  ;;  %v3634_v21 = vmax.f32 %v3618_v13, 0.0  ;;  %v3635_v30 = vmax.f32 %v3619_v11, 0.0  ;;  %v3636_v22 = vmax.f32 %v3620_v35, 0.0 }
 0x766   : > { %7898 = vmatprep.mubr.bf16.mxu0 %v3662_v49  ;;  %v3663_v45 = vpack.c.bf16 %v3632_v15, %v3631_v23  ;;  %v3578_v48 = vadd.f32 %v10510_v18, %v3439_v9  ;;  %v3621_v60 = vadd.f32 %v10533_v41, %v3575_v61  ;;  %v3583_v20 = vadd.f32 %v10506_v50, %v3443_v2  ;;  %v8790_v49 = vld [vmem:[#allocation13 + $0x98] sm:$0xff]  }
 0x767   : > { %v3664_v16 = vpack.c.bf16 %v3634_v21, %v3633_v14  ;;  %v3665_v40 = vpack.c.bf16 %v3636_v22, %v3635_v30  ;;  %v3586_v10 = vadd.f32 %v10508_v0, %v3443_v2  ;;  %v3591_v28 = vadd.f32 %v10514_v33, %v3447_v38  ;;  %v8789_v0 = vld [vmem:[#allocation13 + $0x90] sm:$0xff]   ;;  %v8796_v22 = vld [vmem:[%s11216_s5 + $0xc8] sm:$0xff]  }
 0x768   : > { %7899 = vmatmul.mubr.bf16.vlgmr.msra.gmra.mrb[44].mxu0 %v3663_v45  ;;  %v3622_v26 = vadd.f32 %v10533_v41, %v3578_v48  ;;  %v3637_v47 = vmax.f32 %v3621_v60, 0.0  ;;  %v3623_v31 = vadd.f32 %v10533_v41, %v3583_v20  ;;  %v3594_v8 = vadd.f32 %v10518_v52, %v3447_v38  ;;  %v8793_v21 = vld [vmem:[#allocation13 + $0xb0] sm:$0xff]  }
 0x769   : > { %7935 = vmatpush3.bf16.msra.mxu0 %v10503_v12  ;;  %7902 = vmatprep.mubr.bf16.mxu0 %v3664_v16  ;;  %v3624_v18 = vadd.f32 %v10533_v41, %v3586_v10  ;;  %v3625_v50 = vadd.f32 %v10533_v41, %v3591_v28  ;;  %v3451_v9 = vrot.slane %v3419_v58, %v10260_v37  ;;  %v8795_v30 = vld [vmem:[%s11216_s5 + $0xc0] sm:$0xff]  }
 0x76a   : > { %7936 = vmatprep.subr.bf16.mxu0 %v8788_v53  ;;  %v3638_v33 = vmax.f32 %v3622_v26, 0.0  ;;  %v3639_v2 = vmax.f32 %v3623_v31, 0.0  ;;  %v3626_v6 = vadd.f32 %v10533_v41, %v3594_v8 }
 0x76b   : > { %v3640_v46 = vmax.f32 %v3624_v18, 0.0  ;;  %v3641_v44 = vmax.f32 %v3625_v50, 0.0  ;;  %v3599_v13 = vadd.f32 %v10512_v34, %v3451_v9  ;;  %v3602_v52 = vadd.f32 %v10516_v39, %v3451_v9  ;;  %v8791_v34 = vld [vmem:[#allocation13 + $0xa0] sm:$0xff]   ;;  %v8792_v39 = vld [vmem:[#allocation13 + $0xa8] sm:$0xff]  }
 0x76c   : > { %v3666_v12 = vpack.c.bf16 %v3638_v33, %v3637_v47  ;;  %v3642_v38 = vmax.f32 %v3626_v6, 0.0 }
 0x76d   : > { %7937 = vmatpush3.bf16.msra.mxu0 %v8788_v53  ;;  %v3667_v11 = vpack.c.bf16 %v3640_v46, %v3639_v2  ;;  %v3627_v35 = vadd.f32 %v10533_v41, %v3599_v13  ;;  %v3628_v58 = vadd.f32 %v10533_v41, %v3602_v52  ;;  %v8794_v41 = vld [vmem:[#allocation13 + $0xb8] sm:$0xff]   ;;  %v4010_v53 = vrot.slane %v3994_v36, %v10255_v27 }
 0x76e   : > { %7938 = vmatprep.subr.bf16.mxu0 %v8789_v0  ;;  %v3668_v23 = vpack.c.bf16 %v3642_v38, %v3641_v44 }
 0x76f   : > { %v3643_v15 = vmax.f32 %v3627_v35, 0.0  ;;  %v3644_v61 = vmax.f32 %v3628_v58, 0.0  ;;  %v4039_v20 = vrot.slane %v4010_v53, %v10260_v37 }
 0x770   : > { %7903 = vmatmul.mubr.bf16.gmra.mrb[48].mxu0 %v3665_v40  ;;  %v10633_v40 = vld [vmem:[%s11220_s9 + $0x2] ss:$0 sm:$0xff] }
 0x771   : > { %7939 = vmatpush3.bf16.msra.mxu0 %v8789_v0  ;;  %7906 = vmatprep.mubr.bf16.mxu0 %v3666_v12  ;;  %v3669_v14 = vpack.c.bf16 %v3644_v61, %v3643_v15  ;;  %v8308_v47 = vadd.f32 %v10633_v40, %v4039_v20 }
 0x772   : > { %7940 = vmatprep.subr.bf16.mxu0 %v8790_v49 }
 0x775   : > { %7941 = vmatpush3.bf16.msra.mxu0 %v8790_v49 }
 0x776   : > { %7942 = vmatprep.subr.bf16.mxu0 %v8791_v34 }
 0x778   : > { %7907 = vmatmul.mubr.bf16.gmra.mrb[52].mxu0 %v3667_v11 }
 0x779   : > { %7943 = vmatpush3.bf16.msra.mxu0 %v8791_v34  ;;  %7910 = vmatprep.mubr.bf16.mxu0 %v3668_v23 }
 0x77a   : > { %7944 = vmatprep.subr.bf16.mxu0 %v8792_v39 }
 0x77d   : > { %7945 = vmatpush3.bf16.msra.mxu0 %v8792_v39 }
 0x77e   : > { %7946 = vmatprep.subr.bf16.mxu0 %v8793_v21 }
 0x780   : > { %7911 = vmatmul.mubr.bf16.gmra.mrb[56].mxu0 %v3669_v14 }
 0x781   : > { %7947 = vmatpush3.bf16.msra.mxu0 %v8793_v21  ;;  %7950 = vmatprep.mubr.bf16.mxu0 %v3840_v63  ;;  %v11293_v63 = vpack.c.bf16 %v10469_v59, %v10453_v42  ;;  %v8818_v42 = vld [vmem:[#allocation10 + $0xf8] sm:$0xff]   ;;  %v4002_v59 = vcombine.high %v3994_v36, %v3994_v36  ;;  %v8805_v36 = vld [vmem:[#allocation14 + $0xc8] sm:$0xff]  }
 0x782   : > { %7948 = vmatprep.subr.bf16.mxu0 %v8794_v41 }
 0x783   : > { %v4024_v45 = vrot.slane %v4002_v59, %v10255_v27 }
 0x785   : > { %7949 = vmatpush3.bf16.msra.mxu0 %v8794_v41  ;;  %v4043_v60 = vrot.slane %v4024_v45, %v10260_v37  ;;  %v4034_v16 = vcombine.high %v4024_v45, %v4024_v45 }
 0x786   : > { %7986 = vmatprep.subr.bf16.mxu0 %v8795_v30 }
 0x787   : > { %v8306_v28 = vadd.f32 %v10633_v40, %v4043_v60  ;;  %v4051_v31 = vrot.slane %v4034_v16, %v10260_v37 }
 0x788   : > { %7951 = vmatmul.mubr.bf16.vlgmr.msra.gmra.mrb[44].mxu0 %v3841_v5  ;;  %v11292_v5 = vpack.c.bf16 %v10436_v55, %v10426_v54  ;;  %v8808_v54 = vld [vmem:[#allocation10 + $0xd0] sm:$0xff]   ;;  %v8812_v55 = vld [vmem:[#allocation10 + $0xe0] sm:$0xff]  }
 0x789   : > { %7954 = vmatprep.mubr.bf16.mxu0 %v3842_v24  ;;  %7987 = vmatpush3.bf16.msra.mxu0 %v8795_v30  ;;  %v8806_v24 = vld [vmem:[#allocation10 + $0xc8] sm:$0xff]   ;;  %v8314_v44 = vadd.f32 %v10633_v40, %v4051_v31 }
 0x78a   : > { %7988 = vmatprep.subr.bf16.mxu0 %v8796_v22 }
 0x78d   : > { %7989 = vmatpush3.bf16.msra.mxu0 %v8796_v22  ;;  %v8803_v22 = vld [vmem:[#allocation14 + $0xc0] sm:$0xff]  }
 0x78e   : > { %7990 = vmatprep.subr.bf16.mxu0 %v8797_v4 }
 0x790   : > { %7955 = vmatmul.mubr.bf16.gmra.mrb[48].mxu0 %v3843_v56  ;;  %v8804_v56 = vld [vmem:[#allocation10 + $0xc0] sm:$0xff]  }
 0x791   : > { %7958 = vmatprep.mubr.bf16.mxu0 %v3844_v7  ;;  %7991 = vmatpush3.bf16.msra.mxu0 %v8797_v4  ;;  %v3987_v7 = vcombine.high %v10520_v62, %v10520_v62  ;;  %v4032_v62 = vcombine.high %v4010_v53, %v4010_v53 }
 0x792   : > { %7992 = vmatprep.subr.bf16.mxu0 %v8798_v1  ;;  %7967 = vmatpush3.bf16.msra.mxu1 %v8804_v56 }
 0x793   : > { %7968 = vmatprep.subr.bf16.mxu1 %v11295_v19  ;;  %v4001_v48 = vrot.slane %v3987_v7, %v10255_v27  ;;  %v4047_v13 = vrot.slane %v4032_v62, %v10260_v37 }
 0x795   : > { %7993 = vmatpush3.bf16.msra.mxu0 %v8798_v1  ;;  %v4003_v10 = vcombine.high %v4001_v48, %v4001_v48  ;;  %v4017_v0 = vrot.slane %v4001_v48, %v10255_v27  ;;  %v8316_v41 = vadd.f32 %v10633_v40, %v4047_v13 }
 0x796   : > { %7994 = vmatprep.subr.bf16.mxu0 %v8799_v3  ;;  %7969 = vmatpush3.bf16.msra.mxu1 %v8806_v24 }
 0x797   : > { %7970 = vmatprep.subr.bf16.mxu1 %v11295_v19  ;;  %v4031_v6 = vrot.slane %v4003_v10, %v10255_v27  ;;  %v4033_v34 = vcombine.high %v4017_v0, %v4017_v0 }
 0x798   : > { %7959 = vmatmul.mubr.bf16.gmra.mrb[52].mxu0 %v11292_v5 }
 0x799   : > { %7962 = vmatprep.mubr.bf16.mxu0 %v11293_v63  ;;  %7995 = vmatpush3.bf16.msra.mxu0 %v8799_v3  ;;  %v4035_v14 = vcombine.high %v4031_v6, %v4031_v6 }
 0x79a   : > { %7996 = vmatprep.subr.bf16.mxu0 %v8800_v57  ;;  %7971 = vmatpush3.bf16.msra.mxu1 %v8808_v54 }
 0x79b   : > { %7972 = vmatprep.subr.bf16.mxu1 %v11295_v19  ;;  %v4067_v54 = vrot.slane %v4035_v14, %v10260_v37 }
 0x79d   : > { %7997 = vmatpush3.bf16.msra.mxu0 %v8800_v57 }
 0x79e   : > { %7998 = vmatprep.subr.bf16.mxu0 %v8801_v32  ;;  %7973 = vmatpush3.bf16.msra.mxu1 %v8810_v43  ;;  %v4063_v43 = vrot.slane %v4033_v34, %v10260_v37 }
 0x79f   : > { %7974 = vmatprep.subr.bf16.mxu1 %v11295_v19 }
 0x7a0   : > { %7963 = vmatmul.mubr.bf16.gmra.mrb[56].mxu0 %v11294_v51  ;;  %v4059_v51 = vrot.slane %v4031_v6, %v10260_v37 }
 0x7a1   : > { %7999 = vmatpush3.bf16.msra.mxu0 %v8801_v32  ;;  %v4055_v32 = vrot.slane %v4017_v0, %v10260_v37 }
 0x7a2   : > { %8000 = vmatprep.subr.bf16.mxu0 %v8802_v25  ;;  %7975 = vmatpush3.bf16.msra.mxu1 %v8812_v55  ;;  %v8322_v62 = vadd.f32 %v10633_v40, %v4059_v51 }
 0x7a3   : > { %7976 = vmatprep.subr.bf16.mxu1 %v11295_v19 }
 0x7a5   : > { %8001 = vmatpush3.bf16.msra.mxu0 %v8802_v25 }
 0x7a6   : > { %8050 = vmatprep.subr.bf16.mxu0 %v11295_v19  ;;  %7977 = vmatpush3.bf16.msra.mxu1 %v8814_v17 }
 0x7a7   : > { %7978 = vmatprep.subr.bf16.mxu1 %v11295_v19 }
 0x7aa   : > { %7979 = vmatpush3.bf16.msra.mxu1 %v8816_v29 }
 0x7ab   : > { %7980 = vmatprep.subr.bf16.mxu1 %v11295_v19 }
 0x7ae   : > { %7981 = vmatpush3.bf16.msra.mxu1 %v8818_v42 }
 0x85b   : > { %v7952_v26 = vpop.f32.mrb[44].mxu0 }
 0x85c   : > { %v10638_v8 = vadd.f32 %v8306_v28, %v7952_v26  ;;  %v4158_v18 = vpop.f32.mrb[45].mxu0 }
 0x85d   : > { %v10640_v50 = vadd.f32 %v8308_v47, %v4158_v18  ;;  %v7953_v9 = vpop.f32.mrb[46].mxu0 }
 0x85e   : > { %v10643_v33 = vadd.f32 %v8306_v28, %v7953_v9  ;;  %v4161_v2 = vpop.f32.mrb[47].mxu0  ;;  %v4303_v52 = vmax.f32 %v10638_v8, 0.0  ;;  %v8324_v9 = vadd.f32 %v10633_v40, %v4055_v32 }
 0x85f   : > { %v10646_v46 = vadd.f32 %v8308_v47, %v4161_v2  ;;  %v4301_v35 = vmax.f32 %v10640_v50, 0.0  ;;  %v8807_v2 = vld [vmem:[#allocation14 + $0xd0] sm:$0xff]  }
 0x860   : > { %v4244_v12 = vadd.f32 %v10643_v33, %v10638_v8  ;;  %v4304_v38 = vmax.f32 %v10643_v33, 0.0  ;;  %v4959_v11 = vpack.c.bf16 %v10643_v33, %v10638_v8  ;;  %v8839_v33 = vld [vmem:[%s11216_s5 + $0x120] sm:$0xff]  }
 0x861   : > { %v4237_v58 = vadd.f32 %v10646_v46, %v10640_v50  ;;  %v4302_v49 = vmax.f32 %v10646_v46, 0.0  ;;  %v4958_v23 = vpack.c.bf16 %v10646_v46, %v10640_v50  ;;  %v8837_v50 = vld [vmem:[%s11216_s5 + $0x110] sm:$0xff]   ;;  %v8838_v46 = vld [vmem:[%s11216_s5 + $0x118] sm:$0xff]  }
 0x862   : > { %v4245_v15 = vrot.slane %v4244_v12, 4  ;;  %v4335_v61 = vpack.c.bf16 %v4304_v38, %v4303_v52 }
 0x863   : > { %v4238_v39 = vrot.slane %v4237_v58, 4  ;;  %v7956_v21 = vpop.f32.mrb[48].mxu0  ;;  %v4334_v30 = vpack.c.bf16 %v4302_v49, %v4301_v35 }
 0x864   : > { %v4246_v4 = vadd.f32 %v4245_v15, %v4244_v12  ;;  %v10663_v1 = vadd.f32 %v8314_v44, %v7956_v21  ;;  %v4174_v3 = vpop.f32.mrb[49].mxu0  ;;  %v8330_v12 = vadd.f32 %v10633_v40, %v4067_v54  ;;  %v10697_v15 = vadd.f32 %v10633_v40, %v4063_v43 }
 0x865   : > { %v4239_v57 = vadd.f32 %v4238_v39, %v4237_v58  ;;  %v10665_v5 = vadd.f32 %v8316_v41, %v4174_v3  ;;  %v7957_v63 = vpop.f32.mrb[50].mxu0  ;;  %8002 = vmatprep.mubr.bf16.mxu0 %v4334_v30  ;;  %v8809_v3 = vld [vmem:[#allocation14 + $0xd8] sm:$0xff]  }
 0x866   : > { %v4247_v25 = vrot.slane %v4246_v4, 2  ;;  %v10669_v56 = vadd.f32 %v8314_v44, %v7957_v63  ;;  %v4177_v24 = vpop.f32.mrb[51].mxu0  ;;  %8003 = vmatmul.mubr.bf16.vlgmr.msra.gmra.mrb[60].mxu0 %v4335_v61  ;;  %v4307_v17 = vmax.f32 %v10663_v1, 0.0 }
 0x867   : > { %v4240_v55 = vrot.slane %v4239_v57, 2  ;;  %v4305_v29 = vmax.f32 %v10665_v5, 0.0  ;;  %v10675_v42 = vadd.f32 %v8316_v41, %v4177_v24  ;;  %8051 = vmatpush3.bf16.msra.mxu0 %v8803_v22 }
 0x868   : > { %v4248_v59 = vadd.f32 %v4247_v25, %v4246_v4  ;;  %v4258_v7 = vadd.f32 %v10669_v56, %v10663_v1  ;;  %v4308_v45 = vmax.f32 %v10669_v56, 0.0  ;;  %8052 = vmatprep.subr.bf16.mxu0 %v11295_v19  ;;  %v4961_v53 = vpack.c.bf16 %v10669_v56, %v10663_v1  ;;  %v8841_v56 = vld [vmem:[%s11216_s5 + $0x130] sm:$0xff]  }
 0x869   : > { %v4241_v48 = vadd.f32 %v4240_v55, %v4239_v57  ;;  %v4251_v60 = vadd.f32 %v10675_v42, %v10665_v5  ;;  %v4306_v20 = vmax.f32 %v10675_v42, 0.0  ;;  %v4960_v16 = vpack.c.bf16 %v10675_v42, %v10665_v5  ;;  %v8842_v42 = vld [vmem:[%s11216_s5 + $0x138] sm:$0xff]  }
 0x86a   : > { %v4249_v10 = vrot.slane %v4248_v59, 1  ;;  %v4259_v28 = vrot.slane %v4258_v7, 4  ;;  %v4337_v26 = vpack.c.bf16 %v4308_v45, %v4307_v17 }
 0x86b   : > { %v4242_v47 = vrot.slane %v4241_v48, 1  ;;  %v4252_v31 = vrot.slane %v4251_v60, 4  ;;  %v7960_v18 = vpop.f32.mrb[52].mxu0  ;;  %v4336_v0 = vpack.c.bf16 %v4306_v20, %v4305_v29  ;;  %8053 = vmatpush3.bf16.msra.mxu0 %v8805_v36 }
 0x86c   : > { %v4250_v6 = vadd.f32 %v4249_v10, %v4248_v59  ;;  %v4260_v44 = vadd.f32 %v4259_v28, %v4258_v7  ;;  %v10690_v13 = vadd.f32 %v8322_v62, %v7960_v18  ;;  %v4190_v52 = vpop.f32.mrb[53].mxu0  ;;  %8054 = vmatprep.subr.bf16.mxu0 %v11295_v19 }
 0x86d   : > { %v4243_v38 = vadd.f32 %v4242_v47, %v4241_v48  ;;  %v4253_v35 = vadd.f32 %v4252_v31, %v4251_v60  ;;  %v10694_v58 = vadd.f32 %v8324_v9, %v4190_v52  ;;  %v7961_v49 = vpop.f32.mrb[54].mxu0  ;;  %8006 = vmatprep.mubr.bf16.mxu0 %v4336_v0  ;;  %v8811_v60 = vld [vmem:[#allocation14 + $0xe0] sm:$0xff]  }
 0x86e   : > { %v4294_v61 = vmul.f32 0.0625, %v4250_v6  ;;  %v4261_v14 = vrot.slane %v4260_v44, 2  ;;  %v4311_v34 = vmax.f32 %v10690_v13, 0.0  ;;  %v10700_v39 = vadd.f32 %v8322_v62, %v7961_v49  ;;  %v4193_v21 = vpop.f32.mrb[55].mxu0  ;;  %8007 = vmatmul.mubr.bf16.gmra.mrb[64].mxu0 %v4337_v26 }
 0x86f   : > { %v4293_v41 = vmul.f32 0.0625, %v4243_v38  ;;  %v4254_v30 = vrot.slane %v4253_v35, 2  ;;  %v4309_v22 = vmax.f32 %v10694_v58, 0.0  ;;  %v10703_v4 = vadd.f32 %v8324_v9, %v4193_v21  ;;  %8055 = vmatpush3.bf16.msra.mxu0 %v8807_v2  ;;  %v8813_v21 = vld [vmem:[#allocation14 + $0xe8] sm:$0xff]  }
 0x870   : > { %v4343_v57 = vmax.f32 %v4294_v61, 0.0  ;;  %v4984_v63 = vpack.c.bf16 %v4294_v61, %v4294_v61  ;;  %v4262_v40 = vadd.f32 %v4261_v14, %v4260_v44  ;;  %v4272_v51 = vadd.f32 %v10700_v39, %v10690_v13  ;;  %8056 = vmatprep.subr.bf16.mxu0 %v11295_v19 }
 0x871   : > { %v4342_v32 = vmax.f32 %v4293_v41, 0.0  ;;  %v4983_v25 = vpack.c.bf16 %v4293_v41, %v4293_v41  ;;  %v4255_v24 = vadd.f32 %v4254_v30, %v4253_v35  ;;  %v4312_v54 = vmax.f32 %v10700_v39, 0.0 }
 0x872   : > { %v4368_v43 = vpack.c.bf16 %v4343_v57, %v4343_v57  ;;  %v5000_v55 = vunpack.c.l.b16 %v4984_v63  ;;  %v4263_v17 = vrot.slane %v4262_v40, 1  ;;  %v4273_v29 = vrot.slane %v4272_v51, 4 }
 0x873   : > { %v4367_v36 = vpack.c.bf16 %v4342_v32, %v4342_v32  ;;  %v4999_v59 = vunpack.c.l.b16 %v4983_v25  ;;  %v4256_v7 = vrot.slane %v4255_v24, 1  ;;  %v4265_v45 = vadd.f32 %v10703_v4, %v10694_v58  ;;  %v7964_v48 = vpop.f32.mrb[56].mxu0  ;;  %8057 = vmatpush3.bf16.msra.mxu0 %v8809_v3 }
 0x874   : > { %v4384_v20 = vunpack.c.l.b16 %v4368_v43  ;;  %v4264_v10 = vadd.f32 %v4263_v17, %v4262_v40  ;;  %v4274_v28 = vadd.f32 %v4273_v29, %v4272_v51  ;;  %v4310_v62 = vmax.f32 %v10703_v4, 0.0  ;;  %v4206_v26 = vpop.f32.mrb[57].mxu0  ;;  %8058 = vmatprep.subr.bf16.mxu0 %v11295_v19 }
 0x875   : > { %v4383_v47 = vunpack.c.l.b16 %v4367_v36  ;;  %v5007_v31 = vsel %vm2148_vm1, %v5000_v55, %v4999_v59  ;;  %v4257_v18 = vadd.f32 %v4256_v7, %v4255_v24  ;;  %v4266_v9 = vrot.slane %v4265_v45, 4  ;;  %v7965_v0 = vpop.f32.mrb[58].mxu0  ;;  %v8815_v59 = vld [vmem:[#allocation14 + $0xf0] sm:$0xff]  }
 0x876   : > { %v4296_v2 = vmul.f32 0.0625, %v4264_v10  ;;  %v4275_v6 = vrot.slane %v4274_v28, 2  ;;  %v10714_v44 = vadd.f32 %v8330_v12, %v7964_v48  ;;  %v10717_v52 = vadd.f32 %v10697_v15, %v4206_v26  ;;  %v4209_v38 = vpop.f32.mrb[59].mxu0 }
 0x877   : > { %v4391_v35 = vsel %vm2148_vm1, %v4384_v20, %v4383_v47  ;;  %v4295_v49 = vmul.f32 0.0625, %v4257_v18  ;;  %v4267_v61 = vadd.f32 %v4266_v9, %v4265_v45  ;;  %v10720_v14 = vadd.f32 %v8330_v12, %v7965_v0  ;;  %8059 = vmatpush3.bf16.msra.mxu0 %v8811_v60 }
 0x878   : > { %v4345_v41 = vmax.f32 %v4296_v2, 0.0  ;;  %v4986_v30 = vpack.c.bf16 %v4296_v2, %v4296_v2  ;;  %v4276_v3 = vadd.f32 %v4275_v6, %v4274_v28  ;;  %v4315_v57 = vmax.f32 %v10714_v44, 0.0  ;;  %8060 = vmatprep.subr.bf16.mxu0 %v11295_v19 }
 0x879   : > { %v4344_v63 = vmax.f32 %v4295_v49, 0.0  ;;  %v4985_v40 = vpack.c.bf16 %v4295_v49, %v4295_v49  ;;  %v4268_v51 = vrot.slane %v4267_v61, 2  ;;  %v4313_v32 = vmax.f32 %v10717_v52, 0.0 }
 0x87a   : > { %v4370_v25 = vpack.c.bf16 %v4345_v41, %v4345_v41  ;;  %v5002_v24 = vunpack.c.l.b16 %v4986_v30  ;;  %v4277_v43 = vrot.slane %v4276_v3, 1  ;;  %v4286_v12 = vadd.f32 %v10720_v14, %v10714_v44 }
 0x87b   : > { %v4369_v55 = vpack.c.bf16 %v4344_v63, %v4344_v63  ;;  %v5001_v17 = vunpack.c.l.b16 %v4985_v40  ;;  %v4269_v29 = vadd.f32 %v4268_v51, %v4267_v61  ;;  %v4316_v36 = vmax.f32 %v10720_v14, 0.0  ;;  %8061 = vmatpush3.bf16.msra.mxu0 %v8813_v21 }
 0x87c   : > { %v4386_v7 = vunpack.c.l.b16 %v4370_v25  ;;  %v4278_v45 = vadd.f32 %v4277_v43, %v4276_v3  ;;  %v4287_v48 = vrot.slane %v4286_v12, 4  ;;  %v4338_v60 = vpack.c.bf16 %v4310_v62, %v4309_v22  ;;  %8062 = vmatprep.subr.bf16.mxu0 %v11295_v19 }
 0x87d   : > { %v4385_v20 = vunpack.c.l.b16 %v4369_v55  ;;  %v5008_v10 = vsel %vm2150_vm2, %v5001_v17, %v5007_v31  ;;  %v4270_v28 = vrot.slane %v4269_v29, 1  ;;  %v10733_v26 = vadd.f32 %v10697_v15, %v4209_v38  ;;  %v8817_v15 = vld [vmem:[#allocation14 + $0xf8] sm:$0xff]  }
 0x87e   : > { %v4298_v47 = vmul.f32 0.0625, %v4278_v45  ;;  %v5009_v18 = vsel %vm2152_vm3, %v5002_v24, %v5008_v10  ;;  %v4288_v9 = vadd.f32 %v4287_v48, %v4286_v12  ;;  %8010 = vmatprep.mubr.bf16.mxu0 %v4338_v60  ;;  %v4339_v0 = vpack.c.bf16 %v4312_v54, %v4311_v34 }
 0x87f   : > { %v4271_v22 = vadd.f32 %v4270_v28, %v4269_v29  ;;  %v4279_v62 = vadd.f32 %v10733_v26, %v10717_v52  ;;  %v4314_v31 = vmax.f32 %v10733_v26, 0.0  ;;  %v4341_v2 = vpack.c.bf16 %v4316_v36, %v4315_v57  ;;  %8063 = vmatpush3.bf16.msra.mxu0 %v8815_v59 }
 0x880   : > { %v4347_v6 = vmax.f32 %v4298_v47, 0.0  ;;  %v4289_v38 = vrot.slane %v4288_v9, 2  ;;  %8011 = vmatmul.mubr.bf16.gmra.mrb[68].mxu0 %v4339_v0  ;;  %8064 = vmatprep.subr.bf16.mxu0 %v11295_v19  ;;  %v4392_v49 = vsel %vm2150_vm2, %v4385_v20, %v4391_v35  ;;  %v4988_v54 = vpack.c.bf16 %v4298_v47, %v4298_v47 }
 0x881   : > { %v4297_v61 = vmul.f32 0.0625, %v4271_v22  ;;  %v4280_v21 = vrot.slane %v4279_v62, 4  ;;  %v4340_v41 = vpack.c.bf16 %v4314_v31, %v4313_v32  ;;  %v4393_v34 = vsel %vm2152_vm3, %v4386_v7, %v4392_v49 }
 0x882   : > { %v4290_v30 = vadd.f32 %v4289_v38, %v4288_v9  ;;  %v4372_v25 = vpack.c.bf16 %v4347_v6, %v4347_v6  ;;  %v5004_v17 = vunpack.c.l.b16 %v4988_v54  ;;  %v11296_v8 = vpack.c.bf16 %v10703_v4, %v10694_v58  ;;  %v8850_v58 = vld [vmem:[#allocation10 + $0x118] sm:$0xff]   ;;  %v8854_v4 = vld [vmem:[#allocation10 + $0x128] sm:$0xff]  }
 0x883   : > { %v4346_v57 = vmax.f32 %v4297_v61, 0.0  ;;  %v4987_v63 = vpack.c.bf16 %v4297_v61, %v4297_v61  ;;  %v4281_v40 = vadd.f32 %v4280_v21, %v4279_v62  ;;  %8014 = vmatprep.mubr.bf16.mxu0 %v4340_v41  ;;  %8065 = vmatpush3.bf16.msra.mxu0 %v8817_v15  ;;  %v11298_v1 = vpack.c.bf16 %v10733_v26, %v10717_v52  ;;  %v8858_v52 = vld [vmem:[#allocation10 + $0x138] sm:$0xff]  }
 0x884   : > { %v4291_v35 = vrot.slane %v4290_v30, 1  ;;  %8102 = vmatprep.subr.bf16.mxu0 %v11295_v19  ;;  %v4388_v45 = vunpack.c.l.b16 %v4372_v25  ;;  %v8822_v25 = vld [vmem:[#allocation11 + $0xd8] sm:$0xff]   ;;  %v11299_v5 = vpack.c.bf16 %v10720_v14, %v10714_v44  ;;  %v8856_v44 = vld [vmem:[#allocation10 + $0x130] sm:$0xff]  }
 0x885   : > { %v4371_v43 = vpack.c.bf16 %v4346_v57, %v4346_v57  ;;  %v5003_v12 = vunpack.c.l.b16 %v4987_v63  ;;  %v4282_v55 = vrot.slane %v4281_v40, 2  ;;  %v8819_v57 = vld [vmem:[#allocation11 + $0xc0] sm:$0xff]   ;;  %v8820_v63 = vld [vmem:[#allocation11 + $0xc8] sm:$0xff]  }
 0x886   : > { %v4292_v29 = vadd.f32 %v4291_v35, %v4290_v30  ;;  %8018 = vmatprep.subr.bf16.mxu1 %v8819_v57  ;;  %v8823_v35 = vld [vmem:[#allocation11 + $0xe0] sm:$0xff]  }
 0x887   : > { %v4387_v36 = vunpack.c.l.b16 %v4371_v43  ;;  %v5010_v59 = vsel %vm2154_vm4, %v5003_v12, %v5009_v18  ;;  %v4283_v7 = vadd.f32 %v4282_v55, %v4281_v40  ;;  %v8821_v40 = vld [vmem:[#allocation11 + $0xd0] sm:$0xff]   ;;  %v8824_v43 = vld [vmem:[#allocation11 + $0xe8] sm:$0xff]   ;;  %v8826_v55 = vld [vmem:[#allocation11 + $0xf8] sm:$0xff]  }
 0x888   : > { %v4300_v48 = vmul.f32 0.0625, %v4292_v29  ;;  %8015 = vmatmul.mubr.bf16.gmra.mrb[72].mxu0 %v4341_v2  ;;  %v5011_v60 = vsel %vm2156_vm5, %v5004_v17, %v5010_v59  ;;  %v8825_v12 = vld [vmem:[#allocation11 + $0xf0] sm:$0xff]   ;;  %v10767_v17 = vld [vmem:[#allocation13 + $0xc0] sm:$0xff]  }
 0x889   : > { %v4284_v20 = vrot.slane %v4283_v7, 1  ;;  %8066 = vmatprep.mubr.msk.bf16.mxu0 %vm9234_vm0, %v11295_v19  ;;  %v4394_v10 = vsel %vm2154_vm4, %v4387_v36, %v4393_v34 }
 0x88a   : > { %v4395_v28 = vsel %vm2156_vm5, %v4388_v45, %v4394_v10  ;;  %v4349_v9 = vmax.f32 %v4300_v48, 0.0  ;;  %v4990_v22 = vpack.c.bf16 %v4300_v48, %v4300_v48 }
 0x88b   : > { %v4285_v47 = vadd.f32 %v4284_v20, %v4283_v7 }
 0x88c   : > { %v4374_v31 = vpack.c.bf16 %v4349_v9, %v4349_v9  ;;  %v5006_v2 = vunpack.c.l.b16 %v4990_v22 }
 0x88d   : > { %v4299_v0 = vmul.f32 0.0625, %v4285_v47 }
 0x88e   : > { %v4390_v21 = vunpack.c.l.b16 %v4374_v31 }
 0x88f   : > { %v4348_v62 = vmax.f32 %v4299_v0, 0.0  ;;  %v4989_v18 = vpack.c.bf16 %v4299_v0, %v4299_v0 }
 0x891   : > { %v4373_v15 = vpack.c.bf16 %v4348_v62, %v4348_v62  ;;  %v5005_v6 = vunpack.c.l.b16 %v4989_v18 }
 0x893   : > { %v5012_v38 = vsel %vm2158_vm6, %v5005_v6, %v5011_v60  ;;  %v4389_v49 = vunpack.c.l.b16 %v4373_v15 }
 0x894   : > { %v5013_v61 = vsel %vm2160_vm7, %v5006_v2, %v5012_v38 }
 0x895   : > { %v5014_v41 = vpack.c.b16 %v5013_v61, %v5013_v61  ;;  %v4396_v34 = vsel %vm2158_vm6, %v4389_v49, %v4395_v28 }
 0x896   : > { %v4397_v54 = vsel %vm2160_vm7, %v4390_v21, %v4396_v34 }
 0x897   : > { %8067 = vmatmul.mubr.bf16.vlgmr.msra.gmra.mrb[76].mxu0 %v5014_v41  ;;  %v4398_v30 = vpack.c.b16 %v4397_v54, %v4397_v54 }
 0x898   : > { %8118 = vmatprep.mubr.msk.bf16.mxu0 %vm9234_vm0, %v11295_v19 }
 0x899   : > { %7983 = vmatmul.mubr.bf16.vlgmr.msra.gmra.mrb[52].mxu1 %v4398_v30 }
 0x89a   : > { %8019 = vmatpush3.bf16.msra.mxu1 %v8819_v57 }
 0x89b   : > { %8020 = vmatprep.subr.bf16.mxu1 %v8820_v63 }
 0x89e   : > { %8021 = vmatpush3.bf16.msra.mxu1 %v8820_v63 }
 0x89f   : > { %8022 = vmatprep.subr.bf16.mxu1 %v8821_v40 }
 0x8a2   : > { %8023 = vmatpush3.bf16.msra.mxu1 %v8821_v40 }
 0x8a3   : > { %8024 = vmatprep.subr.bf16.mxu1 %v8822_v25 }
 0x8a6   : > { %8025 = vmatpush3.bf16.msra.mxu1 %v8822_v25 }
 0x8a7   : > { %8026 = vmatprep.subr.bf16.mxu1 %v8823_v35 }
 0x8aa   : > { %8027 = vmatpush3.bf16.msra.mxu1 %v8823_v35 }
 0x8ab   : > { %8028 = vmatprep.subr.bf16.mxu1 %v8824_v43 }
 0x8ae   : > { %8029 = vmatpush3.bf16.msra.mxu1 %v8824_v43 }
 0x8af   : > { %8030 = vmatprep.subr.bf16.mxu1 %v8825_v12 }
 0x8b2   : > { %8031 = vmatpush3.bf16.msra.mxu1 %v8825_v12 }
 0x8b3   : > { %8032 = vmatprep.subr.bf16.mxu1 %v8826_v55 }
 0x8b6   : > { %8033 = vmatpush3.bf16.msra.mxu1 %v8826_v55 }
 0x8b7   : > { %8070 = vmatprep.subr.bf16.mxu1 %v10767_v17 }
 0x939   : > { %v8004_v29 = vpop.f32.mrb[60].mxu0 }
 0x93a   : > { %v4660_v36 = vpop.f32.mrb[61].mxu0 }
 0x93b   : > { %v8005_v59 = vpop.f32.mrb[62].mxu0 }
 0x93c   : > { %v4663_v7 = vpop.f32.mrb[63].mxu0 }
 0x941   : > { %v8008_v45 = vpop.f32.mrb[64].mxu0 }
 0x942   : > { %v4676_v48 = vpop.f32.mrb[65].mxu0 }
 0x943   : > { %v8009_v60 = vpop.f32.mrb[66].mxu0 }
 0x944   : > { %v4679_v20 = vpop.f32.mrb[67].mxu0 }
 0x953   : > { %v10770_v10 = vpop.f32.mrb[68].mxu0 }
 0x954   : > { %v4692_v28 = vpop.f32.mrb[69].mxu0 }
 0x955   : > { %v10772_v47 = vpop.f32.mrb[70].mxu0 }
 0x956   : > { %v10774_v9 = vpop.f32.mrb[71].mxu0 }
 0x95b   : > { %v10776_v0 = vpop.f32.mrb[72].mxu0 }
 0x95c   : > { %v10778_v22 = vpop.f32.mrb[73].mxu0 }
 0x95d   : > { %v10780_v62 = vpop.f32.mrb[74].mxu0 }
 0x95e   : > { %v10782_v18 = vpop.f32.mrb[75].mxu0 }
 0x96a   : > { %v10784_v31 = vpop.f32.mrb[76].mxu0 }
 0x96b   : > { %v8068_v15 = vpop.f32.mrb[77].mxu0  ;;  %v5112_v14 = vrot.slane %v10784_v31, %v10255_v27 }
 0x96c   : > { %v4482_v6 = vpop.f32.mrb[52].mxu1  ;;  %v5101_v2 = vpop.f32.mrb[78].mxu0 }
 0x96d   : > { %v4489_v38 = vcombine.high %v4482_v6, %v4482_v6  ;;  %v7984_v49 = vpop.f32.mrb[53].mxu1  ;;  %v8069_v61 = vpop.f32.mrb[79].mxu0  ;;  %v4496_v21 = vrot.slane %v4482_v6, %v10255_v27  ;;  %v10797_v2 = vld [vmem:[%s11218_s7 + $0x3] ss:$0 sm:$0xff]  ;;  %v5120_v26 = vcombine.high %v5112_v14, %v5112_v14 }
 0x96e   : > { %v4485_v41 = vpop.f32.mrb[54].mxu1 }
 0x96f   : > { %v7985_v34 = vpop.f32.mrb[55].mxu1  ;;  %v4503_v54 = vrot.slane %v4489_v38, %v10255_v27  ;;  %v4504_v30 = vcombine.high %v4496_v21, %v4496_v21  ;;  %v4512_v57 = vrot.slane %v4496_v21, %v10255_v27 }
 0x971   : > { %v4505_v63 = vcombine.high %v4503_v54, %v4503_v54  ;;  %v4519_v40 = vrot.slane %v4503_v54, %v10255_v27  ;;  %v4526_v25 = vrot.slane %v4504_v30, %v10255_v27  ;;  %v4534_v35 = vcombine.high %v4512_v57, %v4512_v57 }
 0x972   : > { %v4541_v43 = vrot.slane %v4512_v57, %v10260_v37 }
 0x973   : > { %v4533_v12 = vrot.slane %v4505_v63, %v10255_v27  ;;  %v4535_v55 = vcombine.high %v4519_v40, %v4519_v40  ;;  %v4536_v15 = vcombine.high %v4526_v25, %v4526_v25  ;;  %v4545_v6 = vrot.slane %v4526_v25, %v10260_v37 }
 0x974   : > { %v4549_v38 = vrot.slane %v4534_v35, %v10260_v37  ;;  %v4557_v49 = vrot.slane %v4519_v40, %v10260_v37  ;;  %v4661_v61 = vadd.f32 %v4660_v36, %v4541_v43  ;;  %v4664_v21 = vadd.f32 %v4663_v7, %v4541_v43 }
 0x975   : > { %v4537_v41 = vcombine.high %v4533_v12, %v4533_v12  ;;  %v4553_v34 = vrot.slane %v4536_v15, %v10260_v37  ;;  %v4561_v54 = vrot.slane %v4533_v12, %v10260_v37  ;;  %v4565_v30 = vrot.slane %v4535_v55, %v10260_v37 }
 0x976   : > { %v4669_v57 = vadd.f32 %v8004_v29, %v4545_v6  ;;  %v4672_v63 = vadd.f32 %v8005_v59, %v4545_v6  ;;  %v4731_v25 = vadd.f32 %v10797_v2, %v4661_v61  ;;  %v4732_v24 = vadd.f32 %v10797_v2, %v4664_v21  ;;  %v8828_v21 = vld [vmem:[#allocation13 + $0xc8] sm:$0xff]  }
 0x977   : > { %v4677_v32 = vadd.f32 %v4676_v48, %v4549_v38  ;;  %v4680_v51 = vadd.f32 %v4679_v20, %v4549_v38  ;;  %v4685_v35 = vadd.f32 %v8008_v45, %v4553_v34  ;;  %v4688_v3 = vadd.f32 %v8009_v60, %v4553_v34 }
 0x978   : > { %v4747_v40 = vmax.f32 %v4731_v25, 0.0  ;;  %v4748_v36 = vmax.f32 %v4732_v24, 0.0  ;;  %v4733_v7 = vadd.f32 %v10797_v2, %v4669_v57  ;;  %v4734_v43 = vadd.f32 %v10797_v2, %v4672_v63 }
 0x979   : > { %v4735_v12 = vadd.f32 %v10797_v2, %v4677_v32  ;;  %v4736_v55 = vadd.f32 %v10797_v2, %v4680_v51  ;;  %v4737_v29 = vadd.f32 %v10797_v2, %v4685_v35  ;;  %v4738_v59 = vadd.f32 %v10797_v2, %v4688_v3 }
 0x97a   : > { %v4780_v15 = vpack.c.bf16 %v4748_v36, %v4747_v40  ;;  %v4749_v6 = vmax.f32 %v4733_v7, 0.0  ;;  %v4750_v48 = vmax.f32 %v4734_v43, 0.0  ;;  %v4693_v20 = vadd.f32 %v4692_v28, %v4557_v49 }
 0x97b   : > { %v4751_v45 = vmax.f32 %v4735_v12, 0.0  ;;  %v4752_v60 = vmax.f32 %v4736_v55, 0.0  ;;  %v4753_v38 = vmax.f32 %v4737_v29, 0.0  ;;  %v4754_v24 = vmax.f32 %v4738_v59, 0.0 }
 0x97c   : > { %8034 = vmatprep.mubr.bf16.mxu1 %v4780_v15  ;;  %v4781_v61 = vpack.c.bf16 %v4750_v48, %v4749_v6  ;;  %v4696_v34 = vadd.f32 %v10774_v9, %v4557_v49  ;;  %v4739_v32 = vadd.f32 %v10797_v2, %v4693_v20  ;;  %v4701_v51 = vadd.f32 %v10770_v10, %v4561_v54  ;;  %v8830_v15 = vld [vmem:[#allocation13 + $0xd8] sm:$0xff]  }
 0x97d   : > { %v4782_v57 = vpack.c.bf16 %v4752_v60, %v4751_v45  ;;  %v4783_v63 = vpack.c.bf16 %v4754_v24, %v4753_v38  ;;  %v4704_v3 = vadd.f32 %v10772_v47, %v4561_v54  ;;  %v4709_v25 = vadd.f32 %v10778_v22, %v4565_v30  ;;  %v8829_v47 = vld [vmem:[#allocation13 + $0xd0] sm:$0xff]   ;;  %v8836_v24 = vld [vmem:[%s11216_s5 + $0x108] sm:$0xff]  }
 0x97e   : > { %8035 = vmatmul.mubr.bf16.vlgmr.msra.gmra.mrb[56].mxu1 %v4781_v61  ;;  %v4740_v28 = vadd.f32 %v10797_v2, %v4696_v34  ;;  %v4755_v35 = vmax.f32 %v4739_v32, 0.0  ;;  %v4741_v40 = vadd.f32 %v10797_v2, %v4701_v51  ;;  %v4712_v36 = vadd.f32 %v10782_v18, %v4565_v30  ;;  %v8833_v60 = vld [vmem:[#allocation13 + $0xf0] sm:$0xff]  }
 0x97f   : > { %8071 = vmatpush3.bf16.msra.mxu1 %v10767_v17  ;;  %8038 = vmatprep.mubr.bf16.mxu1 %v4782_v57  ;;  %v4742_v9 = vadd.f32 %v10797_v2, %v4704_v3  ;;  %v4743_v10 = vadd.f32 %v10797_v2, %v4709_v25  ;;  %v4569_v49 = vrot.slane %v4537_v41, %v10260_v37  ;;  %v8835_v38 = vld [vmem:[%s11216_s5 + $0x100] sm:$0xff]  }
 0x980   : > { %8072 = vmatprep.subr.bf16.mxu1 %v8828_v21  ;;  %v4756_v22 = vmax.f32 %v4740_v28, 0.0  ;;  %v4757_v54 = vmax.f32 %v4741_v40, 0.0  ;;  %v4744_v7 = vadd.f32 %v10797_v2, %v4712_v36  ;;  %v5105_v61 = vcombine.high %v10784_v31, %v10784_v31  ;;  %v10897_v3 = vld [vmem:[%s11220_s9 + $0x3] ss:$0 sm:$0xff] }
 0x981   : > { %v4758_v43 = vmax.f32 %v4742_v9, 0.0  ;;  %v4759_v12 = vmax.f32 %v4743_v10, 0.0  ;;  %v4717_v55 = vadd.f32 %v10776_v0, %v4569_v49  ;;  %v4720_v18 = vadd.f32 %v10780_v62, %v4569_v49  ;;  %v8831_v0 = vld [vmem:[#allocation13 + $0xe0] sm:$0xff]   ;;  %v8832_v62 = vld [vmem:[#allocation13 + $0xe8] sm:$0xff]  }
 0x982   : > { %v4784_v17 = vpack.c.bf16 %v4756_v22, %v4755_v35  ;;  %v4760_v30 = vmax.f32 %v4744_v7, 0.0  ;;  %v5128_v34 = vrot.slane %v5112_v14, %v10255_v27  ;;  %v5119_v32 = vrot.slane %v5105_v61, %v10255_v27  ;;  %v8845_v14 = vld [vmem:[#allocation14 + $0x108] sm:$0xff]  }
 0x983   : > { %8073 = vmatpush3.bf16.msra.mxu1 %v8828_v21  ;;  %v4785_v29 = vpack.c.bf16 %v4758_v43, %v4757_v54  ;;  %v4745_v59 = vadd.f32 %v10797_v2, %v4717_v55  ;;  %v4746_v41 = vadd.f32 %v10797_v2, %v4720_v18  ;;  %v8834_v2 = vld [vmem:[#allocation13 + $0xf8] sm:$0xff]   ;;  %v5142_v21 = vrot.slane %v5120_v26, %v10255_v27 }
 0x984   : > { %8074 = vmatprep.subr.bf16.mxu1 %v8829_v47  ;;  %v4786_v6 = vpack.c.bf16 %v4760_v30, %v4759_v12  ;;  %v5157_v57 = vrot.slane %v5128_v34, %v10260_v37  ;;  %v5121_v25 = vcombine.high %v5119_v32, %v5119_v32  ;;  %v5150_v31 = vcombine.high %v5128_v34, %v5128_v34 }
 0x985   : > { %v4761_v48 = vmax.f32 %v4745_v59, 0.0  ;;  %v4762_v20 = vmax.f32 %v4746_v41, 0.0  ;;  %v5161_v51 = vrot.slane %v5142_v21, %v10260_v37  ;;  %v5135_v22 = vrot.slane %v5119_v32, %v10255_v27 }
 0x986   : > { %8039 = vmatmul.mubr.bf16.gmra.mrb[60].mxu1 %v4783_v63  ;;  %v5152_v63 = vcombine.high %v5142_v21, %v5142_v21  ;;  %v8340_v40 = vadd.f32 %v10897_v3, %v5157_v57  ;;  %v5149_v43 = vrot.slane %v5121_v25, %v10255_v27  ;;  %v5165_v18 = vrot.slane %v5150_v31, %v10260_v37 }
 0x987   : > { %8075 = vmatpush3.bf16.msra.mxu1 %v8829_v47  ;;  %8042 = vmatprep.mubr.bf16.mxu1 %v4784_v17  ;;  %v4787_v45 = vpack.c.bf16 %v4762_v20, %v4761_v48  ;;  %v8338_v28 = vadd.f32 %v10897_v3, %v5161_v51 }
 0x988   : > { %8076 = vmatprep.subr.bf16.mxu1 %v8830_v15  ;;  %v5169_v36 = vrot.slane %v5152_v63, %v10260_v37 }
 0x98a   : > { %v8346_v55 = vadd.f32 %v10897_v3, %v5169_v36 }
 0x98b   : > { %8077 = vmatpush3.bf16.msra.mxu1 %v8830_v15 }
 0x98c   : > { %8078 = vmatprep.subr.bf16.mxu1 %v8831_v0 }
 0x98e   : > { %8043 = vmatmul.mubr.bf16.gmra.mrb[64].mxu1 %v4785_v29 }
 0x98f   : > { %8079 = vmatpush3.bf16.msra.mxu1 %v8831_v0  ;;  %8046 = vmatprep.mubr.bf16.mxu1 %v4786_v6  ;;  %v5153_v0 = vcombine.high %v5149_v43, %v5149_v43 }
 0x990   : > { %8080 = vmatprep.subr.bf16.mxu1 %v8832_v62 }
 0x993   : > { %8081 = vmatpush3.bf16.msra.mxu1 %v8832_v62  ;;  %v5151_v62 = vcombine.high %v5135_v22, %v5135_v22 }
 0x994   : > { %8082 = vmatprep.subr.bf16.mxu1 %v8833_v60 }
 0x996   : > { %8047 = vmatmul.mubr.bf16.gmra.mrb[68].mxu1 %v4787_v45 }
 0x997   : > { %8083 = vmatpush3.bf16.msra.mxu1 %v8833_v60  ;;  %8086 = vmatprep.mubr.bf16.mxu1 %v4958_v23  ;;  %v11297_v23 = vpack.c.bf16 %v10700_v39, %v10690_v13  ;;  %v8848_v13 = vld [vmem:[#allocation10 + $0x110] sm:$0xff]   ;;  %v8852_v39 = vld [vmem:[#allocation10 + $0x120] sm:$0xff]  }
 0x998   : > { %8084 = vmatprep.subr.bf16.mxu1 %v8834_v2 }
 0x99b   : > { %8085 = vmatpush3.bf16.msra.mxu1 %v8834_v2 }
 0x99c   : > { %8122 = vmatprep.subr.bf16.mxu1 %v8835_v38 }
 0x99e   : > { %8087 = vmatmul.mubr.bf16.vlgmr.msra.gmra.mrb[56].mxu1 %v4959_v11  ;;  %v8840_v11 = vld [vmem:[%s11216_s5 + $0x128] sm:$0xff]  }
 0x99f   : > { %8090 = vmatprep.mubr.bf16.mxu1 %v4960_v16  ;;  %8123 = vmatpush3.bf16.msra.mxu1 %v8835_v38  ;;  %v8846_v16 = vld [vmem:[#allocation10 + $0x108] sm:$0xff]   ;;  %v8348_v38 = vadd.f32 %v10897_v3, %v5165_v18 }
 0x9a0   : > { %8124 = vmatprep.subr.bf16.mxu1 %v8836_v24 }
 0x9a3   : > { %8125 = vmatpush3.bf16.msra.mxu1 %v8836_v24 }
 0x9a4   : > { %8126 = vmatprep.subr.bf16.mxu1 %v8837_v50 }
 0x9a6   : > { %8091 = vmatmul.mubr.bf16.gmra.mrb[60].mxu1 %v4961_v53  ;;  %v8844_v53 = vld [vmem:[#allocation10 + $0x100] sm:$0xff]  }
 0x9a7   : > { %8094 = vmatprep.mubr.bf16.mxu1 %v11296_v8  ;;  %8127 = vmatpush3.bf16.msra.mxu1 %v8837_v50  ;;  %v8843_v50 = vld [vmem:[#allocation14 + $0x100] sm:$0xff]  }
 0x9a8   : > { %8128 = vmatprep.subr.bf16.mxu1 %v8838_v46  ;;  %8103 = vmatpush3.bf16.msra.mxu0 %v8844_v53 }
 0x9a9   : > { %8104 = vmatprep.subr.bf16.mxu0 %v11295_v19 }
 0x9ab   : > { %8129 = vmatpush3.bf16.msra.mxu1 %v8838_v46 }
 0x9ac   : > { %8130 = vmatprep.subr.bf16.mxu1 %v8839_v33  ;;  %8105 = vmatpush3.bf16.msra.mxu0 %v8846_v16 }
 0x9ad   : > { %8106 = vmatprep.subr.bf16.mxu0 %v11295_v19 }
 0x9ae   : > { %8095 = vmatmul.mubr.bf16.gmra.mrb[64].mxu1 %v11297_v23 }
 0x9af   : > { %8098 = vmatprep.mubr.bf16.mxu1 %v11298_v1  ;;  %8131 = vmatpush3.bf16.msra.mxu1 %v8839_v33 }
 0x9b0   : > { %8132 = vmatprep.subr.bf16.mxu1 %v8840_v11  ;;  %8107 = vmatpush3.bf16.msra.mxu0 %v8848_v13  ;;  %v5185_v13 = vrot.slane %v5153_v0, %v10260_v37 }
 0x9b1   : > { %8108 = vmatprep.subr.bf16.mxu0 %v11295_v19 }
 0x9b3   : > { %8133 = vmatpush3.bf16.msra.mxu1 %v8840_v11 }
 0x9b4   : > { %8134 = vmatprep.subr.bf16.mxu1 %v8841_v56  ;;  %8109 = vmatpush3.bf16.msra.mxu0 %v8850_v58  ;;  %v5181_v58 = vrot.slane %v5151_v62, %v10260_v37 }
 0x9b5   : > { %8110 = vmatprep.subr.bf16.mxu0 %v11295_v19 }
 0x9b6   : > { %8099 = vmatmul.mubr.bf16.gmra.mrb[68].mxu1 %v11299_v5  ;;  %v5177_v5 = vrot.slane %v5149_v43, %v10260_v37 }
 0x9b7   : > { %8135 = vmatpush3.bf16.msra.mxu1 %v8841_v56  ;;  %v5173_v56 = vrot.slane %v5135_v22, %v10260_v37 }
 0x9b8   : > { %8136 = vmatprep.subr.bf16.mxu1 %v8842_v42  ;;  %8111 = vmatpush3.bf16.msra.mxu0 %v8852_v39  ;;  %v8354_v31 = vadd.f32 %v10897_v3, %v5177_v5 }
 0x9b9   : > { %8112 = vmatprep.subr.bf16.mxu0 %v11295_v19 }
 0x9bb   : > { %8137 = vmatpush3.bf16.msra.mxu1 %v8842_v42 }
 0x9bc   : > { %8186 = vmatprep.subr.bf16.mxu1 %v11295_v19  ;;  %8113 = vmatpush3.bf16.msra.mxu0 %v8854_v4 }
 0x9bd   : > { %8114 = vmatprep.subr.bf16.mxu0 %v11295_v19 }
 0x9c0   : > { %8115 = vmatpush3.bf16.msra.mxu0 %v8856_v44 }
 0x9c1   : > { %8116 = vmatprep.subr.bf16.mxu0 %v11295_v19 }
 0x9c4   : > { %8117 = vmatpush3.bf16.msra.mxu0 %v8858_v52 }
 0xa71   : > { %v8088_v35 = vpop.f32.mrb[56].mxu1 }
 0xa72   : > { %v10902_v9 = vadd.f32 %v8338_v28, %v8088_v35  ;;  %v5276_v10 = vpop.f32.mrb[57].mxu1 }
 0xa73   : > { %v10904_v49 = vadd.f32 %v8340_v40, %v5276_v10  ;;  %v8089_v47 = vpop.f32.mrb[58].mxu1 }
 0xa74   : > { %v10907_v54 = vadd.f32 %v8338_v28, %v8089_v47  ;;  %v5279_v7 = vpop.f32.mrb[59].mxu1  ;;  %v5421_v17 = vmax.f32 %v10902_v9, 0.0  ;;  %v8356_v47 = vadd.f32 %v10897_v3, %v5173_v56 }
 0xa75   : > { %v10910_v12 = vadd.f32 %v8340_v40, %v5279_v7  ;;  %v5419_v41 = vmax.f32 %v10904_v49, 0.0  ;;  %v8847_v7 = vld [vmem:[#allocation14 + $0x110] sm:$0xff]  }
 0xa76   : > { %v5362_v30 = vadd.f32 %v10907_v54, %v10902_v9  ;;  %v5422_v29 = vmax.f32 %v10907_v54, 0.0  ;;  %v6077_v59 = vpack.c.bf16 %v10907_v54, %v10902_v9 }
 0xa77   : > { %v5355_v15 = vadd.f32 %v10910_v12, %v10904_v49  ;;  %v5420_v6 = vmax.f32 %v10910_v12, 0.0  ;;  %v6076_v48 = vpack.c.bf16 %v10910_v12, %v10904_v49  ;;  %v8875_v12 = vld [vmem:[#allocation16] sm:$0xff]  }
 0xa78   : > { %v5363_v20 = vrot.slane %v5362_v30, 4  ;;  %v5453_v45 = vpack.c.bf16 %v5422_v29, %v5421_v17 }
 0xa79   : > { %v5356_v60 = vrot.slane %v5355_v15, 4  ;;  %v8092_v2 = vpop.f32.mrb[60].mxu1  ;;  %v5452_v24 = vpack.c.bf16 %v5420_v6, %v5419_v41 }
 0xa7a   : > { %v5364_v46 = vadd.f32 %v5363_v20, %v5362_v30  ;;  %v10927_v8 = vadd.f32 %v8346_v55, %v8092_v2  ;;  %v5292_v33 = vpop.f32.mrb[61].mxu1  ;;  %v8362_v30 = vadd.f32 %v10897_v3, %v5185_v13  ;;  %v10961_v20 = vadd.f32 %v10897_v3, %v5181_v58 }
 0xa7b   : > { %v5357_v11 = vadd.f32 %v5356_v60, %v5355_v15  ;;  %v10929_v23 = vadd.f32 %v8348_v38, %v5292_v33  ;;  %v8093_v1 = vpop.f32.mrb[62].mxu1  ;;  %8138 = vmatprep.mubr.bf16.mxu1 %v5452_v24  ;;  %v8849_v33 = vld [vmem:[#allocation14 + $0x118] sm:$0xff]  }
 0xa7c   : > { %v5365_v42 = vrot.slane %v5364_v46, 2  ;;  %v10933_v53 = vadd.f32 %v8346_v55, %v8093_v1  ;;  %v5295_v16 = vpop.f32.mrb[63].mxu1  ;;  %8139 = vmatmul.mubr.bf16.vlgmr.msra.gmra.mrb[72].mxu1 %v5453_v45  ;;  %v5425_v4 = vmax.f32 %v10927_v8, 0.0 }
 0xa7d   : > { %v5358_v39 = vrot.slane %v5357_v11, 2  ;;  %v5423_v44 = vmax.f32 %v10929_v23, 0.0  ;;  %v10939_v52 = vadd.f32 %v8348_v38, %v5295_v16  ;;  %8187 = vmatpush3.bf16.msra.mxu1 %v8843_v50 }
 0xa7e   : > { %v5366_v26 = vadd.f32 %v5365_v42, %v5364_v46  ;;  %v5376_v61 = vadd.f32 %v10933_v53, %v10927_v8  ;;  %v5426_v21 = vmax.f32 %v10933_v53, 0.0  ;;  %8188 = vmatprep.subr.bf16.mxu1 %v11295_v19  ;;  %v6079_v34 = vpack.c.bf16 %v10933_v53, %v10927_v8  ;;  %v8878_v8 = vld [vmem:[#allocation16 + $0x18] sm:$0xff]   ;;  %v8880_v53 = vld [vmem:[#allocation16 + $0x28] sm:$0xff]  }
 0xa7f   : > { %v5359_v32 = vadd.f32 %v5358_v39, %v5357_v11  ;;  %v5369_v51 = vadd.f32 %v10939_v52, %v10929_v23  ;;  %v5424_v57 = vmax.f32 %v10939_v52, 0.0  ;;  %v6078_v63 = vpack.c.bf16 %v10939_v52, %v10929_v23  ;;  %v8879_v23 = vld [vmem:[#allocation16 + $0x20] sm:$0xff]   ;;  %v8881_v52 = vld [vmem:[#allocation16 + $0x30] sm:$0xff]  }
 0xa80   : > { %v5367_v25 = vrot.slane %v5366_v26, 1  ;;  %v5377_v28 = vrot.slane %v5376_v61, 4  ;;  %v5455_v35 = vpack.c.bf16 %v5426_v21, %v5425_v4 }
 0xa81   : > { %v5360_v40 = vrot.slane %v5359_v32, 1  ;;  %v5370_v36 = vrot.slane %v5369_v51, 4  ;;  %v8096_v10 = vpop.f32.mrb[64].mxu1  ;;  %v5454_v22 = vpack.c.bf16 %v5424_v57, %v5423_v44  ;;  %8189 = vmatpush3.bf16.msra.mxu1 %v8845_v14 }
 0xa82   : > { %v5368_v43 = vadd.f32 %v5367_v25, %v5366_v26  ;;  %v5378_v55 = vadd.f32 %v5377_v28, %v5376_v61  ;;  %v10954_v18 = vadd.f32 %v8354_v31, %v8096_v10  ;;  %v5308_v17 = vpop.f32.mrb[65].mxu1  ;;  %8190 = vmatprep.subr.bf16.mxu1 %v11295_v19 }
 0xa83   : > { %v5361_v29 = vadd.f32 %v5360_v40, %v5359_v32  ;;  %v5371_v41 = vadd.f32 %v5370_v36, %v5369_v51  ;;  %v10958_v15 = vadd.f32 %v8356_v47, %v5308_v17  ;;  %v8097_v6 = vpop.f32.mrb[66].mxu1  ;;  %8142 = vmatprep.mubr.bf16.mxu1 %v5454_v22  ;;  %v8851_v51 = vld [vmem:[#allocation14 + $0x120] sm:$0xff]  }
 0xa84   : > { %v5412_v45 = vmul.f32 0.0625, %v5368_v43  ;;  %v5379_v0 = vrot.slane %v5378_v55, 2  ;;  %v5429_v62 = vmax.f32 %v10954_v18, 0.0  ;;  %v10964_v60 = vadd.f32 %v8354_v31, %v8097_v6  ;;  %v5311_v2 = vpop.f32.mrb[67].mxu1  ;;  %8143 = vmatmul.mubr.bf16.gmra.mrb[76].mxu1 %v5455_v35 }
 0xa85   : > { %v5411_v38 = vmul.f32 0.0625, %v5361_v29  ;;  %v5372_v24 = vrot.slane %v5371_v41, 2  ;;  %v5427_v50 = vmax.f32 %v10958_v15, 0.0  ;;  %v10967_v46 = vadd.f32 %v8356_v47, %v5311_v2  ;;  %8191 = vmatpush3.bf16.msra.mxu1 %v8847_v7  ;;  %v8853_v2 = vld [vmem:[#allocation14 + $0x128] sm:$0xff]  }
 0xa86   : > { %v5461_v11 = vmax.f32 %v5412_v45, 0.0  ;;  %v6102_v1 = vpack.c.bf16 %v5412_v45, %v5412_v45  ;;  %v5380_v3 = vadd.f32 %v5379_v0, %v5378_v55  ;;  %v5390_v5 = vadd.f32 %v10964_v60, %v10954_v18  ;;  %8192 = vmatprep.subr.bf16.mxu1 %v11295_v19 }
 0xa87   : > { %v5460_v56 = vmax.f32 %v5411_v38, 0.0  ;;  %v6101_v42 = vpack.c.bf16 %v5411_v38, %v5411_v38  ;;  %v5373_v16 = vadd.f32 %v5372_v24, %v5371_v41  ;;  %v5430_v13 = vmax.f32 %v10964_v60, 0.0 }
 0xa88   : > { %v5486_v58 = vpack.c.bf16 %v5461_v11, %v5461_v11  ;;  %v6118_v39 = vunpack.c.l.b16 %v6102_v1  ;;  %v5381_v4 = vrot.slane %v5380_v3, 1  ;;  %v5391_v44 = vrot.slane %v5390_v5, 4 }
 0xa89   : > { %v5485_v14 = vpack.c.bf16 %v5460_v56, %v5460_v56  ;;  %v6117_v26 = vunpack.c.l.b16 %v6101_v42  ;;  %v5374_v61 = vrot.slane %v5373_v16, 1  ;;  %v5383_v21 = vadd.f32 %v10967_v46, %v10958_v15  ;;  %v8100_v32 = vpop.f32.mrb[68].mxu1  ;;  %8193 = vmatpush3.bf16.msra.mxu1 %v8849_v33 }
 0xa8a   : > { %v5502_v57 = vunpack.c.l.b16 %v5486_v58  ;;  %v5382_v25 = vadd.f32 %v5381_v4, %v5380_v3  ;;  %v5392_v28 = vadd.f32 %v5391_v44, %v5390_v5  ;;  %v5428_v31 = vmax.f32 %v10967_v46, 0.0  ;;  %v5324_v35 = vpop.f32.mrb[69].mxu1  ;;  %8194 = vmatprep.subr.bf16.mxu1 %v11295_v19 }
 0xa8b   : > { %v5501_v40 = vunpack.c.l.b16 %v5485_v14  ;;  %v6125_v36 = vsel %vm2148_vm1, %v6118_v39, %v6117_v26  ;;  %v5375_v10 = vadd.f32 %v5374_v61, %v5373_v16  ;;  %v5384_v47 = vrot.slane %v5383_v21, 4  ;;  %v8101_v22 = vpop.f32.mrb[70].mxu1  ;;  %v8855_v26 = vld [vmem:[#allocation14 + $0x130] sm:$0xff]  }
 0xa8c   : > { %v5414_v7 = vmul.f32 0.0625, %v5382_v25  ;;  %v5393_v43 = vrot.slane %v5392_v28, 2  ;;  %v10978_v55 = vadd.f32 %v8362_v30, %v8100_v32  ;;  %v10981_v17 = vadd.f32 %v10961_v20, %v5324_v35  ;;  %v5327_v29 = vpop.f32.mrb[71].mxu1 }
 0xa8d   : > { %v5509_v41 = vsel %vm2148_vm1, %v5502_v57, %v5501_v40  ;;  %v5413_v6 = vmul.f32 0.0625, %v5375_v10  ;;  %v5385_v45 = vadd.f32 %v5384_v47, %v5383_v21  ;;  %v10984_v0 = vadd.f32 %v8362_v30, %v8101_v22  ;;  %8195 = vmatpush3.bf16.msra.mxu1 %v8851_v51 }
 0xa8e   : > { %v5463_v38 = vmax.f32 %v5414_v7, 0.0  ;;  %v6104_v24 = vpack.c.bf16 %v5414_v7, %v5414_v7  ;;  %v5394_v33 = vadd.f32 %v5393_v43, %v5392_v28  ;;  %v5433_v11 = vmax.f32 %v10978_v55, 0.0  ;;  %8196 = vmatprep.subr.bf16.mxu1 %v11295_v19 }
 0xa8f   : > { %v5462_v1 = vmax.f32 %v5413_v6, 0.0  ;;  %v6103_v3 = vpack.c.bf16 %v5413_v6, %v5413_v6  ;;  %v5386_v5 = vrot.slane %v5385_v45, 2  ;;  %v5431_v56 = vmax.f32 %v10981_v17, 0.0 }
 0xa90   : > { %v5488_v42 = vpack.c.bf16 %v5463_v38, %v5463_v38  ;;  %v6120_v16 = vunpack.c.l.b16 %v6104_v24  ;;  %v5395_v58 = vrot.slane %v5394_v33, 1  ;;  %v5404_v30 = vadd.f32 %v10984_v0, %v10978_v55 }
 0xa91   : > { %v5487_v39 = vpack.c.bf16 %v5462_v1, %v5462_v1  ;;  %v6119_v4 = vunpack.c.l.b16 %v6103_v3  ;;  %v5387_v44 = vadd.f32 %v5386_v5, %v5385_v45  ;;  %v5434_v14 = vmax.f32 %v10984_v0, 0.0  ;;  %8197 = vmatpush3.bf16.msra.mxu1 %v8853_v2 }
 0xa92   : > { %v5504_v61 = vunpack.c.l.b16 %v5488_v42  ;;  %v5396_v21 = vadd.f32 %v5395_v58, %v5394_v33  ;;  %v5405_v32 = vrot.slane %v5404_v30, 4  ;;  %v5456_v51 = vpack.c.bf16 %v5428_v31, %v5427_v50  ;;  %8198 = vmatprep.subr.bf16.mxu1 %v11295_v19 }
 0xa93   : > { %v5503_v57 = vunpack.c.l.b16 %v5487_v39  ;;  %v6126_v25 = vsel %vm2150_vm2, %v6119_v4, %v6125_v36  ;;  %v5388_v28 = vrot.slane %v5387_v44, 1  ;;  %v10997_v35 = vadd.f32 %v10961_v20, %v5327_v29  ;;  %v8857_v20 = vld [vmem:[#allocation14 + $0x138] sm:$0xff]  }
 0xa94   : > { %v5416_v40 = vmul.f32 0.0625, %v5396_v21  ;;  %v6127_v10 = vsel %vm2152_vm3, %v6120_v16, %v6126_v25  ;;  %v5406_v47 = vadd.f32 %v5405_v32, %v5404_v30  ;;  %8146 = vmatprep.mubr.bf16.mxu1 %v5456_v51  ;;  %v5457_v22 = vpack.c.bf16 %v5430_v13, %v5429_v62 }
 0xa95   : > { %v5389_v50 = vadd.f32 %v5388_v28, %v5387_v44  ;;  %v5397_v31 = vadd.f32 %v10997_v35, %v10981_v17  ;;  %v5432_v36 = vmax.f32 %v10997_v35, 0.0  ;;  %v5459_v7 = vpack.c.bf16 %v5434_v14, %v5433_v11  ;;  %8199 = vmatpush3.bf16.msra.mxu1 %v8855_v26 }
 0xa96   : > { %v5465_v43 = vmax.f32 %v5416_v40, 0.0  ;;  %v5407_v29 = vrot.slane %v5406_v47, 2  ;;  %8147 = vmatmul.mubr.bf16.gmra.mrb[80].mxu1 %v5457_v22  ;;  %8200 = vmatprep.subr.bf16.mxu1 %v11295_v19  ;;  %v5510_v6 = vsel %vm2150_vm2, %v5503_v57, %v5509_v41  ;;  %v6106_v13 = vpack.c.bf16 %v5416_v40, %v5416_v40 }
 0xa97   : > { %v5415_v45 = vmul.f32 0.0625, %v5389_v50  ;;  %v5398_v2 = vrot.slane %v5397_v31, 4  ;;  %v5458_v38 = vpack.c.bf16 %v5432_v36, %v5431_v56  ;;  %v5511_v62 = vsel %vm2152_vm3, %v5504_v61, %v5510_v6 }
 0xa98   : > { %v5408_v24 = vadd.f32 %v5407_v29, %v5406_v47  ;;  %v5490_v42 = vpack.c.bf16 %v5465_v43, %v5465_v43  ;;  %v6122_v4 = vunpack.c.l.b16 %v6106_v13  ;;  %v11301_v49 = vpack.c.bf16 %v10964_v60, %v10954_v18 }
 0xa99   : > { %v5464_v11 = vmax.f32 %v5415_v45, 0.0  ;;  %v6105_v1 = vpack.c.bf16 %v5415_v45, %v5415_v45  ;;  %v5399_v3 = vadd.f32 %v5398_v2, %v5397_v31  ;;  %8150 = vmatprep.mubr.bf16.mxu1 %v5458_v38  ;;  %8201 = vmatpush3.bf16.msra.mxu1 %v8857_v20  ;;  %v11302_v9 = vpack.c.bf16 %v10997_v35, %v10981_v17 }
 0xa9a   : > { %v5409_v41 = vrot.slane %v5408_v24, 1  ;;  %8238 = vmatprep.subr.bf16.mxu1 %v11295_v19  ;;  %v5506_v21 = vunpack.c.l.b16 %v5490_v42  ;;  %v8862_v42 = vld [vmem:[#allocation11 + $0x118] sm:$0xff]   ;;  %v11303_v54 = vpack.c.bf16 %v10984_v0, %v10978_v55 }
 0xa9b   : > { %v5489_v58 = vpack.c.bf16 %v5464_v11, %v5464_v11  ;;  %v6121_v30 = vunpack.c.l.b16 %v6105_v1  ;;  %v5400_v39 = vrot.slane %v5399_v3, 2  ;;  %v8859_v11 = vld [vmem:[#allocation11 + $0x100] sm:$0xff]   ;;  %v8860_v1 = vld [vmem:[#allocation11 + $0x108] sm:$0xff]  }
 0xa9c   : > { %v5410_v44 = vadd.f32 %v5409_v41, %v5408_v24  ;;  %8154 = vmatprep.subr.bf16.mxu0 %v8859_v11  ;;  %v8863_v41 = vld [vmem:[#allocation11 + $0x120] sm:$0xff]  }
 0xa9d   : > { %v5505_v14 = vunpack.c.l.b16 %v5489_v58  ;;  %v6128_v26 = vsel %vm2154_vm4, %v6121_v30, %v6127_v10  ;;  %v5401_v61 = vadd.f32 %v5400_v39, %v5399_v3  ;;  %v8861_v3 = vld [vmem:[#allocation11 + $0x110] sm:$0xff]   ;;  %v8864_v58 = vld [vmem:[#allocation11 + $0x128] sm:$0xff]   ;;  %v8866_v39 = vld [vmem:[#allocation11 + $0x138] sm:$0xff]  }
 0xa9e   : > { %v5418_v32 = vmul.f32 0.0625, %v5410_v44  ;;  %8151 = vmatmul.mubr.bf16.gmra.mrb[84].mxu1 %v5459_v7  ;;  %v6129_v51 = vsel %vm2156_vm5, %v6122_v4, %v6128_v26  ;;  %v8865_v30 = vld [vmem:[#allocation11 + $0x130] sm:$0xff]   ;;  %v11031_v4 = vld [vmem:[#allocation13 + $0x100] sm:$0xff]  }
 0xa9f   : > { %v5402_v57 = vrot.slane %v5401_v61, 1  ;;  %8202 = vmatprep.mubr.msk.bf16.mxu1 %vm9234_vm0, %v11295_v19  ;;  %v5512_v25 = vsel %vm2154_vm4, %v5505_v14, %v5511_v62 }
 0xaa0   : > { %v5513_v28 = vsel %vm2156_vm5, %v5506_v21, %v5512_v25  ;;  %v5467_v47 = vmax.f32 %v5418_v32, 0.0  ;;  %v6108_v50 = vpack.c.bf16 %v5418_v32, %v5418_v32 }
 0xaa1   : > { %v5403_v40 = vadd.f32 %v5402_v57, %v5401_v61 }
 0xaa2   : > { %v5492_v36 = vpack.c.bf16 %v5467_v47, %v5467_v47  ;;  %v6124_v7 = vunpack.c.l.b16 %v6108_v50 }
 0xaa3   : > { %v5417_v22 = vmul.f32 0.0625, %v5403_v40 }
 0xaa4   : > { %v5508_v2 = vunpack.c.l.b16 %v5492_v36 }
 0xaa5   : > { %v5466_v31 = vmax.f32 %v5417_v22, 0.0  ;;  %v6107_v10 = vpack.c.bf16 %v5417_v22, %v5417_v22 }
 0xaa7   : > { %v5491_v20 = vpack.c.bf16 %v5466_v31, %v5466_v31  ;;  %v6123_v43 = vunpack.c.l.b16 %v6107_v10 }
 0xaa9   : > { %v6130_v29 = vsel %vm2158_vm6, %v6123_v43, %v6129_v51  ;;  %v5507_v6 = vunpack.c.l.b16 %v5491_v20 }
 0xaaa   : > { %v6131_v45 = vsel %vm2160_vm7, %v6124_v7, %v6130_v29 }
 0xaab   : > { %v6132_v38 = vpack.c.b16 %v6131_v45, %v6131_v45  ;;  %v5514_v62 = vsel %vm2158_vm6, %v5507_v6, %v5513_v28 }
 0xaac   : > { %v5515_v13 = vsel %vm2160_vm7, %v5508_v2, %v5514_v62 }
 0xaad   : > { %8203 = vmatmul.mubr.bf16.vlgmr.msra.gmra.mrb[88].mxu1 %v6132_v38  ;;  %v5516_v24 = vpack.c.b16 %v5515_v13, %v5515_v13 }
 0xaae   : > { %8254 = vmatprep.mubr.msk.bf16.mxu1 %vm9234_vm0, %v11295_v19  ;;  %8239 = vmatpush3.bf16.msra.mxu1 %v8875_v12 }
 0xaaf   : > { %8119 = vmatmul.mubr.bf16.vlgmr.msra.gmra.mrb[80].mxu0 %v5516_v24  ;;  %8240 = vmatprep.subr.bf16.mxu1 %v11295_v19 }
 0xab0   : > { %8155 = vmatpush3.bf16.msra.mxu0 %v8859_v11 }
 0xab1   : > { %8156 = vmatprep.subr.bf16.mxu0 %v8860_v1 }
 0xab4   : > { %8157 = vmatpush3.bf16.msra.mxu0 %v8860_v1 }
 0xab5   : > { %8158 = vmatprep.subr.bf16.mxu0 %v8861_v3 }
 0xab8   : > { %8159 = vmatpush3.bf16.msra.mxu0 %v8861_v3 }
 0xab9   : > { %8160 = vmatprep.subr.bf16.mxu0 %v8862_v42 }
 0xabc   : > { %8161 = vmatpush3.bf16.msra.mxu0 %v8862_v42 }
 0xabd   : > { %8162 = vmatprep.subr.bf16.mxu0 %v8863_v41 }
 0xac0   : > { %8163 = vmatpush3.bf16.msra.mxu0 %v8863_v41 }
 0xac1   : > { %8164 = vmatprep.subr.bf16.mxu0 %v8864_v58 }
 0xac4   : > { %8165 = vmatpush3.bf16.msra.mxu0 %v8864_v58 }
 0xac5   : > { %8166 = vmatprep.subr.bf16.mxu0 %v8865_v30 }
 0xac8   : > { %8167 = vmatpush3.bf16.msra.mxu0 %v8865_v30 }
 0xac9   : > { %8168 = vmatprep.subr.bf16.mxu0 %v8866_v39 }
 0xacc   : > { %8169 = vmatpush3.bf16.msra.mxu0 %v8866_v39 }
 0xacd   : > { %8206 = vmatprep.subr.bf16.mxu0 %v11031_v4 }
 0xb4f   : > { %v8140_v44 = vpop.f32.mrb[72].mxu1 }
 0xb50   : > { %v5778_v14 = vpop.f32.mrb[73].mxu1 }
 0xb51   : > { %v8141_v26 = vpop.f32.mrb[74].mxu1 }
 0xb52   : > { %v5781_v61 = vpop.f32.mrb[75].mxu1 }
 0xb57   : > { %v8144_v21 = vpop.f32.mrb[76].mxu1 }
 0xb58   : > { %v5794_v32 = vpop.f32.mrb[77].mxu1 }
 0xb59   : > { %v8145_v51 = vpop.f32.mrb[78].mxu1 }
 0xb5a   : > { %v5797_v57 = vpop.f32.mrb[79].mxu1 }
 0xb69   : > { %v11034_v25 = vpop.f32.mrb[80].mxu1 }
 0xb6a   : > { %v5810_v28 = vpop.f32.mrb[81].mxu1 }
 0xb6b   : > { %v11036_v40 = vpop.f32.mrb[82].mxu1 }
 0xb6c   : > { %v11038_v47 = vpop.f32.mrb[83].mxu1 }
 0xb71   : > { %v11040_v22 = vpop.f32.mrb[84].mxu1 }
 0xb72   : > { %v11042_v50 = vpop.f32.mrb[85].mxu1 }
 0xb73   : > { %v11044_v31 = vpop.f32.mrb[86].mxu1 }
 0xb74   : > { %v11046_v10 = vpop.f32.mrb[87].mxu1 }
 0xb80   : > { %v11048_v36 = vpop.f32.mrb[88].mxu1 }
 0xb81   : > { %v8204_v20 = vpop.f32.mrb[89].mxu1 }
 0xb82   : > { %v5600_v43 = vpop.f32.mrb[80].mxu0  ;;  %v6219_v7 = vpop.f32.mrb[90].mxu1 }
 0xb83   : > { %v5607_v29 = vcombine.high %v5600_v43, %v5600_v43  ;;  %v8120_v6 = vpop.f32.mrb[81].mxu0  ;;  %v8205_v45 = vpop.f32.mrb[91].mxu1  ;;  %v5614_v2 = vrot.slane %v5600_v43, %v10255_v27  ;;  %v11061_v7 = vld [vmem:[%s11218_s7 + $0x4] ss:$0 sm:$0xff] }
 0xb84   : > { %v5603_v38 = vpop.f32.mrb[82].mxu0 }
 0xb85   : > { %v8121_v62 = vpop.f32.mrb[83].mxu0  ;;  %v5621_v13 = vrot.slane %v5607_v29, %v10255_v27  ;;  %v5622_v24 = vcombine.high %v5614_v2, %v5614_v2  ;;  %v5630_v11 = vrot.slane %v5614_v2, %v10255_v27 }
 0xb87   : > { %v5623_v1 = vcombine.high %v5621_v13, %v5621_v13  ;;  %v5637_v3 = vrot.slane %v5621_v13, %v10255_v27  ;;  %v5644_v42 = vrot.slane %v5622_v24, %v10255_v27  ;;  %v5652_v41 = vcombine.high %v5630_v11, %v5630_v11 }
 0xb88   : > { %v5659_v58 = vrot.slane %v5630_v11, %v10260_v37 }
 0xb89   : > { %v5651_v30 = vrot.slane %v5623_v1, %v10255_v27  ;;  %v5653_v39 = vcombine.high %v5637_v3, %v5637_v3  ;;  %v5654_v20 = vcombine.high %v5644_v42, %v5644_v42  ;;  %v5663_v43 = vrot.slane %v5644_v42, %v10260_v37 }
 0xb8a   : > { %v5667_v29 = vrot.slane %v5652_v41, %v10260_v37  ;;  %v5675_v6 = vrot.slane %v5637_v3, %v10260_v37  ;;  %v5779_v45 = vadd.f32 %v5778_v14, %v5659_v58  ;;  %v5782_v2 = vadd.f32 %v5781_v61, %v5659_v58 }
 0xb8b   : > { %v5655_v38 = vcombine.high %v5651_v30, %v5651_v30  ;;  %v5671_v62 = vrot.slane %v5654_v20, %v10260_v37  ;;  %v5679_v13 = vrot.slane %v5651_v30, %v10260_v37  ;;  %v5683_v24 = vrot.slane %v5653_v39, %v10260_v37 }
 0xb8c   : > { %v5787_v11 = vadd.f32 %v8140_v44, %v5663_v43  ;;  %v5790_v1 = vadd.f32 %v8141_v26, %v5663_v43  ;;  %v5849_v42 = vadd.f32 %v11061_v7, %v5779_v45  ;;  %v5850_v16 = vadd.f32 %v11061_v7, %v5782_v2  ;;  %v8868_v2 = vld [vmem:[#allocation13 + $0x108] sm:$0xff]  }
 0xb8d   : > { %v5795_v56 = vadd.f32 %v5794_v32, %v5667_v29  ;;  %v5798_v5 = vadd.f32 %v5797_v57, %v5667_v29  ;;  %v5803_v41 = vadd.f32 %v8144_v21, %v5671_v62  ;;  %v5806_v33 = vadd.f32 %v8145_v51, %v5671_v62 }
 0xb8e   : > { %v5865_v3 = vmax.f32 %v5849_v42, 0.0  ;;  %v5866_v14 = vmax.f32 %v5850_v16, 0.0  ;;  %v5851_v61 = vadd.f32 %v11061_v7, %v5787_v11  ;;  %v5852_v58 = vadd.f32 %v11061_v7, %v5790_v1 }
 0xb8f   : > { %v5853_v30 = vadd.f32 %v11061_v7, %v5795_v56  ;;  %v5854_v39 = vadd.f32 %v11061_v7, %v5798_v5  ;;  %v5855_v44 = vadd.f32 %v11061_v7, %v5803_v41  ;;  %v5856_v26 = vadd.f32 %v11061_v7, %v5806_v33 }
 0xb90   : > { %v5898_v20 = vpack.c.bf16 %v5866_v14, %v5865_v3  ;;  %v5867_v43 = vmax.f32 %v5851_v61, 0.0  ;;  %v5868_v32 = vmax.f32 %v5852_v58, 0.0  ;;  %v5811_v57 = vadd.f32 %v5810_v28, %v5675_v6 }
 0xb91   : > { %v5869_v21 = vmax.f32 %v5853_v30, 0.0  ;;  %v5870_v51 = vmax.f32 %v5854_v39, 0.0  ;;  %v5871_v29 = vmax.f32 %v5855_v44, 0.0  ;;  %v5872_v16 = vmax.f32 %v5856_v26, 0.0 }
 0xb92   : > { %8170 = vmatprep.mubr.bf16.mxu0 %v5898_v20  ;;  %v5899_v45 = vpack.c.bf16 %v5868_v32, %v5867_v43  ;;  %v5814_v62 = vadd.f32 %v11038_v47, %v5675_v6  ;;  %v5857_v56 = vadd.f32 %v11061_v7, %v5811_v57  ;;  %v5819_v5 = vadd.f32 %v11034_v25, %v5679_v13  ;;  %v8870_v20 = vld [vmem:[#allocation13 + $0x118] sm:$0xff]  }
 0xb93   : > { %v5900_v11 = vpack.c.bf16 %v5870_v51, %v5869_v21  ;;  %v5901_v1 = vpack.c.bf16 %v5872_v16, %v5871_v29  ;;  %v5822_v33 = vadd.f32 %v11036_v40, %v5679_v13  ;;  %v5827_v42 = vadd.f32 %v11042_v50, %v5683_v24  ;;  %v8869_v40 = vld [vmem:[#allocation13 + $0x110] sm:$0xff]  }
 0xb94   : > { %8171 = vmatmul.mubr.bf16.vlgmr.msra.gmra.mrb[84].mxu0 %v5899_v45  ;;  %v5858_v28 = vadd.f32 %v11061_v7, %v5814_v62  ;;  %v5873_v41 = vmax.f32 %v5857_v56, 0.0  ;;  %v5859_v3 = vadd.f32 %v11061_v7, %v5819_v5  ;;  %v5830_v14 = vadd.f32 %v11046_v10, %v5683_v24  ;;  %v8873_v51 = vld [vmem:[#allocation13 + $0x130] sm:$0xff]  }
 0xb95   : > { %8207 = vmatpush3.bf16.msra.mxu0 %v11031_v4  ;;  %8174 = vmatprep.mubr.bf16.mxu0 %v5900_v11  ;;  %v5860_v47 = vadd.f32 %v11061_v7, %v5822_v33  ;;  %v5861_v25 = vadd.f32 %v11061_v7, %v5827_v42  ;;  %v5687_v6 = vrot.slane %v5655_v38, %v10260_v37 }
 0xb96   : > { %8208 = vmatprep.subr.bf16.mxu0 %v8868_v2  ;;  %v5874_v50 = vmax.f32 %v5858_v28, 0.0  ;;  %v5875_v13 = vmax.f32 %v5859_v3, 0.0  ;;  %v5862_v61 = vadd.f32 %v11061_v7, %v5830_v14  ;;  %v11300_v29 = vpack.c.bf16 %v10967_v46, %v10958_v15 }
 0xb97   : > { %v5876_v58 = vmax.f32 %v5860_v47, 0.0  ;;  %v5877_v30 = vmax.f32 %v5861_v25, 0.0  ;;  %v5835_v39 = vadd.f32 %v11040_v22, %v5687_v6  ;;  %v5838_v10 = vadd.f32 %v11044_v31, %v5687_v6  ;;  %v8871_v22 = vld [vmem:[#allocation13 + $0x120] sm:$0xff]   ;;  %v8872_v31 = vld [vmem:[#allocation13 + $0x128] sm:$0xff]  }
 0xb98   : > { %v5902_v4 = vpack.c.bf16 %v5874_v50, %v5873_v41  ;;  %v5878_v24 = vmax.f32 %v5862_v61, 0.0  ;;  %v6223_v46 = vcombine.high %v11048_v36, %v11048_v36 }
 0xb99   : > { %8209 = vmatpush3.bf16.msra.mxu0 %v8868_v2  ;;  %v5903_v44 = vpack.c.bf16 %v5876_v58, %v5875_v13  ;;  %v5863_v26 = vadd.f32 %v11061_v7, %v5835_v39  ;;  %v5864_v38 = vadd.f32 %v11061_v7, %v5838_v10  ;;  %v8874_v7 = vld [vmem:[#allocation13 + $0x138] sm:$0xff]  }
 0xb9a   : > { %8210 = vmatprep.subr.bf16.mxu0 %v8869_v40  ;;  %v5904_v43 = vpack.c.bf16 %v5878_v24, %v5877_v30  ;;  %v6237_v0 = vrot.slane %v6223_v46, %v10255_v27 }
 0xb9b   : > { %v5879_v32 = vmax.f32 %v5863_v26, 0.0  ;;  %v5880_v57 = vmax.f32 %v5864_v38, 0.0 }
 0xb9c   : > { %8175 = vmatmul.mubr.bf16.gmra.mrb[88].mxu0 %v5901_v1  ;;  %v6239_v1 = vcombine.high %v6237_v0, %v6237_v0  ;;  %v6253_v50 = vrot.slane %v6237_v0, %v10255_v27 }
 0xb9d   : > { %8211 = vmatpush3.bf16.msra.mxu0 %v8869_v40  ;;  %8178 = vmatprep.mubr.bf16.mxu0 %v5902_v4  ;;  %v5905_v21 = vpack.c.bf16 %v5880_v57, %v5879_v32 }
 0xb9e   : > { %8212 = vmatprep.subr.bf16.mxu0 %v8870_v20  ;;  %v6267_v40 = vrot.slane %v6239_v1, %v10255_v27 }
 0xba1   : > { %8213 = vmatpush3.bf16.msra.mxu0 %v8870_v20 }
 0xba2   : > { %8214 = vmatprep.subr.bf16.mxu0 %v8871_v22 }
 0xba4   : > { %8179 = vmatmul.mubr.bf16.gmra.mrb[92].mxu0 %v5903_v44 }
 0xba5   : > { %8215 = vmatpush3.bf16.msra.mxu0 %v8871_v22  ;;  %8182 = vmatprep.mubr.bf16.mxu0 %v5904_v43  ;;  %v6295_v43 = vrot.slane %v6267_v40, %v10260_v37 }
 0xba6   : > { %8216 = vmatprep.subr.bf16.mxu0 %v8872_v31 }
 0xba9   : > { %8217 = vmatpush3.bf16.msra.mxu0 %v8872_v31 }
 0xbaa   : > { %8218 = vmatprep.subr.bf16.mxu0 %v8873_v51 }
 0xbac   : > { %8183 = vmatmul.mubr.bf16.gmra.mrb[96].mxu0 %v5905_v21  ;;  %v6291_v21 = vrot.slane %v6253_v50, %v10260_v37 }
 0xbad   : > { %8219 = vmatpush3.bf16.msra.mxu0 %v8873_v51  ;;  %8222 = vmatprep.mubr.bf16.mxu0 %v6076_v48  ;;  %v8877_v48 = vld [vmem:[#allocation16 + $0x10] sm:$0xff]  }
 0xbae   : > { %8220 = vmatprep.subr.bf16.mxu0 %v8874_v7 }
 0xbb1   : > { %8221 = vmatpush3.bf16.msra.mxu0 %v8874_v7 }
 0xbb4   : > { %8223 = vmatmul.mubr.bf16.vlgmr.msra.gmra.mrb[84].mxu0 %v6077_v59  ;;  %v8876_v59 = vld [vmem:[#allocation16 + $0x8] sm:$0xff]  }
 0xbb5   : > { %8226 = vmatprep.mubr.bf16.mxu0 %v6078_v63  ;;  %8241 = vmatpush3.bf16.msra.mxu1 %v8876_v59  ;;  %v6230_v63 = vrot.slane %v11048_v36, %v10255_v27 }
 0xbb6   : > { %8242 = vmatprep.subr.bf16.mxu1 %v11295_v19 }
 0xbb7   : > { %v6238_v18 = vcombine.high %v6230_v63, %v6230_v63  ;;  %v6246_v60 = vrot.slane %v6230_v63, %v10255_v27 }
 0xbb9   : > { %8243 = vmatpush3.bf16.msra.mxu1 %v8877_v48  ;;  %v6260_v15 = vrot.slane %v6238_v18, %v10255_v27  ;;  %v6275_v17 = vrot.slane %v6246_v60, %v10260_v37  ;;  %v6268_v45 = vcombine.high %v6246_v60, %v6246_v60 }
 0xbba   : > { %8244 = vmatprep.subr.bf16.mxu1 %v11295_v19 }
 0xbbb   : > { %v6279_v55 = vrot.slane %v6260_v15, %v10260_v37  ;;  %v6270_v16 = vcombine.high %v6260_v15, %v6260_v15  ;;  %v6283_v3 = vrot.slane %v6268_v45, %v10260_v37 }
 0xbbc   : > { %8227 = vmatmul.mubr.bf16.gmra.mrb[88].mxu0 %v6079_v34  ;;  %v8882_v34 = vld [vmem:[#allocation16 + $0x38] sm:$0xff]  }
 0xbbd   : > { %8230 = vmatprep.mubr.bf16.mxu0 %v11300_v29  ;;  %8245 = vmatpush3.bf16.msra.mxu1 %v8878_v8  ;;  %v6287_v28 = vrot.slane %v6270_v16, %v10260_v37  ;;  %v6269_v8 = vcombine.high %v6253_v50, %v6253_v50 }
 0xbbe   : > { %8246 = vmatprep.subr.bf16.mxu1 %v11295_v19 }
 0xbc1   : > { %8247 = vmatpush3.bf16.msra.mxu1 %v8879_v23 }
 0xbc2   : > { %8248 = vmatprep.subr.bf16.mxu1 %v11295_v19 }
 0xbc4   : > { %8231 = vmatmul.mubr.bf16.gmra.mrb[92].mxu0 %v11301_v49 }
 0xbc5   : > { %8234 = vmatprep.mubr.bf16.mxu0 %v11302_v9  ;;  %8249 = vmatpush3.bf16.msra.mxu1 %v8880_v53  ;;  %v6271_v9 = vcombine.high %v6267_v40, %v6267_v40 }
 0xbc6   : > { %8250 = vmatprep.subr.bf16.mxu1 %v11295_v19 }
 0xbc9   : > { %8251 = vmatpush3.bf16.msra.mxu1 %v8881_v52 }
 0xbca   : > { %8252 = vmatprep.subr.bf16.mxu1 %v11295_v19  ;;  %v11135_v19 = vld [vmem:[%s11220_s9 + $0x4] ss:$0 sm:$0xff] }
 0xbcb   : > { %v8370_v35 = vadd.f32 %v11135_v19, %v6279_v55  ;;  %v8372_v62 = vadd.f32 %v11135_v19, %v6275_v17  ;;  %v8378_v6 = vadd.f32 %v11135_v19, %v6287_v28  ;;  %v8380_v58 = vadd.f32 %v11135_v19, %v6283_v3 }
 0xbcc   : > { %8235 = vmatmul.mubr.bf16.gmra.mrb[96].mxu0 %v11303_v54  ;;  %v8386_v49 = vadd.f32 %v11135_v19, %v6295_v43  ;;  %v8388_v48 = vadd.f32 %v11135_v19, %v6291_v21 }
 0xbcd   : > { %8253 = vmatpush3.bf16.msra.mxu1 %v8882_v34 }
 0xc87   : > { %v8224_v2 = vpop.f32.mrb[84].mxu0 }
 0xc88   : > { %v8371_v56 = vadd.f32 %v8370_v35, %v8224_v2  ;;  %v6394_v36 = vpop.f32.mrb[85].mxu0 }
 0xc89   : > { %v8373_v5 = vadd.f32 %v8372_v62, %v6394_v36  ;;  %v8225_v11 = vpop.f32.mrb[86].mxu0 }
 0xc8a   : > { %v8375_v33 = vadd.f32 %v8370_v35, %v8225_v11  ;;  %v6397_v42 = vpop.f32.mrb[87].mxu0  ;;  %v6303_v35 = vrot.slane %v6271_v9, %v10260_v37 }
 0xc8b   : > { %v8377_v41 = vadd.f32 %v8372_v62, %v6397_v42  ;;  %v6299_v62 = vrot.slane %v6269_v8, %v10260_v37 }
 0xc8c   : > { %v6480_v14 = vadd.f32 %v8375_v33, %v8371_v56  ;;  %v8394_v3 = vadd.f32 %v11135_v19, %v6303_v35 }
 0xc8d   : > { %v6473_v47 = vadd.f32 %v8377_v41, %v8373_v5  ;;  %v8396_v40 = vadd.f32 %v11135_v19, %v6299_v62 }
 0xc8e   : > { %v6481_v25 = vrot.slane %v6480_v14, 4 }
 0xc8f   : > { %v6474_v13 = vrot.slane %v6473_v47, 4  ;;  %v8228_v61 = vpop.f32.mrb[88].mxu0 }
 0xc90   : > { %v6482_v30 = vadd.f32 %v6481_v25, %v6480_v14  ;;  %v8379_v39 = vadd.f32 %v8378_v6, %v8228_v61  ;;  %v6410_v10 = vpop.f32.mrb[89].mxu0 }
 0xc91   : > { %v6475_v4 = vadd.f32 %v6474_v13, %v6473_v47  ;;  %v8381_v24 = vadd.f32 %v8380_v58, %v6410_v10  ;;  %v8229_v44 = vpop.f32.mrb[90].mxu0 }
 0xc92   : > { %v6483_v26 = vrot.slane %v6482_v30, 2  ;;  %v8383_v38 = vadd.f32 %v8378_v6, %v8229_v44  ;;  %v6413_v20 = vpop.f32.mrb[91].mxu0 }
 0xc93   : > { %v6476_v32 = vrot.slane %v6475_v4, 2  ;;  %v8385_v57 = vadd.f32 %v8380_v58, %v6413_v20 }
 0xc94   : > { %v6484_v27 = vadd.f32 %v6483_v26, %v6482_v30  ;;  %v6494_v22 = vadd.f32 %v8383_v38, %v8379_v39 }
 0xc95   : > { %v6477_v31 = vadd.f32 %v6476_v32, %v6475_v4  ;;  %v6487_v51 = vadd.f32 %v8385_v57, %v8381_v24 }
 0xc96   : > { %v6485_v7 = vrot.slane %v6484_v27, 1  ;;  %v6495_v29 = vrot.slane %v6494_v22, 4 }
 0xc97   : > { %v6478_v54 = vrot.slane %v6477_v31, 1  ;;  %v6488_v12 = vrot.slane %v6487_v51, 4  ;;  %v8232_v59 = vpop.f32.mrb[92].mxu0 }
 0xc98   : > { %v6486_v23 = vadd.f32 %v6485_v7, %v6484_v27  ;;  %v6496_v53 = vadd.f32 %v6495_v29, %v6494_v22  ;;  %v8387_v52 = vadd.f32 %v8386_v49, %v8232_v59  ;;  %v6426_v34 = vpop.f32.mrb[93].mxu0 }
 0xc99   : > { %v6479_v63 = vadd.f32 %v6478_v54, %v6477_v31  ;;  %v6489_v18 = vadd.f32 %v6488_v12, %v6487_v51  ;;  %v8389_v15 = vadd.f32 %v8388_v48, %v6426_v34  ;;  %v8233_v60 = vpop.f32.mrb[94].mxu0 }
 0xc9a   : > { %v6530_v46 = vmul.f32 0.0625, %v6486_v23  ;;  %v6497_v55 = vrot.slane %v6496_v53, 2  ;;  %v8391_v17 = vadd.f32 %v8386_v49, %v8233_v60  ;;  %v6429_v0 = vpop.f32.mrb[95].mxu0 }
 0xc9b   : > { %v6529_v16 = vmul.f32 0.0625, %v6479_v63  ;;  %v6490_v45 = vrot.slane %v6489_v18, 2  ;;  %v8393_v2 = vadd.f32 %v8388_v48, %v6429_v0 }
 0xc9c   : > { %v6538_v56 = vmax.f32 %v6530_v46, 0.0  ;;  %v6498_v36 = vadd.f32 %v6497_v55, %v6496_v53  ;;  %v6508_v5 = vadd.f32 %v8391_v17, %v8387_v52 }
 0xc9d   : > { %v6537_v11 = vmax.f32 %v6529_v16, 0.0  ;;  %v6491_v1 = vadd.f32 %v6490_v45, %v6489_v18  ;;  %v6501_v33 = vadd.f32 %v8393_v2, %v8389_v15 }
 0xc9e   : > { %v6562_v42 = vpack.c.bf16 %v6538_v56, %v6538_v56  ;;  %v6499_v28 = vrot.slane %v6498_v36, 1  ;;  %v6509_v41 = vrot.slane %v6508_v5, 4 }
 0xc9f   : > { %v6561_v14 = vpack.c.bf16 %v6537_v11, %v6537_v11  ;;  %v6492_v47 = vrot.slane %v6491_v1, 1  ;;  %v6502_v25 = vrot.slane %v6501_v33, 4  ;;  %v8236_v6 = vpop.f32.mrb[96].mxu0 }
 0xca0   : > { %v6585_v50 = vunpack.c.l.b16 %v6562_v42  ;;  %v6500_v13 = vadd.f32 %v6499_v28, %v6498_v36  ;;  %v6510_v37 = vadd.f32 %v6509_v41, %v6508_v5  ;;  %v8395_v61 = vadd.f32 %v8394_v3, %v8236_v6  ;;  %v6442_v58 = vpop.f32.mrb[97].mxu0 }
 0xca1   : > { %v6584_v30 = vunpack.c.l.b16 %v6561_v14  ;;  %v6493_v39 = vadd.f32 %v6492_v47, %v6491_v1  ;;  %v6503_v10 = vadd.f32 %v6502_v25, %v6501_v33  ;;  %v8397_v4 = vadd.f32 %v8396_v40, %v6442_v58  ;;  %v8237_v24 = vpop.f32.mrb[98].mxu0 }
 0xca2   : > { %v6532_v44 = vmul.f32 0.0625, %v6500_v13  ;;  %v6511_v26 = vrot.slane %v6510_v37, 2  ;;  %v8399_v38 = vadd.f32 %v8394_v3, %v8237_v24  ;;  %v6445_v20 = vpop.f32.mrb[99].mxu0 }
 0xca3   : > { %v6592_v43 = vsel %vm2148_vm1, %v6585_v50, %v6584_v30  ;;  %v6531_v32 = vmul.f32 0.0625, %v6493_v39  ;;  %v6504_v57 = vrot.slane %v6503_v10, 2  ;;  %v8401_v21 = vadd.f32 %v8396_v40, %v6445_v20 }
 0xca4   : > { %v6540_v19 = vmax.f32 %v6532_v44, 0.0  ;;  %v6512_v27 = vadd.f32 %v6511_v26, %v6510_v37  ;;  %v6522_v22 = vadd.f32 %v8399_v38, %v8395_v61  ;;  %v7167_v61 = vld [vmem:[%s11305_s26] ss:$0 sm:$0xff] }
 0xca5   : > { %v6539_v31 = vmax.f32 %v6531_v32, 0.0  ;;  %v6505_v51 = vadd.f32 %v6504_v57, %v6503_v10  ;;  %v6515_v7 = vadd.f32 %v8401_v21, %v8397_v4 }
 0xca6   : > { %v6564_v29 = vpack.c.bf16 %v6540_v19, %v6540_v19  ;;  %v6513_v49 = vrot.slane %v6512_v27, 1  ;;  %v6523_v9 = vrot.slane %v6522_v22, 4 }
 0xca7   : > { %v6563_v54 = vpack.c.bf16 %v6539_v31, %v6539_v31  ;;  %v6506_v12 = vrot.slane %v6505_v51, 1  ;;  %v6516_v59 = vrot.slane %v6515_v7, 4 }
 0xca8   : > { %v6514_v48 = vadd.f32 %v6513_v49, %v6512_v27  ;;  %v6524_v8 = vadd.f32 %v6523_v9, %v6522_v22  ;;  %v6587_v34 = vunpack.c.l.b16 %v6564_v29 }
 0xca9   : > { %v6586_v23 = vunpack.c.l.b16 %v6563_v54  ;;  %v6507_v53 = vadd.f32 %v6506_v12, %v6505_v51  ;;  %v6517_v52 = vadd.f32 %v6516_v59, %v6515_v7 }
 0xcaa   : > { %v6534_v63 = vmul.f32 0.0625, %v6514_v48  ;;  %v6525_v18 = vrot.slane %v6524_v8, 2 }
 0xcab   : > { %v6593_v15 = vsel %vm2150_vm2, %v6586_v23, %v6592_v43  ;;  %v6533_v60 = vmul.f32 0.0625, %v6507_v53  ;;  %v6518_v46 = vrot.slane %v6517_v52, 2 }
 0xcac   : > { %v6542_v55 = vmax.f32 %v6534_v63, 0.0  ;;  %v6526_v17 = vadd.f32 %v6525_v18, %v6524_v8  ;;  %v6594_v0 = vsel %vm2152_vm3, %v6587_v34, %v6593_v15 }
 0xcad   : > { %v6541_v35 = vmax.f32 %v6533_v60, 0.0  ;;  %v6519_v16 = vadd.f32 %v6518_v46, %v6517_v52 }
 0xcae   : > { %v6566_v45 = vpack.c.bf16 %v6542_v55, %v6542_v55  ;;  %v6527_v2 = vrot.slane %v6526_v17, 1 }
 0xcaf   : > { %v6565_v62 = vpack.c.bf16 %v6541_v35, %v6541_v35  ;;  %v6520_v56 = vrot.slane %v6519_v16, 1 }
 0xcb0   : > { %v6528_v36 = vadd.f32 %v6527_v2, %v6526_v17  ;;  %v6589_v1 = vunpack.c.l.b16 %v6566_v45 }
 0xcb1   : > { %v6588_v5 = vunpack.c.l.b16 %v6565_v62  ;;  %v6521_v11 = vadd.f32 %v6520_v56, %v6519_v16 }
 0xcb2   : > { %v6536_v33 = vmul.f32 0.0625, %v6528_v36 }
 0xcb3   : > { %v6535_v42 = vmul.f32 0.0625, %v6521_v11  ;;  %v6595_v28 = vsel %vm2154_vm4, %v6588_v5, %v6594_v0 }
 0xcb4   : > { %v6544_v41 = vmax.f32 %v6536_v33, 0.0  ;;  %v6596_v3 = vsel %vm2156_vm5, %v6589_v1, %v6595_v28 }
 0xcb5   : > { %v6543_v14 = vmax.f32 %v6535_v42, 0.0 }
 0xcb6   : > { %v6568_v47 = vpack.c.bf16 %v6544_v41, %v6544_v41 }
 0xcb7   : > { %v6567_v25 = vpack.c.bf16 %v6543_v14, %v6543_v14 }
 0xcb8   : > { %v6591_v40 = vunpack.c.l.b16 %v6568_v47 }
 0xcb9   : > { %v6590_v6 = vunpack.c.l.b16 %v6567_v25 }
 0xcbb   : > { %v6597_v50 = vsel %vm2158_vm6, %v6590_v6, %v6596_v3 }
 0xcbc   : > { %v6598_v13 = vsel %vm2160_vm7, %v6591_v40, %v6597_v50 }
 0xcbd   : > { %v6599_v37 = vpack.c.b16 %v6598_v13, %v6598_v13 }
 0xcbf   : > { %8255 = vmatmul.mubr.bf16.vlgmr.msra.gmra.mrb[92].mxu1 %v6599_v37 }
 0xd92   : > { %v6683_v58 = vpop.f32.mrb[92].mxu1 }
 0xd93   : > { %v6684_v30 = vadd.f32 %v7167_v61, %v6683_v58  ;;  %v8256_v39 = vpop.f32.mrb[93].mxu1 }
 0xd94   : > { %v6686_v10 = vpop.f32.mrb[94].mxu1 }
 0xd95   : > { %6689 = vst [vmem:[%s586_s27] sm:$0xff] %v6684_v30  ;;  %v8257_v4 = vpop.f32.mrb[95].mxu1 }
 0xd96   : > { %9148 = shalt.err (!%p9145_p9)
}
 0xd97   : > { %s9149_s24 = scalar_lea.hbm %s11169_s23, 128  ;;  %s9153_s29 = scalar_lea.hbm %s11307_s18, 256 }
 0xd98   : > { %p9150_p12 = scmp.ne.s32.totalorder %s11169_s23, %s9149_s24  ;;  %p9154_p3 = scmp.lt.u32.totalorder %s11169_s23, %s11307_s18 }
 0xd99   : > { %p9155_p4 = scmp.lt.u32.totalorder %s9153_s29, %s9149_s24  ;;  %p9157_p8 = scmp.lt.u32.totalorder %s9149_s24, %s11169_s23 }
 0xd9a   : > { %p9151_p10 = pnand %p9150_p12, %p11308_p11 }
 0xd9b   : > { %p9156_p7 = por %p9155_p4, %p9154_p3 }
 0xd9c   : > { %p9152_p2 = pneg %p9151_p10 }
 0xd9d   : > { %p9158_p13 = por %p9157_p8, %p9156_p7 }
 0xd9f   : > { %p9159_p0 = pnand %p9158_p13, %p9152_p2 }
 0xda1   : > { %9162 = shalt.err (!%p9159_p0)
}
 0xda2   : > { %8550 = dma.vmem_to_hbm [thread:$0]  (%p11308_p11), %s11171_s25, 128, %s11169_s23, %s6691_s4  }
 0xda3 PF: > { %s11309_s26 = sld [smem:[#allocation27_spill]]  ;;  %s11310_s14 = sld [smem:[#allocation24_spill]] }
 0xda4   : > { %s11311_s27 = sld [smem:[#allocation31_spill]] }
 0xda9   : > { %p8602_p1 = scmp.ge.s32.totalorder %s11309_s26, 2  ;;  %s6716_s20 = sand.u32 1, %s11310_s14  }
 0xdaa   : > { %p11312_p6 = scmp.ne.s32.totalorder %s11311_s27, 0  ;;  %s6717_s28 = scalar_lea.sflag [#allocation4], %s6716_s20 }
 0xdac   : > { %p8581_p5 = pnand %p8602_p1, %p11312_p6 }
 0xdae   : > { %9200 = dma.done.wait (!%p8581_p5), %s6717_s28, 128  }
 0xdaf   : > { %9202 = vsyncadd (!%p8581_p5), %s6717_s28, 4294967168  ;;  %s11313_s16 = sld [smem:[#allocation28_spill]]  ;;  %s11314_s29 = sld [smem:[#allocation25_spill]] }
 0xdb0   : > { %s11315_s30 = sld [smem:[#allocation26_spill]]  ;;  %s11316_s15 = sld [smem:[#allocation29_spill]] }
 0xdb5   : > { %p29_p9 = scmp.ge.s32.totalorder %s11313_s16, 4  }
 0xdb7   :  { %31 = sbr.rel (!%p29_p9) target bundleno = 13 (0xd), region = 176 }
 0xdbe   :  { %6722 = vsyncpa [#allocation3], 1 }
 0xdbf   :  { %6724 = vsyncpa [#allocation3 + $0x1], 1 }
 0xdc0   :  { %6725 = vsyncpa [#allocation6], 1 }
 0xdc1   :  { %6726 = vsyncpa [#allocation9], 1 }
 0xdc2   :  { %6727 = vsyncpa [#allocation12], 1 }
 0xdc3   :  { %6728 = vsyncpa [#allocation15], 1 }
 0xdc4   :  { %6729 = vsyncpa [#allocation4], 1 }
 0xdc5   :  { %6731 = vsyncpa [#allocation4 + $0x1], 1 }

</bundles_post_ra>
